<compile_context>
chip_gen: v6e
topology: v6e:2x2x1
jax: 0.10.0
libtpu: 0.0.40
codegen_flags: <defaults>
</compile_context>

<pallas_src>
import jax
import jax.numpy as jnp
import numpy as np
from jax.experimental import pallas as pl
from jax.experimental.pallas import tpu as pltpu

BN_EPS = 1e-5
CPAD = 8          # pad the single input channel up to 8 sublanes
OUT_LANES = 128   # logits emitted lane-dense, sliced to 4 in the wrapper


# ----------------------------------------------------------------------------
# In-kernel building blocks
# ----------------------------------------------------------------------------
def _conv_bn_relu(h, w_ref, shift_ref, m_not_first, m_not_last):
    """h: (C_in, L).  w_ref: (C_out, 3*C_in) = [tap0 | tap1 | tap2] with the
    eval-mode BatchNorm scale already folded in.  shift_ref: (C_out, 1).
    Conv1d(k=3, padding=1, bias=False) + BN shift + ReLU."""
    L = h.shape[1]
    # h_m1[c, l] = h[c, l-1] (0 at l=0); h_p1[c, l] = h[c, l+1] (0 at l=L-1)
    h_m1 = jnp.where(m_not_first, pltpu.roll(h, 1, 1), 0.0)
    h_p1 = jnp.where(m_not_last, pltpu.roll(h, L - 1, 1), 0.0)
    hs = jnp.concatenate([h_m1, h, h_p1], axis=0)            # (3*C_in, L)
    y = jnp.dot(w_ref[...], hs, preferred_element_type=jnp.float32)
    return jnp.maximum(y + shift_ref[...], 0.0)


def _maxpool2(h, sel_ref):
    """MaxPool1d(kernel_size=2, stride=2) along lanes.
    m = max(h, h shifted left by one); sel picks even columns, so the wrapped
    value at the last lane is never read."""
    L = h.shape[1]
    h_p1 = pltpu.roll(h, L - 1, 1)                            # h[:, l+1] (wrap)
    m = jnp.maximum(h, h_p1)
    return jnp.dot(m, sel_ref[...], preferred_element_type=jnp.float32)


def make_signalnet_kernel(b_tile):
    def kernel(x_ref,
               w1a_ref, t1a_ref, w1b_ref, t1b_ref,
               w2a_ref, t2a_ref, w2b_ref, t2b_ref,
               sel1_ref, sel2_ref,
               fc1w_ref, fc1b_ref, fc2w_ref, fc2b_ref,
               out_ref):
        # Lane-boundary masks, hoisted so they are built once per grid step.
        def lane_masks(l):
            lane = jax.lax.broadcasted_iota(jnp.int32, (1, l), 1)
            return lane >= 1, lane < (l - 1)

        m512 = lane_masks(512)
        m256 = lane_masks(256)

        feats = []
        for b in range(b_tile):                                # static unroll
            h = x_ref[b]                                       # (8, 512)
            # enc1 block
            h = _conv_bn_relu(h, w1a_ref, t1a_ref, *m512)
            h = _conv_bn_relu(h, w1b_ref, t1b_ref, *m512)
            h = _maxpool2(h, sel1_ref)                         # (8, 256)
            # Dropout(0.1): identity at inference
            # enc2 block
            h = _conv_bn_relu(h, w2a_ref, t2a_ref, *m256)
            h = _conv_bn_relu(h, w2b_ref, t2b_ref, *m256)
            h = _maxpool2(h, sel2_ref)                         # (16, 128)
            # Dropout(0.1): identity at inference
            feats.append(h)

        # FC head, batched across the tile.  Channel-major flatten is realised
        # by contracting channel c of every sample against fc1w[c] (128, 256).
        acc = jnp.zeros((b_tile, 256), jnp.float32)
        for c in range(16):
            hc = jnp.concatenate([f[c:c + 1, :] for f in feats], axis=0)  # (B,128)
            acc = acc + jnp.dot(hc, fc1w_ref[c],
                                preferred_element_type=jnp.float32)
        h1 = acc + fc1b_ref[...]                               # (B, 256)
        # Dropout(0.1) between the Linear layers: identity at inference
        out_ref[...] = (jnp.dot(h1, fc2w_ref[...],
                                preferred_element_type=jnp.float32)
                        + fc2b_ref[...])                       # (B, 128) lane-dense

    return kernel


# ----------------------------------------------------------------------------
# Constant even-column selection matrix (for MaxPool compaction)
# ----------------------------------------------------------------------------
def even_select_matrix(L):  # (L, L//2): picks even columns
    j = np.arange(L)[:, None]
    i = np.arange(L // 2)[None, :]
    return jnp.asarray((j == 2 * i).astype(np.float32))


# ----------------------------------------------------------------------------
# Parameters (deterministic synthetic init; shapes follow SignalNet.__init__)
# ----------------------------------------------------------------------------
def init_params(key):
    ks = jax.random.split(key, 16)

    def conv_w(k, co, ci):
        return (0.3 * jax.random.normal(k, (co, ci, 3))).astype(jnp.float32)

    def bn(kg, kb, c):
        gamma = (1.0 + 0.1 * jax.random.normal(kg, (c,))).astype(jnp.float32)
        beta = (0.1 * jax.random.normal(kb, (c,))).astype(jnp.float32)
        mean = jnp.zeros((c,), jnp.float32)   # fresh BatchNorm1d running stats
        var = jnp.ones((c,), jnp.float32)
        return (gamma, beta, mean, var)

    p = {}
    p['w1a'] = conv_w(ks[0], 8, 1)
    p['bn1a'] = bn(ks[1], ks[2], 8)
    p['w1b'] = conv_w(ks[3], 8, 8)
    p['bn1b'] = bn(ks[4], ks[5], 8)
    p['w2a'] = conv_w(ks[6], 16, 8)
    p['bn2a'] = bn(ks[7], ks[8], 16)
    p['w2b'] = conv_w(ks[9], 16, 16)
    p['bn2b'] = bn(ks[10], ks[11], 16)
    p['fc1w'] = (0.02 * jax.random.normal(ks[12], (256, 16 * 128))).astype(jnp.float32)
    p['fc1b'] = (0.1 * jax.random.normal(ks[13], (256,))).astype(jnp.float32)
    p['fc2w'] = (0.1 * jax.random.normal(ks[14], (4, 256))).astype(jnp.float32)
    p['fc2b'] = (0.1 * jax.random.normal(ks[15], (4,))).astype(jnp.float32)
    return p


def prepare_kernel_params(p):
    """One-time weight prep: fold eval-mode BN scale into the conv taps, stack
    the 3 taps along C_in, pad conv1's single input channel to 8, reshape fc1
    to (c, l, out) for the channel-wise contraction, pre-transpose fc2 and pad
    it to 128 output lanes for dense stores."""
    def fold(bn):
        g, b, m, v = bn
        s = g / jnp.sqrt(v + BN_EPS)
        return s, b - m * s

    def stacked_taps(w, scale):  # (Cout, Cin, 3) -> (Cout, 3*Cin)
        w = w * scale[:, None, None]
        return jnp.concatenate([w[:, :, 0], w[:, :, 1], w[:, :, 2]], axis=1)

    s1a, t1a = fold(p['bn1a'])
    s1b, t1b = fold(p['bn1b'])
    s2a, t2a = fold(p['bn2a'])
    s2b, t2b = fold(p['bn2b'])

    w1a_p = jnp.pad(p['w1a'], ((0, 0), (0, CPAD - p['w1a'].shape[1]), (0, 0)))

    kp = {
        'w1a': stacked_taps(w1a_p, s1a), 't1a': t1a[:, None],
        'w1b': stacked_taps(p['w1b'], s1b), 't1b': t1b[:, None],
        'w2a': stacked_taps(p['w2a'], s2a), 't2a': t2a[:, None],
        'w2b': stacked_taps(p['w2b'], s2b), 't2b': t2b[:, None],
        'sel1': even_select_matrix(512),
        'sel2': even_select_matrix(256),
        # fc1: (256, 2048) -> (16, 128, 256), so fc1w_r[c, l, o] = fc1w[o, 128c+l]
        'fc1w': jnp.transpose(p['fc1w'].reshape(256, 16, 128), (1, 2, 0)),
        'fc1b': p['fc1b'][None, :],
        # fc2: pre-transposed once and lane-padded to 128 outputs
        'fc2w': jnp.pad(p['fc2w'].T, ((0, 0), (0, OUT_LANES - p['fc2w'].shape[0]))),
        'fc2b': jnp.pad(p['fc2b'][None, :], ((0, 0), (0, OUT_LANES - p['fc2b'].shape[0]))),
    }
    return kp


# ----------------------------------------------------------------------------
# Forward wrapper
# ----------------------------------------------------------------------------
def signal_net_forward(x, kp, *, b_tile=8):
    N, c_in, L = x.shape
    assert c_in == 1 and L == 512, "SignalNet.fc forces input (N, 1, 512)"

    B = min(b_tile, N)
    n_blocks = pl.cdiv(N, B)
    Npad = n_blocks * B

    # Pad batch to a multiple of the tile and in_channels 1 -> 8 (zeros).
    xp = jnp.pad(x.astype(jnp.float32),
                 ((0, Npad - N), (0, CPAD - c_in), (0, 0)))

    out = pl.pallas_call(
        make_signalnet_kernel(B),
        out_shape=jax.ShapeDtypeStruct((Npad, OUT_LANES), jnp.float32),
        grid=(n_blocks,),
        in_specs=[
            pl.BlockSpec((B, CPAD, L), lambda n: (n, 0, 0)),      # x tile
            pl.BlockSpec((8, 24), lambda n: (0, 0)),              # enc1 conv1 W
            pl.BlockSpec((8, 1), lambda n: (0, 0)),               # enc1 bn1 shift
            pl.BlockSpec((8, 24), lambda n: (0, 0)),              # enc1 conv2 W
            pl.BlockSpec((8, 1), lambda n: (0, 0)),               # enc1 bn2 shift
            pl.BlockSpec((16, 24), lambda n: (0, 0)),             # enc2 conv1 W
            pl.BlockSpec((16, 1), lambda n: (0, 0)),              # enc2 bn1 shift
            pl.BlockSpec((16, 48), lambda n: (0, 0)),             # enc2 conv2 W
            pl.BlockSpec((16, 1), lambda n: (0, 0)),              # enc2 bn2 shift
            pl.BlockSpec((512, 256), lambda n: (0, 0)),           # pool1 even-select
            pl.BlockSpec((256, 128), lambda n: (0, 0)),           # pool2 even-select
            pl.BlockSpec((16, 128, 256), lambda n: (0, 0, 0)),    # fc1 W (c,l,out)
            pl.BlockSpec((1, 256), lambda n: (0, 0)),             # fc1 b
            pl.BlockSpec((256, OUT_LANES), lambda n: (0, 0)),     # fc2 W (padded)
            pl.BlockSpec((1, OUT_LANES), lambda n: (0, 0)),       # fc2 b (padded)
        ],
        out_specs=pl.BlockSpec((B, OUT_LANES), lambda n: (n, 0)),
        compiler_params=pltpu.CompilerParams(dimension_semantics=("parallel",)),
    )(xp, kp['w1a'], kp['t1a'], kp['w1b'], kp['t1b'],
      kp['w2a'], kp['t2a'], kp['w2b'], kp['t2b'],
      kp['sel1'], kp['sel2'], kp['fc1w'], kp['fc1b'], kp['fc2w'], kp['fc2b'])

    return out[:N, :4]


# ----------------------------------------------------------------------------
# Pure-JAX reference (eval-mode PyTorch semantics) for a correctness check
# ----------------------------------------------------------------------------
def reference_forward(x, p):
    prec = jax.lax.Precision.HIGHEST

    def conv1d(h, w):
        return jax.lax.conv_general_dilated(
            h, w, window_strides=(1,), padding=((1, 1),),
            dimension_numbers=('NCH', 'OIH', 'NCH'), precision=prec)

    def bn_relu(h, bn):
        g, b, m, v = bn
        s = g / jnp.sqrt(v + BN_EPS)
        t = b - m * s
        return jnp.maximum(h * s[None, :, None] + t[None, :, None], 0.0)

    def pool(h):
        n_, c_, l_ = h.shape
        return jnp.max(h.reshape(n_, c_, l_ // 2, 2), axis=-1)

    h = bn_relu(conv1d(x, p['w1a']), p['bn1a'])
    h = bn_relu(conv1d(h, p['w1b']), p['bn1b'])
    h = pool(h)
    h = bn_relu(conv1d(h, p['w2a']), p['bn2a'])
    h = bn_relu(conv1d(h, p['w2b']), p['bn2b'])
    h = pool(h)
    hf = h.reshape(h.shape[0], -1)
    y = jnp.dot(hf, p['fc1w'].T, precision=prec) + p['fc1b']
    y = jnp.dot(y, p['fc2w'].T, precision=prec) + p['fc2b']
    return y


if __name__ == "__main__":
    key = jax.random.PRNGKey(0)
    pkey, xkey = jax.random.split(key)
    params = init_params(pkey)
    kparams = prepare_kernel_params(params)      # one-time weight prep
    x = jax.random.normal(xkey, (2, 1, 512), dtype=jnp.float32)  # (N, C_in=1, L=512)

    y = signal_net_forward(x, kparams)
    y = jax.block_until_ready(y)

    y_ref = reference_forward(x, params)
    if not np.allclose(np.asarray(y), np.asarray(y_ref), rtol=2e-2, atol=2e-2):
        raise AssertionError(
            f"Pallas output mismatch:\n{np.asarray(y)}\nvs reference\n{np.asarray(y_ref)}")
    print("KERNEL_OK")
</pallas_src>

<mosaic_0001>
module attributes {stable_mosaic.version = 11 : i64} {
  func.func @kernel(%arg0: i32, %arg1: memref<2x8x512xf32, #tpu.memory_space<vmem>>, %arg2: memref<8x24xf32, #tpu.memory_space<vmem>>, %arg3: memref<8x1xf32, #tpu.memory_space<vmem>>, %arg4: memref<8x24xf32, #tpu.memory_space<vmem>>, %arg5: memref<8x1xf32, #tpu.memory_space<vmem>>, %arg6: memref<16x24xf32, #tpu.memory_space<vmem>>, %arg7: memref<16x1xf32, #tpu.memory_space<vmem>>, %arg8: memref<16x48xf32, #tpu.memory_space<vmem>>, %arg9: memref<16x1xf32, #tpu.memory_space<vmem>>, %arg10: memref<512x256xf32, #tpu.memory_space<vmem>>, %arg11: memref<256x128xf32, #tpu.memory_space<vmem>>, %arg12: memref<16x128x256xf32, #tpu.memory_space<vmem>>, %arg13: memref<1x256xf32, #tpu.memory_space<vmem>>, %arg14: memref<256x128xf32, #tpu.memory_space<vmem>>, %arg15: memref<1x128xf32, #tpu.memory_space<vmem>>, %arg16: memref<2x128xf32, #tpu.memory_space<vmem>>) attributes {dimension_semantics = [#tpu.dimension_semantics<parallel>], iteration_bounds = array<i64: 1>, scalar_prefetch = 0 : i64, scratch_operands = 0 : i64, tpu.core_type = #tpu.core_type<tc>, window_params = [{transform_indices = @transform_0, window_bounds = array<i64: 2, 8, 512>}, {pipeline_mode = #tpu.pipeline_mode<synchronous>, transform_indices = @transform_1, window_bounds = array<i64: 8, 24>}, {pipeline_mode = #tpu.pipeline_mode<synchronous>, transform_indices = @transform_2, window_bounds = array<i64: 8, 1>}, {pipeline_mode = #tpu.pipeline_mode<synchronous>, transform_indices = @transform_3, window_bounds = array<i64: 8, 24>}, {pipeline_mode = #tpu.pipeline_mode<synchronous>, transform_indices = @transform_4, window_bounds = array<i64: 8, 1>}, {pipeline_mode = #tpu.pipeline_mode<synchronous>, transform_indices = @transform_5, window_bounds = array<i64: 16, 24>}, {pipeline_mode = #tpu.pipeline_mode<synchronous>, transform_indices = @transform_6, window_bounds = array<i64: 16, 1>}, {pipeline_mode = #tpu.pipeline_mode<synchronous>, transform_indices = @transform_7, window_bounds = array<i64: 16, 48>}, {pipeline_mode = #tpu.pipeline_mode<synchronous>, transform_indices = @transform_8, window_bounds = array<i64: 16, 1>}, {pipeline_mode = #tpu.pipeline_mode<synchronous>, transform_indices = @transform_9, window_bounds = array<i64: 512, 256>}, {pipeline_mode = #tpu.pipeline_mode<synchronous>, transform_indices = @transform_10, window_bounds = array<i64: 256, 128>}, {pipeline_mode = #tpu.pipeline_mode<synchronous>, transform_indices = @transform_11, window_bounds = array<i64: 16, 128, 256>}, {pipeline_mode = #tpu.pipeline_mode<synchronous>, transform_indices = @transform_12, window_bounds = array<i64: 1, 256>}, {pipeline_mode = #tpu.pipeline_mode<synchronous>, transform_indices = @transform_13, window_bounds = array<i64: 256, 128>}, {pipeline_mode = #tpu.pipeline_mode<synchronous>, transform_indices = @transform_14, window_bounds = array<i64: 1, 128>}, {transform_indices = @transform_15, window_bounds = array<i64: 2, 128>}]} {
    %0 = tpu.iota {dimensions = array<i32: 1>} : vector<1x512xi32>
    %c1_i32 = arith.constant 1 : i32
    %1 = vector.broadcast %c1_i32 : i32 to vector<1x512xi32>
    %2 = arith.cmpi sge, %0, %1 : vector<1x512xi32>
    %c511_i32 = arith.constant 511 : i32
    %3 = vector.broadcast %c511_i32 : i32 to vector<1x512xi32>
    %4 = arith.cmpi slt, %0, %3 : vector<1x512xi32>
    %5 = tpu.iota {dimensions = array<i32: 1>} : vector<1x256xi32>
    %c1_i32_0 = arith.constant 1 : i32
    %6 = vector.broadcast %c1_i32_0 : i32 to vector<1x256xi32>
    %7 = arith.cmpi sge, %5, %6 : vector<1x256xi32>
    %c255_i32 = arith.constant 255 : i32
    %8 = vector.broadcast %c255_i32 : i32 to vector<1x256xi32>
    %9 = arith.cmpi slt, %5, %8 : vector<1x256xi32>
    %c0 = arith.constant 0 : index
    %c0_1 = arith.constant 0 : index
    %c0_2 = arith.constant 0 : index
    %10 = vector.load %arg1[%c0, %c0_1, %c0_2] : memref<2x8x512xf32, #tpu.memory_space<vmem>>, vector<1x8x512xf32>
    %11 = vector.shape_cast %10 : vector<1x8x512xf32> to vector<8x512xf32>
    %c1_i32_3 = arith.constant 1 : i32
    %12 = tpu.dynamic_rotate %11 by %c1_i32_3 dim 1 : vector<8x512xf32>, i32 -> vector<8x512xf32>
    %cst = arith.constant 0.000000e+00 : f32
    %13 = vector.shape_cast %2 : vector<1x512xi1> to vector<1x512xi1>
    %14 = vector.broadcast %13 : vector<1x512xi1> to vector<8x512xi1>
    %15 = vector.broadcast %cst : f32 to vector<8x512xf32>
    %16 = arith.select %14, %12, %15 : vector<8x512xi1>, vector<8x512xf32>
    %c511_i32_4 = arith.constant 511 : i32
    %17 = tpu.dynamic_rotate %11 by %c511_i32_4 dim 1 : vector<8x512xf32>, i32 -> vector<8x512xf32>
    %cst_5 = arith.constant 0.000000e+00 : f32
    %18 = vector.shape_cast %4 : vector<1x512xi1> to vector<1x512xi1>
    %19 = vector.broadcast %18 : vector<1x512xi1> to vector<8x512xi1>
    %20 = vector.broadcast %cst_5 : f32 to vector<8x512xf32>
    %21 = arith.select %19, %17, %20 : vector<8x512xi1>, vector<8x512xf32>
    %22 = tpu.concatenate %16, %11, %21 in 0 : vector<8x512xf32>, vector<8x512xf32>, vector<8x512xf32> -> vector<24x512xf32>
    %c0_6 = arith.constant 0 : index
    %c0_7 = arith.constant 0 : index
    %23 = vector.load %arg2[%c0_6, %c0_7] : memref<8x24xf32, #tpu.memory_space<vmem>>, vector<8x24xf32>
    %cst_8 = arith.constant dense<0.000000e+00> : vector<8x512xf32>
    %24 = tpu.matmul %23, %22, %cst_8 {dimension_numbers = #tpu.dot_dimension_numbers<[1], [0], [0], [1], [0, 0, 1, 1], [], []>} : vector<8x24xf32>, vector<24x512xf32>, vector<8x512xf32> -> vector<8x512xf32>
    %c0_9 = arith.constant 0 : index
    %c0_10 = arith.constant 0 : index
    %25 = vector.load %arg3[%c0_9, %c0_10] : memref<8x1xf32, #tpu.memory_space<vmem>>, vector<8x1xf32>
    %26 = vector.broadcast %25 : vector<8x1xf32> to vector<8x512xf32>
    %27 = arith.addf %24, %26 : vector<8x512xf32>
    %cst_11 = arith.constant 0.000000e+00 : f32
    %28 = vector.broadcast %cst_11 : f32 to vector<8x512xf32>
    %29 = arith.maximumf %27, %28 : vector<8x512xf32>
    %c1_i32_12 = arith.constant 1 : i32
    %30 = tpu.dynamic_rotate %29 by %c1_i32_12 dim 1 : vector<8x512xf32>, i32 -> vector<8x512xf32>
    %cst_13 = arith.constant 0.000000e+00 : f32
    %31 = vector.shape_cast %2 : vector<1x512xi1> to vector<1x512xi1>
    %32 = vector.broadcast %31 : vector<1x512xi1> to vector<8x512xi1>
    %33 = vector.broadcast %cst_13 : f32 to vector<8x512xf32>
    %34 = arith.select %32, %30, %33 : vector<8x512xi1>, vector<8x512xf32>
    %c511_i32_14 = arith.constant 511 : i32
    %35 = tpu.dynamic_rotate %29 by %c511_i32_14 dim 1 : vector<8x512xf32>, i32 -> vector<8x512xf32>
    %cst_15 = arith.constant 0.000000e+00 : f32
    %36 = vector.shape_cast %4 : vector<1x512xi1> to vector<1x512xi1>
    %37 = vector.broadcast %36 : vector<1x512xi1> to vector<8x512xi1>
    %38 = vector.broadcast %cst_15 : f32 to vector<8x512xf32>
    %39 = arith.select %37, %35, %38 : vector<8x512xi1>, vector<8x512xf32>
    %40 = tpu.concatenate %34, %29, %39 in 0 : vector<8x512xf32>, vector<8x512xf32>, vector<8x512xf32> -> vector<24x512xf32>
    %c0_16 = arith.constant 0 : index
    %c0_17 = arith.constant 0 : index
    %41 = vector.load %arg4[%c0_16, %c0_17] : memref<8x24xf32, #tpu.memory_space<vmem>>, vector<8x24xf32>
    %cst_18 = arith.constant dense<0.000000e+00> : vector<8x512xf32>
    %42 = tpu.matmul %41, %40, %cst_18 {dimension_numbers = #tpu.dot_dimension_numbers<[1], [0], [0], [1], [0, 0, 1, 1], [], []>} : vector<8x24xf32>, vector<24x512xf32>, vector<8x512xf32> -> vector<8x512xf32>
    %c0_19 = arith.constant 0 : index
    %c0_20 = arith.constant 0 : index
    %43 = vector.load %arg5[%c0_19, %c0_20] : memref<8x1xf32, #tpu.memory_space<vmem>>, vector<8x1xf32>
    %44 = vector.broadcast %43 : vector<8x1xf32> to vector<8x512xf32>
    %45 = arith.addf %42, %44 : vector<8x512xf32>
    %cst_21 = arith.constant 0.000000e+00 : f32
    %46 = vector.broadcast %cst_21 : f32 to vector<8x512xf32>
    %47 = arith.maximumf %45, %46 : vector<8x512xf32>
    %c511_i32_22 = arith.constant 511 : i32
    %48 = tpu.dynamic_rotate %47 by %c511_i32_22 dim 1 : vector<8x512xf32>, i32 -> vector<8x512xf32>
    %49 = arith.maximumf %47, %48 : vector<8x512xf32>
    %c0_23 = arith.constant 0 : index
    %c0_24 = arith.constant 0 : index
    %50 = vector.load %arg10[%c0_23, %c0_24] : memref<512x256xf32, #tpu.memory_space<vmem>>, vector<512x256xf32>
    %cst_25 = arith.constant dense<0.000000e+00> : vector<8x256xf32>
    %51 = tpu.matmul %49, %50, %cst_25 {dimension_numbers = #tpu.dot_dimension_numbers<[1], [0], [0], [1], [0, 0, 1, 1], [], []>} : vector<8x512xf32>, vector<512x256xf32>, vector<8x256xf32> -> vector<8x256xf32>
    %c1_i32_26 = arith.constant 1 : i32
    %52 = tpu.dynamic_rotate %51 by %c1_i32_26 dim 1 : vector<8x256xf32>, i32 -> vector<8x256xf32>
    %cst_27 = arith.constant 0.000000e+00 : f32
    %53 = vector.shape_cast %7 : vector<1x256xi1> to vector<1x256xi1>
    %54 = vector.broadcast %53 : vector<1x256xi1> to vector<8x256xi1>
    %55 = vector.broadcast %cst_27 : f32 to vector<8x256xf32>
    %56 = arith.select %54, %52, %55 : vector<8x256xi1>, vector<8x256xf32>
    %c255_i32_28 = arith.constant 255 : i32
    %57 = tpu.dynamic_rotate %51 by %c255_i32_28 dim 1 : vector<8x256xf32>, i32 -> vector<8x256xf32>
    %cst_29 = arith.constant 0.000000e+00 : f32
    %58 = vector.shape_cast %9 : vector<1x256xi1> to vector<1x256xi1>
    %59 = vector.broadcast %58 : vector<1x256xi1> to vector<8x256xi1>
    %60 = vector.broadcast %cst_29 : f32 to vector<8x256xf32>
    %61 = arith.select %59, %57, %60 : vector<8x256xi1>, vector<8x256xf32>
    %62 = tpu.concatenate %56, %51, %61 in 0 : vector<8x256xf32>, vector<8x256xf32>, vector<8x256xf32> -> vector<24x256xf32>
    %c0_30 = arith.constant 0 : index
    %c0_31 = arith.constant 0 : index
    %63 = vector.load %arg6[%c0_30, %c0_31] : memref<16x24xf32, #tpu.memory_space<vmem>>, vector<16x24xf32>
    %cst_32 = arith.constant dense<0.000000e+00> : vector<16x256xf32>
    %64 = tpu.matmul %63, %62, %cst_32 {dimension_numbers = #tpu.dot_dimension_numbers<[1], [0], [0], [1], [0, 0, 1, 1], [], []>} : vector<16x24xf32>, vector<24x256xf32>, vector<16x256xf32> -> vector<16x256xf32>
    %c0_33 = arith.constant 0 : index
    %c0_34 = arith.constant 0 : index
    %65 = vector.load %arg7[%c0_33, %c0_34] : memref<16x1xf32, #tpu.memory_space<vmem>>, vector<16x1xf32>
    %66 = vector.broadcast %65 : vector<16x1xf32> to vector<16x256xf32>
    %67 = arith.addf %64, %66 : vector<16x256xf32>
    %cst_35 = arith.constant 0.000000e+00 : f32
    %68 = vector.broadcast %cst_35 : f32 to vector<16x256xf32>
    %69 = arith.maximumf %67, %68 : vector<16x256xf32>
    %c1_i32_36 = arith.constant 1 : i32
    %70 = tpu.dynamic_rotate %69 by %c1_i32_36 dim 1 : vector<16x256xf32>, i32 -> vector<16x256xf32>
    %cst_37 = arith.constant 0.000000e+00 : f32
    %71 = vector.shape_cast %7 : vector<1x256xi1> to vector<1x256xi1>
    %72 = vector.broadcast %71 : vector<1x256xi1> to vector<16x256xi1>
    %73 = vector.broadcast %cst_37 : f32 to vector<16x256xf32>
    %74 = arith.select %72, %70, %73 : vector<16x256xi1>, vector<16x256xf32>
    %c255_i32_38 = arith.constant 255 : i32
    %75 = tpu.dynamic_rotate %69 by %c255_i32_38 dim 1 : vector<16x256xf32>, i32 -> vector<16x256xf32>
    %cst_39 = arith.constant 0.000000e+00 : f32
    %76 = vector.shape_cast %9 : vector<1x256xi1> to vector<1x256xi1>
    %77 = vector.broadcast %76 : vector<1x256xi1> to vector<16x256xi1>
    %78 = vector.broadcast %cst_39 : f32 to vector<16x256xf32>
    %79 = arith.select %77, %75, %78 : vector<16x256xi1>, vector<16x256xf32>
    %80 = tpu.concatenate %74, %69, %79 in 0 : vector<16x256xf32>, vector<16x256xf32>, vector<16x256xf32> -> vector<48x256xf32>
    %c0_40 = arith.constant 0 : index
    %c0_41 = arith.constant 0 : index
    %81 = vector.load %arg8[%c0_40, %c0_41] : memref<16x48xf32, #tpu.memory_space<vmem>>, vector<16x48xf32>
    %cst_42 = arith.constant dense<0.000000e+00> : vector<16x256xf32>
    %82 = tpu.matmul %81, %80, %cst_42 {dimension_numbers = #tpu.dot_dimension_numbers<[1], [0], [0], [1], [0, 0, 1, 1], [], []>} : vector<16x48xf32>, vector<48x256xf32>, vector<16x256xf32> -> vector<16x256xf32>
    %c0_43 = arith.constant 0 : index
    %c0_44 = arith.constant 0 : index
    %83 = vector.load %arg9[%c0_43, %c0_44] : memref<16x1xf32, #tpu.memory_space<vmem>>, vector<16x1xf32>
    %84 = vector.broadcast %83 : vector<16x1xf32> to vector<16x256xf32>
    %85 = arith.addf %82, %84 : vector<16x256xf32>
    %cst_45 = arith.constant 0.000000e+00 : f32
    %86 = vector.broadcast %cst_45 : f32 to vector<16x256xf32>
    %87 = arith.maximumf %85, %86 : vector<16x256xf32>
    %c255_i32_46 = arith.constant 255 : i32
    %88 = tpu.dynamic_rotate %87 by %c255_i32_46 dim 1 : vector<16x256xf32>, i32 -> vector<16x256xf32>
    %89 = arith.maximumf %87, %88 : vector<16x256xf32>
    %c0_47 = arith.constant 0 : index
    %c0_48 = arith.constant 0 : index
    %90 = vector.load %arg11[%c0_47, %c0_48] : memref<256x128xf32, #tpu.memory_space<vmem>>, vector<256x128xf32>
    %cst_49 = arith.constant dense<0.000000e+00> : vector<16x128xf32>
    %91 = tpu.matmul %89, %90, %cst_49 {dimension_numbers = #tpu.dot_dimension_numbers<[1], [0], [0], [1], [0, 0, 1, 1], [], []>} : vector<16x256xf32>, vector<256x128xf32>, vector<16x128xf32> -> vector<16x128xf32>
    %c1 = arith.constant 1 : index
    %c0_50 = arith.constant 0 : index
    %c0_51 = arith.constant 0 : index
    %92 = vector.load %arg1[%c1, %c0_50, %c0_51] : memref<2x8x512xf32, #tpu.memory_space<vmem>>, vector<1x8x512xf32>
    %93 = vector.shape_cast %92 : vector<1x8x512xf32> to vector<8x512xf32>
    %c1_i32_52 = arith.constant 1 : i32
    %94 = tpu.dynamic_rotate %93 by %c1_i32_52 dim 1 : vector<8x512xf32>, i32 -> vector<8x512xf32>
    %cst_53 = arith.constant 0.000000e+00 : f32
    %95 = vector.shape_cast %2 : vector<1x512xi1> to vector<1x512xi1>
    %96 = vector.broadcast %95 : vector<1x512xi1> to vector<8x512xi1>
    %97 = vector.broadcast %cst_53 : f32 to vector<8x512xf32>
    %98 = arith.select %96, %94, %97 : vector<8x512xi1>, vector<8x512xf32>
    %c511_i32_54 = arith.constant 511 : i32
    %99 = tpu.dynamic_rotate %93 by %c511_i32_54 dim 1 : vector<8x512xf32>, i32 -> vector<8x512xf32>
    %cst_55 = arith.constant 0.000000e+00 : f32
    %100 = vector.shape_cast %4 : vector<1x512xi1> to vector<1x512xi1>
    %101 = vector.broadcast %100 : vector<1x512xi1> to vector<8x512xi1>
    %102 = vector.broadcast %cst_55 : f32 to vector<8x512xf32>
    %103 = arith.select %101, %99, %102 : vector<8x512xi1>, vector<8x512xf32>
    %104 = tpu.concatenate %98, %93, %103 in 0 : vector<8x512xf32>, vector<8x512xf32>, vector<8x512xf32> -> vector<24x512xf32>
    %c0_56 = arith.constant 0 : index
    %c0_57 = arith.constant 0 : index
    %105 = vector.load %arg2[%c0_56, %c0_57] : memref<8x24xf32, #tpu.memory_space<vmem>>, vector<8x24xf32>
    %cst_58 = arith.constant dense<0.000000e+00> : vector<8x512xf32>
    %106 = tpu.matmul %105, %104, %cst_58 {dimension_numbers = #tpu.dot_dimension_numbers<[1], [0], [0], [1], [0, 0, 1, 1], [], []>} : vector<8x24xf32>, vector<24x512xf32>, vector<8x512xf32> -> vector<8x512xf32>
    %c0_59 = arith.constant 0 : index
    %c0_60 = arith.constant 0 : index
    %107 = vector.load %arg3[%c0_59, %c0_60] : memref<8x1xf32, #tpu.memory_space<vmem>>, vector<8x1xf32>
    %108 = vector.broadcast %107 : vector<8x1xf32> to vector<8x512xf32>
    %109 = arith.addf %106, %108 : vector<8x512xf32>
    %cst_61 = arith.constant 0.000000e+00 : f32
    %110 = vector.broadcast %cst_61 : f32 to vector<8x512xf32>
    %111 = arith.maximumf %109, %110 : vector<8x512xf32>
    %c1_i32_62 = arith.constant 1 : i32
    %112 = tpu.dynamic_rotate %111 by %c1_i32_62 dim 1 : vector<8x512xf32>, i32 -> vector<8x512xf32>
    %cst_63 = arith.constant 0.000000e+00 : f32
    %113 = vector.shape_cast %2 : vector<1x512xi1> to vector<1x512xi1>
    %114 = vector.broadcast %113 : vector<1x512xi1> to vector<8x512xi1>
    %115 = vector.broadcast %cst_63 : f32 to vector<8x512xf32>
    %116 = arith.select %114, %112, %115 : vector<8x512xi1>, vector<8x512xf32>
    %c511_i32_64 = arith.constant 511 : i32
    %117 = tpu.dynamic_rotate %111 by %c511_i32_64 dim 1 : vector<8x512xf32>, i32 -> vector<8x512xf32>
    %cst_65 = arith.constant 0.000000e+00 : f32
    %118 = vector.shape_cast %4 : vector<1x512xi1> to vector<1x512xi1>
    %119 = vector.broadcast %118 : vector<1x512xi1> to vector<8x512xi1>
    %120 = vector.broadcast %cst_65 : f32 to vector<8x512xf32>
    %121 = arith.select %119, %117, %120 : vector<8x512xi1>, vector<8x512xf32>
    %122 = tpu.concatenate %116, %111, %121 in 0 : vector<8x512xf32>, vector<8x512xf32>, vector<8x512xf32> -> vector<24x512xf32>
    %c0_66 = arith.constant 0 : index
    %c0_67 = arith.constant 0 : index
    %123 = vector.load %arg4[%c0_66, %c0_67] : memref<8x24xf32, #tpu.memory_space<vmem>>, vector<8x24xf32>
    %cst_68 = arith.constant dense<0.000000e+00> : vector<8x512xf32>
    %124 = tpu.matmul %123, %122, %cst_68 {dimension_numbers = #tpu.dot_dimension_numbers<[1], [0], [0], [1], [0, 0, 1, 1], [], []>} : vector<8x24xf32>, vector<24x512xf32>, vector<8x512xf32> -> vector<8x512xf32>
    %c0_69 = arith.constant 0 : index
    %c0_70 = arith.constant 0 : index
    %125 = vector.load %arg5[%c0_69, %c0_70] : memref<8x1xf32, #tpu.memory_space<vmem>>, vector<8x1xf32>
    %126 = vector.broadcast %125 : vector<8x1xf32> to vector<8x512xf32>
    %127 = arith.addf %124, %126 : vector<8x512xf32>
    %cst_71 = arith.constant 0.000000e+00 : f32
    %128 = vector.broadcast %cst_71 : f32 to vector<8x512xf32>
    %129 = arith.maximumf %127, %128 : vector<8x512xf32>
    %c511_i32_72 = arith.constant 511 : i32
    %130 = tpu.dynamic_rotate %129 by %c511_i32_72 dim 1 : vector<8x512xf32>, i32 -> vector<8x512xf32>
    %131 = arith.maximumf %129, %130 : vector<8x512xf32>
    %c0_73 = arith.constant 0 : index
    %c0_74 = arith.constant 0 : index
    %132 = vector.load %arg10[%c0_73, %c0_74] : memref<512x256xf32, #tpu.memory_space<vmem>>, vector<512x256xf32>
    %cst_75 = arith.constant dense<0.000000e+00> : vector<8x256xf32>
    %133 = tpu.matmul %131, %132, %cst_75 {dimension_numbers = #tpu.dot_dimension_numbers<[1], [0], [0], [1], [0, 0, 1, 1], [], []>} : vector<8x512xf32>, vector<512x256xf32>, vector<8x256xf32> -> vector<8x256xf32>
    %c1_i32_76 = arith.constant 1 : i32
    %134 = tpu.dynamic_rotate %133 by %c1_i32_76 dim 1 : vector<8x256xf32>, i32 -> vector<8x256xf32>
    %cst_77 = arith.constant 0.000000e+00 : f32
    %135 = vector.shape_cast %7 : vector<1x256xi1> to vector<1x256xi1>
    %136 = vector.broadcast %135 : vector<1x256xi1> to vector<8x256xi1>
    %137 = vector.broadcast %cst_77 : f32 to vector<8x256xf32>
    %138 = arith.select %136, %134, %137 : vector<8x256xi1>, vector<8x256xf32>
    %c255_i32_78 = arith.constant 255 : i32
    %139 = tpu.dynamic_rotate %133 by %c255_i32_78 dim 1 : vector<8x256xf32>, i32 -> vector<8x256xf32>
    %cst_79 = arith.constant 0.000000e+00 : f32
    %140 = vector.shape_cast %9 : vector<1x256xi1> to vector<1x256xi1>
    %141 = vector.broadcast %140 : vector<1x256xi1> to vector<8x256xi1>
    %142 = vector.broadcast %cst_79 : f32 to vector<8x256xf32>
    %143 = arith.select %141, %139, %142 : vector<8x256xi1>, vector<8x256xf32>
    %144 = tpu.concatenate %138, %133, %143 in 0 : vector<8x256xf32>, vector<8x256xf32>, vector<8x256xf32> -> vector<24x256xf32>
    %c0_80 = arith.constant 0 : index
    %c0_81 = arith.constant 0 : index
    %145 = vector.load %arg6[%c0_80, %c0_81] : memref<16x24xf32, #tpu.memory_space<vmem>>, vector<16x24xf32>
    %cst_82 = arith.constant dense<0.000000e+00> : vector<16x256xf32>
    %146 = tpu.matmul %145, %144, %cst_82 {dimension_numbers = #tpu.dot_dimension_numbers<[1], [0], [0], [1], [0, 0, 1, 1], [], []>} : vector<16x24xf32>, vector<24x256xf32>, vector<16x256xf32> -> vector<16x256xf32>
    %c0_83 = arith.constant 0 : index
    %c0_84 = arith.constant 0 : index
    %147 = vector.load %arg7[%c0_83, %c0_84] : memref<16x1xf32, #tpu.memory_space<vmem>>, vector<16x1xf32>
    %148 = vector.broadcast %147 : vector<16x1xf32> to vector<16x256xf32>
    %149 = arith.addf %146, %148 : vector<16x256xf32>
    %cst_85 = arith.constant 0.000000e+00 : f32
    %150 = vector.broadcast %cst_85 : f32 to vector<16x256xf32>
    %151 = arith.maximumf %149, %150 : vector<16x256xf32>
    %c1_i32_86 = arith.constant 1 : i32
    %152 = tpu.dynamic_rotate %151 by %c1_i32_86 dim 1 : vector<16x256xf32>, i32 -> vector<16x256xf32>
    %cst_87 = arith.constant 0.000000e+00 : f32
    %153 = vector.shape_cast %7 : vector<1x256xi1> to vector<1x256xi1>
    %154 = vector.broadcast %153 : vector<1x256xi1> to vector<16x256xi1>
    %155 = vector.broadcast %cst_87 : f32 to vector<16x256xf32>
    %156 = arith.select %154, %152, %155 : vector<16x256xi1>, vector<16x256xf32>
    %c255_i32_88 = arith.constant 255 : i32
    %157 = tpu.dynamic_rotate %151 by %c255_i32_88 dim 1 : vector<16x256xf32>, i32 -> vector<16x256xf32>
    %cst_89 = arith.constant 0.000000e+00 : f32
    %158 = vector.shape_cast %9 : vector<1x256xi1> to vector<1x256xi1>
    %159 = vector.broadcast %158 : vector<1x256xi1> to vector<16x256xi1>
    %160 = vector.broadcast %cst_89 : f32 to vector<16x256xf32>
    %161 = arith.select %159, %157, %160 : vector<16x256xi1>, vector<16x256xf32>
    %162 = tpu.concatenate %156, %151, %161 in 0 : vector<16x256xf32>, vector<16x256xf32>, vector<16x256xf32> -> vector<48x256xf32>
    %c0_90 = arith.constant 0 : index
    %c0_91 = arith.constant 0 : index
    %163 = vector.load %arg8[%c0_90, %c0_91] : memref<16x48xf32, #tpu.memory_space<vmem>>, vector<16x48xf32>
    %cst_92 = arith.constant dense<0.000000e+00> : vector<16x256xf32>
    %164 = tpu.matmul %163, %162, %cst_92 {dimension_numbers = #tpu.dot_dimension_numbers<[1], [0], [0], [1], [0, 0, 1, 1], [], []>} : vector<16x48xf32>, vector<48x256xf32>, vector<16x256xf32> -> vector<16x256xf32>
    %c0_93 = arith.constant 0 : index
    %c0_94 = arith.constant 0 : index
    %165 = vector.load %arg9[%c0_93, %c0_94] : memref<16x1xf32, #tpu.memory_space<vmem>>, vector<16x1xf32>
    %166 = vector.broadcast %165 : vector<16x1xf32> to vector<16x256xf32>
    %167 = arith.addf %164, %166 : vector<16x256xf32>
    %cst_95 = arith.constant 0.000000e+00 : f32
    %168 = vector.broadcast %cst_95 : f32 to vector<16x256xf32>
    %169 = arith.maximumf %167, %168 : vector<16x256xf32>
    %c255_i32_96 = arith.constant 255 : i32
    %170 = tpu.dynamic_rotate %169 by %c255_i32_96 dim 1 : vector<16x256xf32>, i32 -> vector<16x256xf32>
    %171 = arith.maximumf %169, %170 : vector<16x256xf32>
    %c0_97 = arith.constant 0 : index
    %c0_98 = arith.constant 0 : index
    %172 = vector.load %arg11[%c0_97, %c0_98] : memref<256x128xf32, #tpu.memory_space<vmem>>, vector<256x128xf32>
    %cst_99 = arith.constant dense<0.000000e+00> : vector<16x128xf32>
    %173 = tpu.matmul %171, %172, %cst_99 {dimension_numbers = #tpu.dot_dimension_numbers<[1], [0], [0], [1], [0, 0, 1, 1], [], []>} : vector<16x256xf32>, vector<256x128xf32>, vector<16x128xf32> -> vector<16x128xf32>
    %cst_100 = arith.constant 0.000000e+00 : f32
    %174 = vector.broadcast %cst_100 : f32 to vector<2x256xf32>
    %175 = vector.extract_strided_slice %91 {offsets = [0, 0], sizes = [1, 128], strides = [1, 1]} : vector<16x128xf32> to vector<1x128xf32>
    %176 = vector.extract_strided_slice %173 {offsets = [0, 0], sizes = [1, 128], strides = [1, 1]} : vector<16x128xf32> to vector<1x128xf32>
    %177 = tpu.concatenate %175, %176 in 0 : vector<1x128xf32>, vector<1x128xf32> -> vector<2x128xf32>
    %c0_101 = arith.constant 0 : index
    %c0_102 = arith.constant 0 : index
    %c0_103 = arith.constant 0 : index
    %178 = vector.load %arg12[%c0_101, %c0_102, %c0_103] : memref<16x128x256xf32, #tpu.memory_space<vmem>>, vector<1x128x256xf32>
    %179 = vector.shape_cast %178 : vector<1x128x256xf32> to vector<128x256xf32>
    %cst_104 = arith.constant dense<0.000000e+00> : vector<2x256xf32>
    %180 = tpu.matmul %177, %179, %cst_104 {dimension_numbers = #tpu.dot_dimension_numbers<[1], [0], [0], [1], [0, 0, 1, 1], [], []>} : vector<2x128xf32>, vector<128x256xf32>, vector<2x256xf32> -> vector<2x256xf32>
    %181 = arith.addf %174, %180 : vector<2x256xf32>
    %182 = vector.extract_strided_slice %91 {offsets = [1, 0], sizes = [1, 128], strides = [1, 1]} : vector<16x128xf32> to vector<1x128xf32>
    %183 = vector.extract_strided_slice %173 {offsets = [1, 0], sizes = [1, 128], strides = [1, 1]} : vector<16x128xf32> to vector<1x128xf32>
    %184 = tpu.concatenate %182, %183 in 0 : vector<1x128xf32>, vector<1x128xf32> -> vector<2x128xf32>
    %c1_105 = arith.constant 1 : index
    %c0_106 = arith.constant 0 : index
    %c0_107 = arith.constant 0 : index
    %185 = vector.load %arg12[%c1_105, %c0_106, %c0_107] : memref<16x128x256xf32, #tpu.memory_space<vmem>>, vector<1x128x256xf32>
    %186 = vector.shape_cast %185 : vector<1x128x256xf32> to vector<128x256xf32>
    %cst_108 = arith.constant dense<0.000000e+00> : vector<2x256xf32>
    %187 = tpu.matmul %184, %186, %cst_108 {dimension_numbers = #tpu.dot_dimension_numbers<[1], [0], [0], [1], [0, 0, 1, 1], [], []>} : vector<2x128xf32>, vector<128x256xf32>, vector<2x256xf32> -> vector<2x256xf32>
    %188 = arith.addf %181, %187 : vector<2x256xf32>
    %189 = vector.extract_strided_slice %91 {offsets = [2, 0], sizes = [1, 128], strides = [1, 1]} : vector<16x128xf32> to vector<1x128xf32>
    %190 = vector.extract_strided_slice %173 {offsets = [2, 0], sizes = [1, 128], strides = [1, 1]} : vector<16x128xf32> to vector<1x128xf32>
    %191 = tpu.concatenate %189, %190 in 0 : vector<1x128xf32>, vector<1x128xf32> -> vector<2x128xf32>
    %c2 = arith.constant 2 : index
    %c0_109 = arith.constant 0 : index
    %c0_110 = arith.constant 0 : index
    %192 = vector.load %arg12[%c2, %c0_109, %c0_110] : memref<16x128x256xf32, #tpu.memory_space<vmem>>, vector<1x128x256xf32>
    %193 = vector.shape_cast %192 : vector<1x128x256xf32> to vector<128x256xf32>
    %cst_111 = arith.constant dense<0.000000e+00> : vector<2x256xf32>
    %194 = tpu.matmul %191, %193, %cst_111 {dimension_numbers = #tpu.dot_dimension_numbers<[1], [0], [0], [1], [0, 0, 1, 1], [], []>} : vector<2x128xf32>, vector<128x256xf32>, vector<2x256xf32> -> vector<2x256xf32>
    %195 = arith.addf %188, %194 : vector<2x256xf32>
    %196 = vector.extract_strided_slice %91 {offsets = [3, 0], sizes = [1, 128], strides = [1, 1]} : vector<16x128xf32> to vector<1x128xf32>
    %197 = vector.extract_strided_slice %173 {offsets = [3, 0], sizes = [1, 128], strides = [1, 1]} : vector<16x128xf32> to vector<1x128xf32>
    %198 = tpu.concatenate %196, %197 in 0 : vector<1x128xf32>, vector<1x128xf32> -> vector<2x128xf32>
    %c3 = arith.constant 3 : index
    %c0_112 = arith.constant 0 : index
    %c0_113 = arith.constant 0 : index
    %199 = vector.load %arg12[%c3, %c0_112, %c0_113] : memref<16x128x256xf32, #tpu.memory_space<vmem>>, vector<1x128x256xf32>
    %200 = vector.shape_cast %199 : vector<1x128x256xf32> to vector<128x256xf32>
    %cst_114 = arith.constant dense<0.000000e+00> : vector<2x256xf32>
    %201 = tpu.matmul %198, %200, %cst_114 {dimension_numbers = #tpu.dot_dimension_numbers<[1], [0], [0], [1], [0, 0, 1, 1], [], []>} : vector<2x128xf32>, vector<128x256xf32>, vector<2x256xf32> -> vector<2x256xf32>
    %202 = arith.addf %195, %201 : vector<2x256xf32>
    %203 = vector.extract_strided_slice %91 {offsets = [4, 0], sizes = [1, 128], strides = [1, 1]} : vector<16x128xf32> to vector<1x128xf32>
    %204 = vector.extract_strided_slice %173 {offsets = [4, 0], sizes = [1, 128], strides = [1, 1]} : vector<16x128xf32> to vector<1x128xf32>
    %205 = tpu.concatenate %203, %204 in 0 : vector<1x128xf32>, vector<1x128xf32> -> vector<2x128xf32>
    %c4 = arith.constant 4 : index
    %c0_115 = arith.constant 0 : index
    %c0_116 = arith.constant 0 : index
    %206 = vector.load %arg12[%c4, %c0_115, %c0_116] : memref<16x128x256xf32, #tpu.memory_space<vmem>>, vector<1x128x256xf32>
    %207 = vector.shape_cast %206 : vector<1x128x256xf32> to vector<128x256xf32>
    %cst_117 = arith.constant dense<0.000000e+00> : vector<2x256xf32>
    %208 = tpu.matmul %205, %207, %cst_117 {dimension_numbers = #tpu.dot_dimension_numbers<[1], [0], [0], [1], [0, 0, 1, 1], [], []>} : vector<2x128xf32>, vector<128x256xf32>, vector<2x256xf32> -> vector<2x256xf32>
    %209 = arith.addf %202, %208 : vector<2x256xf32>
    %210 = vector.extract_strided_slice %91 {offsets = [5, 0], sizes = [1, 128], strides = [1, 1]} : vector<16x128xf32> to vector<1x128xf32>
    %211 = vector.extract_strided_slice %173 {offsets = [5, 0], sizes = [1, 128], strides = [1, 1]} : vector<16x128xf32> to vector<1x128xf32>
    %212 = tpu.concatenate %210, %211 in 0 : vector<1x128xf32>, vector<1x128xf32> -> vector<2x128xf32>
    %c5 = arith.constant 5 : index
    %c0_118 = arith.constant 0 : index
    %c0_119 = arith.constant 0 : index
    %213 = vector.load %arg12[%c5, %c0_118, %c0_119] : memref<16x128x256xf32, #tpu.memory_space<vmem>>, vector<1x128x256xf32>
    %214 = vector.shape_cast %213 : vector<1x128x256xf32> to vector<128x256xf32>
    %cst_120 = arith.constant dense<0.000000e+00> : vector<2x256xf32>
    %215 = tpu.matmul %212, %214, %cst_120 {dimension_numbers = #tpu.dot_dimension_numbers<[1], [0], [0], [1], [0, 0, 1, 1], [], []>} : vector<2x128xf32>, vector<128x256xf32>, vector<2x256xf32> -> vector<2x256xf32>
    %216 = arith.addf %209, %215 : vector<2x256xf32>
    %217 = vector.extract_strided_slice %91 {offsets = [6, 0], sizes = [1, 128], strides = [1, 1]} : vector<16x128xf32> to vector<1x128xf32>
    %218 = vector.extract_strided_slice %173 {offsets = [6, 0], sizes = [1, 128], strides = [1, 1]} : vector<16x128xf32> to vector<1x128xf32>
    %219 = tpu.concatenate %217, %218 in 0 : vector<1x128xf32>, vector<1x128xf32> -> vector<2x128xf32>
    %c6 = arith.constant 6 : index
    %c0_121 = arith.constant 0 : index
    %c0_122 = arith.constant 0 : index
    %220 = vector.load %arg12[%c6, %c0_121, %c0_122] : memref<16x128x256xf32, #tpu.memory_space<vmem>>, vector<1x128x256xf32>
    %221 = vector.shape_cast %220 : vector<1x128x256xf32> to vector<128x256xf32>
    %cst_123 = arith.constant dense<0.000000e+00> : vector<2x256xf32>
    %222 = tpu.matmul %219, %221, %cst_123 {dimension_numbers = #tpu.dot_dimension_numbers<[1], [0], [0], [1], [0, 0, 1, 1], [], []>} : vector<2x128xf32>, vector<128x256xf32>, vector<2x256xf32> -> vector<2x256xf32>
    %223 = arith.addf %216, %222 : vector<2x256xf32>
    %224 = vector.extract_strided_slice %91 {offsets = [7, 0], sizes = [1, 128], strides = [1, 1]} : vector<16x128xf32> to vector<1x128xf32>
    %225 = vector.extract_strided_slice %173 {offsets = [7, 0], sizes = [1, 128], strides = [1, 1]} : vector<16x128xf32> to vector<1x128xf32>
    %226 = tpu.concatenate %224, %225 in 0 : vector<1x128xf32>, vector<1x128xf32> -> vector<2x128xf32>
    %c7 = arith.constant 7 : index
    %c0_124 = arith.constant 0 : index
    %c0_125 = arith.constant 0 : index
    %227 = vector.load %arg12[%c7, %c0_124, %c0_125] : memref<16x128x256xf32, #tpu.memory_space<vmem>>, vector<1x128x256xf32>
    %228 = vector.shape_cast %227 : vector<1x128x256xf32> to vector<128x256xf32>
    %cst_126 = arith.constant dense<0.000000e+00> : vector<2x256xf32>
    %229 = tpu.matmul %226, %228, %cst_126 {dimension_numbers = #tpu.dot_dimension_numbers<[1], [0], [0], [1], [0, 0, 1, 1], [], []>} : vector<2x128xf32>, vector<128x256xf32>, vector<2x256xf32> -> vector<2x256xf32>
    %230 = arith.addf %223, %229 : vector<2x256xf32>
    %231 = vector.extract_strided_slice %91 {offsets = [8, 0], sizes = [1, 128], strides = [1, 1]} : vector<16x128xf32> to vector<1x128xf32>
    %232 = vector.extract_strided_slice %173 {offsets = [8, 0], sizes = [1, 128], strides = [1, 1]} : vector<16x128xf32> to vector<1x128xf32>
    %233 = tpu.concatenate %231, %232 in 0 : vector<1x128xf32>, vector<1x128xf32> -> vector<2x128xf32>
    %c8 = arith.constant 8 : index
    %c0_127 = arith.constant 0 : index
    %c0_128 = arith.constant 0 : index
    %234 = vector.load %arg12[%c8, %c0_127, %c0_128] : memref<16x128x256xf32, #tpu.memory_space<vmem>>, vector<1x128x256xf32>
    %235 = vector.shape_cast %234 : vector<1x128x256xf32> to vector<128x256xf32>
    %cst_129 = arith.constant dense<0.000000e+00> : vector<2x256xf32>
    %236 = tpu.matmul %233, %235, %cst_129 {dimension_numbers = #tpu.dot_dimension_numbers<[1], [0], [0], [1], [0, 0, 1, 1], [], []>} : vector<2x128xf32>, vector<128x256xf32>, vector<2x256xf32> -> vector<2x256xf32>
    %237 = arith.addf %230, %236 : vector<2x256xf32>
    %238 = vector.extract_strided_slice %91 {offsets = [9, 0], sizes = [1, 128], strides = [1, 1]} : vector<16x128xf32> to vector<1x128xf32>
    %239 = vector.extract_strided_slice %173 {offsets = [9, 0], sizes = [1, 128], strides = [1, 1]} : vector<16x128xf32> to vector<1x128xf32>
    %240 = tpu.concatenate %238, %239 in 0 : vector<1x128xf32>, vector<1x128xf32> -> vector<2x128xf32>
    %c9 = arith.constant 9 : index
    %c0_130 = arith.constant 0 : index
    %c0_131 = arith.constant 0 : index
    %241 = vector.load %arg12[%c9, %c0_130, %c0_131] : memref<16x128x256xf32, #tpu.memory_space<vmem>>, vector<1x128x256xf32>
    %242 = vector.shape_cast %241 : vector<1x128x256xf32> to vector<128x256xf32>
    %cst_132 = arith.constant dense<0.000000e+00> : vector<2x256xf32>
    %243 = tpu.matmul %240, %242, %cst_132 {dimension_numbers = #tpu.dot_dimension_numbers<[1], [0], [0], [1], [0, 0, 1, 1], [], []>} : vector<2x128xf32>, vector<128x256xf32>, vector<2x256xf32> -> vector<2x256xf32>
    %244 = arith.addf %237, %243 : vector<2x256xf32>
    %245 = vector.extract_strided_slice %91 {offsets = [10, 0], sizes = [1, 128], strides = [1, 1]} : vector<16x128xf32> to vector<1x128xf32>
    %246 = vector.extract_strided_slice %173 {offsets = [10, 0], sizes = [1, 128], strides = [1, 1]} : vector<16x128xf32> to vector<1x128xf32>
    %247 = tpu.concatenate %245, %246 in 0 : vector<1x128xf32>, vector<1x128xf32> -> vector<2x128xf32>
    %c10 = arith.constant 10 : index
    %c0_133 = arith.constant 0 : index
    %c0_134 = arith.constant 0 : index
    %248 = vector.load %arg12[%c10, %c0_133, %c0_134] : memref<16x128x256xf32, #tpu.memory_space<vmem>>, vector<1x128x256xf32>
    %249 = vector.shape_cast %248 : vector<1x128x256xf32> to vector<128x256xf32>
    %cst_135 = arith.constant dense<0.000000e+00> : vector<2x256xf32>
    %250 = tpu.matmul %247, %249, %cst_135 {dimension_numbers = #tpu.dot_dimension_numbers<[1], [0], [0], [1], [0, 0, 1, 1], [], []>} : vector<2x128xf32>, vector<128x256xf32>, vector<2x256xf32> -> vector<2x256xf32>
    %251 = arith.addf %244, %250 : vector<2x256xf32>
    %252 = vector.extract_strided_slice %91 {offsets = [11, 0], sizes = [1, 128], strides = [1, 1]} : vector<16x128xf32> to vector<1x128xf32>
    %253 = vector.extract_strided_slice %173 {offsets = [11, 0], sizes = [1, 128], strides = [1, 1]} : vector<16x128xf32> to vector<1x128xf32>
    %254 = tpu.concatenate %252, %253 in 0 : vector<1x128xf32>, vector<1x128xf32> -> vector<2x128xf32>
    %c11 = arith.constant 11 : index
    %c0_136 = arith.constant 0 : index
    %c0_137 = arith.constant 0 : index
    %255 = vector.load %arg12[%c11, %c0_136, %c0_137] : memref<16x128x256xf32, #tpu.memory_space<vmem>>, vector<1x128x256xf32>
    %256 = vector.shape_cast %255 : vector<1x128x256xf32> to vector<128x256xf32>
    %cst_138 = arith.constant dense<0.000000e+00> : vector<2x256xf32>
    %257 = tpu.matmul %254, %256, %cst_138 {dimension_numbers = #tpu.dot_dimension_numbers<[1], [0], [0], [1], [0, 0, 1, 1], [], []>} : vector<2x128xf32>, vector<128x256xf32>, vector<2x256xf32> -> vector<2x256xf32>
    %258 = arith.addf %251, %257 : vector<2x256xf32>
    %259 = vector.extract_strided_slice %91 {offsets = [12, 0], sizes = [1, 128], strides = [1, 1]} : vector<16x128xf32> to vector<1x128xf32>
    %260 = vector.extract_strided_slice %173 {offsets = [12, 0], sizes = [1, 128], strides = [1, 1]} : vector<16x128xf32> to vector<1x128xf32>
    %261 = tpu.concatenate %259, %260 in 0 : vector<1x128xf32>, vector<1x128xf32> -> vector<2x128xf32>
    %c12 = arith.constant 12 : index
    %c0_139 = arith.constant 0 : index
    %c0_140 = arith.constant 0 : index
    %262 = vector.load %arg12[%c12, %c0_139, %c0_140] : memref<16x128x256xf32, #tpu.memory_space<vmem>>, vector<1x128x256xf32>
    %263 = vector.shape_cast %262 : vector<1x128x256xf32> to vector<128x256xf32>
    %cst_141 = arith.constant dense<0.000000e+00> : vector<2x256xf32>
    %264 = tpu.matmul %261, %263, %cst_141 {dimension_numbers = #tpu.dot_dimension_numbers<[1], [0], [0], [1], [0, 0, 1, 1], [], []>} : vector<2x128xf32>, vector<128x256xf32>, vector<2x256xf32> -> vector<2x256xf32>
    %265 = arith.addf %258, %264 : vector<2x256xf32>
    %266 = vector.extract_strided_slice %91 {offsets = [13, 0], sizes = [1, 128], strides = [1, 1]} : vector<16x128xf32> to vector<1x128xf32>
    %267 = vector.extract_strided_slice %173 {offsets = [13, 0], sizes = [1, 128], strides = [1, 1]} : vector<16x128xf32> to vector<1x128xf32>
    %268 = tpu.concatenate %266, %267 in 0 : vector<1x128xf32>, vector<1x128xf32> -> vector<2x128xf32>
    %c13 = arith.constant 13 : index
    %c0_142 = arith.constant 0 : index
    %c0_143 = arith.constant 0 : index
    %269 = vector.load %arg12[%c13, %c0_142, %c0_143] : memref<16x128x256xf32, #tpu.memory_space<vmem>>, vector<1x128x256xf32>
    %270 = vector.shape_cast %269 : vector<1x128x256xf32> to vector<128x256xf32>
    %cst_144 = arith.constant dense<0.000000e+00> : vector<2x256xf32>
    %271 = tpu.matmul %268, %270, %cst_144 {dimension_numbers = #tpu.dot_dimension_numbers<[1], [0], [0], [1], [0, 0, 1, 1], [], []>} : vector<2x128xf32>, vector<128x256xf32>, vector<2x256xf32> -> vector<2x256xf32>
    %272 = arith.addf %265, %271 : vector<2x256xf32>
    %273 = vector.extract_strided_slice %91 {offsets = [14, 0], sizes = [1, 128], strides = [1, 1]} : vector<16x128xf32> to vector<1x128xf32>
    %274 = vector.extract_strided_slice %173 {offsets = [14, 0], sizes = [1, 128], strides = [1, 1]} : vector<16x128xf32> to vector<1x128xf32>
    %275 = tpu.concatenate %273, %274 in 0 : vector<1x128xf32>, vector<1x128xf32> -> vector<2x128xf32>
    %c14 = arith.constant 14 : index
    %c0_145 = arith.constant 0 : index
    %c0_146 = arith.constant 0 : index
    %276 = vector.load %arg12[%c14, %c0_145, %c0_146] : memref<16x128x256xf32, #tpu.memory_space<vmem>>, vector<1x128x256xf32>
    %277 = vector.shape_cast %276 : vector<1x128x256xf32> to vector<128x256xf32>
    %cst_147 = arith.constant dense<0.000000e+00> : vector<2x256xf32>
    %278 = tpu.matmul %275, %277, %cst_147 {dimension_numbers = #tpu.dot_dimension_numbers<[1], [0], [0], [1], [0, 0, 1, 1], [], []>} : vector<2x128xf32>, vector<128x256xf32>, vector<2x256xf32> -> vector<2x256xf32>
    %279 = arith.addf %272, %278 : vector<2x256xf32>
    %280 = vector.extract_strided_slice %91 {offsets = [15, 0], sizes = [1, 128], strides = [1, 1]} : vector<16x128xf32> to vector<1x128xf32>
    %281 = vector.extract_strided_slice %173 {offsets = [15, 0], sizes = [1, 128], strides = [1, 1]} : vector<16x128xf32> to vector<1x128xf32>
    %282 = tpu.concatenate %280, %281 in 0 : vector<1x128xf32>, vector<1x128xf32> -> vector<2x128xf32>
    %c15 = arith.constant 15 : index
    %c0_148 = arith.constant 0 : index
    %c0_149 = arith.constant 0 : index
    %283 = vector.load %arg12[%c15, %c0_148, %c0_149] : memref<16x128x256xf32, #tpu.memory_space<vmem>>, vector<1x128x256xf32>
    %284 = vector.shape_cast %283 : vector<1x128x256xf32> to vector<128x256xf32>
    %cst_150 = arith.constant dense<0.000000e+00> : vector<2x256xf32>
    %285 = tpu.matmul %282, %284, %cst_150 {dimension_numbers = #tpu.dot_dimension_numbers<[1], [0], [0], [1], [0, 0, 1, 1], [], []>} : vector<2x128xf32>, vector<128x256xf32>, vector<2x256xf32> -> vector<2x256xf32>
    %286 = arith.addf %279, %285 : vector<2x256xf32>
    %c0_151 = arith.constant 0 : index
    %c0_152 = arith.constant 0 : index
    %287 = vector.load %arg13[%c0_151, %c0_152] : memref<1x256xf32, #tpu.memory_space<vmem>>, vector<1x256xf32>
    %288 = vector.broadcast %287 : vector<1x256xf32> to vector<2x256xf32>
    %289 = arith.addf %286, %288 : vector<2x256xf32>
    %c0_153 = arith.constant 0 : index
    %c0_154 = arith.constant 0 : index
    %290 = vector.load %arg14[%c0_153, %c0_154] : memref<256x128xf32, #tpu.memory_space<vmem>>, vector<256x128xf32>
    %cst_155 = arith.constant dense<0.000000e+00> : vector<2x128xf32>
    %291 = tpu.matmul %289, %290, %cst_155 {dimension_numbers = #tpu.dot_dimension_numbers<[1], [0], [0], [1], [0, 0, 1, 1], [], []>} : vector<2x256xf32>, vector<256x128xf32>, vector<2x128xf32> -> vector<2x128xf32>
    %c0_156 = arith.constant 0 : index
    %c0_157 = arith.constant 0 : index
    %292 = vector.load %arg15[%c0_156, %c0_157] : memref<1x128xf32, #tpu.memory_space<vmem>>, vector<1x128xf32>
    %293 = vector.broadcast %292 : vector<1x128xf32> to vector<2x128xf32>
    %294 = arith.addf %291, %293 : vector<2x128xf32>
    %c0_158 = arith.constant 0 : index
    %c0_159 = arith.constant 0 : index
    %295 = vector.load %arg16[%c0_158, %c0_159] : memref<2x128xf32, #tpu.memory_space<vmem>>, vector<2x128xf32>
    tpu.vector_store %arg16[%c0_158, %c0_159], %294 {strides = array<i32>} : memref<2x128xf32, #tpu.memory_space<vmem>>, vector<2x128xf32>,
    return
  }
  func.func @transform_0(%arg0: i32) -> (i32, i32, i32) {
    %c0_i32 = arith.constant 0 : i32
    %c0_i32_0 = arith.constant 0 : i32
    %c0_i32_1 = arith.constant 0 : i32
    return %arg0, %c0_i32, %c0_i32_0 : i32, i32, i32
  }
  func.func @transform_1(%arg0: i32) -> (i32, i32) {
    %c0_i32 = arith.constant 0 : i32
    %c0_i32_0 = arith.constant 0 : i32
    %c0_i32_1 = arith.constant 0 : i32
    return %c0_i32, %c0_i32_0 : i32, i32
  }
  func.func @transform_2(%arg0: i32) -> (i32, i32) {
    %c0_i32 = arith.constant 0 : i32
    %c0_i32_0 = arith.constant 0 : i32
    %c0_i32_1 = arith.constant 0 : i32
    return %c0_i32, %c0_i32_0 : i32, i32
  }
  func.func @transform_3(%arg0: i32) -> (i32, i32) {
    %c0_i32 = arith.constant 0 : i32
    %c0_i32_0 = arith.constant 0 : i32
    %c0_i32_1 = arith.constant 0 : i32
    return %c0_i32, %c0_i32_0 : i32, i32
  }
  func.func @transform_4(%arg0: i32) -> (i32, i32) {
    %c0_i32 = arith.constant 0 : i32
    %c0_i32_0 = arith.constant 0 : i32
    %c0_i32_1 = arith.constant 0 : i32
    return %c0_i32, %c0_i32_0 : i32, i32
  }
  func.func @transform_5(%arg0: i32) -> (i32, i32) {
    %c0_i32 = arith.constant 0 : i32
    %c0_i32_0 = arith.constant 0 : i32
    %c0_i32_1 = arith.constant 0 : i32
    return %c0_i32, %c0_i32_0 : i32, i32
  }
  func.func @transform_6(%arg0: i32) -> (i32, i32) {
    %c0_i32 = arith.constant 0 : i32
    %c0_i32_0 = arith.constant 0 : i32
    %c0_i32_1 = arith.constant 0 : i32
    return %c0_i32, %c0_i32_0 : i32, i32
  }
  func.func @transform_7(%arg0: i32) -> (i32, i32) {
    %c0_i32 = arith.constant 0 : i32
    %c0_i32_0 = arith.constant 0 : i32
    %c0_i32_1 = arith.constant 0 : i32
    return %c0_i32, %c0_i32_0 : i32, i32
  }
  func.func @transform_8(%arg0: i32) -> (i32, i32) {
    %c0_i32 = arith.constant 0 : i32
    %c0_i32_0 = arith.constant 0 : i32
    %c0_i32_1 = arith.constant 0 : i32
    return %c0_i32, %c0_i32_0 : i32, i32
  }
  func.func @transform_9(%arg0: i32) -> (i32, i32) {
    %c0_i32 = arith.constant 0 : i32
    %c0_i32_0 = arith.constant 0 : i32
    %c0_i32_1 = arith.constant 0 : i32
    return %c0_i32, %c0_i32_0 : i32, i32
  }
  func.func @transform_10(%arg0: i32) -> (i32, i32) {
    %c0_i32 = arith.constant 0 : i32
    %c0_i32_0 = arith.constant 0 : i32
    %c0_i32_1 = arith.constant 0 : i32
    return %c0_i32, %c0_i32_0 : i32, i32
  }
  func.func @transform_11(%arg0: i32) -> (i32, i32, i32) {
    %c0_i32 = arith.constant 0 : i32
    %c0_i32_0 = arith.constant 0 : i32
    %c0_i32_1 = arith.constant 0 : i32
    %c0_i32_2 = arith.constant 0 : i32
    return %c0_i32, %c0_i32_0, %c0_i32_1 : i32, i32, i32
  }
  func.func @transform_12(%arg0: i32) -> (i32, i32) {
    %c0_i32 = arith.constant 0 : i32
    %c0_i32_0 = arith.constant 0 : i32
    %c0_i32_1 = arith.constant 0 : i32
    return %c0_i32, %c0_i32_0 : i32, i32
  }
  func.func @transform_13(%arg0: i32) -> (i32, i32) {
    %c0_i32 = arith.constant 0 : i32
    %c0_i32_0 = arith.constant 0 : i32
    %c0_i32_1 = arith.constant 0 : i32
    return %c0_i32, %c0_i32_0 : i32, i32
  }
  func.func @transform_14(%arg0: i32) -> (i32, i32) {
    %c0_i32 = arith.constant 0 : i32
    %c0_i32_0 = arith.constant 0 : i32
    %c0_i32_1 = arith.constant 0 : i32
    return %c0_i32, %c0_i32_0 : i32, i32
  }
  func.func @transform_15(%arg0: i32) -> (i32, i32) {
    %c0_i32 = arith.constant 0 : i32
    %c0_i32_0 = arith.constant 0 : i32
    return %arg0, %c0_i32 : i32, i32
  }
}

</mosaic_0001>

<bundles_post_ra>
// kernel: tpu_custom_call.1
= control target key start
LH: loop header
LB: loop body
LE: loop exit
PB: predicated region body
PF: predicated region fallthrough
CT: control target
= control target key end

     0   :  { %20 = vsyncpa [#allocation3], 0  ;;  %s5637_s0 = inlined_call_operand.hbm [shape: f32[2,8,512], index: 0, kind: input, shape index: {}]   ;;  %s5638_s1 = inlined_call_operand.hbm [shape: f32[8,24], index: 1, kind: input, shape index: {}]   ;;  %s5639_s2 = inlined_call_operand.vmem [shape: f32[8,1], index: 2, kind: input, shape index: {}]   ;;  %s5640_s3 = inlined_call_operand.hbm [shape: f32[8,24], index: 3, kind: input, shape index: {}]   ;;  %s5641_s4 = inlined_call_operand.vmem [shape: f32[8,1], index: 4, kind: input, shape index: {}]   ;;  %s5642_s5 = inlined_call_operand.hbm [shape: f32[16,24], index: 5, kind: input, shape index: {}]   ;;  %s5643_s6 = inlined_call_operand.vmem [shape: f32[16,1], index: 6, kind: input, shape index: {}]   ;;  %s5644_s7 = inlined_call_operand.hbm [shape: f32[16,48], index: 7, kind: input, shape index: {}]   ;;  %s5645_s8 = inlined_call_operand.vmem [shape: f32[16,1], index: 8, kind: input, shape index: {}]   ;;  %s5646_s9 = inlined_call_operand.hbm [shape: f32[512,256], index: 9, kind: input, shape index: {}]   ;;  %s5647_s10 = inlined_call_operand.hbm [shape: f32[256,128], index: 10, kind: input, shape index: {}]   ;;  %s5648_s11 = inlined_call_operand.hbm [shape: f32[16,128,256], index: 11, kind: input, shape index: {}]   ;;  %s5649_s12 = inlined_call_operand.hbm [shape: f32[1,256], index: 12, kind: input, shape index: {}]   ;;  %s5650_s13 = inlined_call_operand.hbm [shape: f32[256,128], index: 13, kind: input, shape index: {}]   ;;  %s5651_s14 = inlined_call_operand.hbm [shape: f32[1,128], index: 14, kind: input, shape index: {}]   ;;  %s5652_s15 = inlined_call_operand.hbm [shape: f32[2,128], index: 15, kind: output, shape index: {}]  }
   0x1   :  { %21 = vsyncpa [#allocation6], 0 }
   0x2   :  { %22 = vsyncpa [#allocation9], 0 }
   0x3   :  { %23 = vsyncpa [#allocation12], 0 }
   0x4   :  { %24 = vsyncpa [#allocation15], 0 }
   0x5   :  { %25 = vsyncpa [#allocation18], 0 }
   0x6   :  { %26 = vsyncpa [#allocation4], 0  ;;  %s4536_s18 = smov [#allocation5]   ;;  %s4537_s20 = smov [#allocation8]  }
   0x7   :  { %s45_s19 = sshll.u32 %s4536_s18, 4  ;;  %s68_s21 = sshll.u32 %s4537_s20, 4  ;;  %s46_s19 = int_to_ptr.vmem [resolvable:$true] %s45_s19  ;;  %s69_s21 = int_to_ptr.vmem [resolvable:$true] %s68_s21 }
   0x8   :  { %s4290_s22 = scalar_lea.vmem %s46_s19, 128  ;;  %p4295_p1 = scmp.lt.s32.totalorder %s46_s19, %s46_s19 }
   0x9   :  { %p4291_p0 = scmp.ne.s32.totalorder %s46_s19, %s4290_s22  ;;  %p4296_p2 = scmp.lt.s32.totalorder %s4290_s22, %s4290_s22 }
   0xb   :  { %p4297_p3 = por %p4296_p2, %p4295_p1 }
   0xd   :  { %p4298_p4 = pnand %p4297_p3, %p4291_p0 }
   0xf   :  { %4301 = shalt.err (!%p4298_p4)
}
  0x10   :  { %48 = dma.hbm_to_vmem [thread:$0]  %s5638_s1, 128, %s46_s19, [#allocation6]  }
  0x11   :  { %s4310_s25 = scalar_lea.vmem %s69_s21, 256  ;;  %p4315_p6 = scmp.lt.s32.totalorder %s69_s21, %s69_s21 }
  0x12   :  { %p4311_p5 = scmp.ne.s32.totalorder %s69_s21, %s4310_s25  ;;  %p4316_p7 = scmp.lt.s32.totalorder %s4310_s25, %s4310_s25 }
  0x14   :  { %p4317_p8 = por %p4316_p7, %p4315_p6 }
  0x16   :  { %p4318_p9 = pnand %p4317_p8, %p4311_p5 }
  0x18   :  { %4321 = shalt.err (!%p4318_p9)
}
  0x19   :  { %s4538_s26 = smov 128   ;;  %s4539_s27 = smov 8  }
  0x1a   :  { %74 = dma.hbm_to_vmem [thread:$0]  %s5642_s5, 256, %s69_s21, [#allocation9], %s4538_s26, %s4538_s26, %s4539_s27  }
  0x1b   :  { %s4540_s30 = smov [#allocation11]  }
  0x1c   :  { %s96_s16 = sshll.u32 %s4540_s30, 4  ;;  %s97_s16 = int_to_ptr.vmem [resolvable:$true] %s96_s16 }
  0x1d   :  { %s4330_s1 = scalar_lea.vmem %s97_s16, 16384  ;;  %p4335_p11 = scmp.lt.s32.totalorder %s97_s16, %s97_s16 }
  0x1e   :  { %p4331_p10 = scmp.ne.s32.totalorder %s97_s16, %s4330_s1  ;;  %p4336_p12 = scmp.lt.s32.totalorder %s4330_s1, %s4330_s1 }
  0x20   :  { %p4337_p13 = por %p4336_p12, %p4335_p11 }
  0x22   :  { %p4338_p0 = pnand %p4337_p13, %p4331_p10 }
  0x24   :  { %4341 = shalt.err (!%p4338_p0)
}
  0x25   :  { %s4541_s17 = smov 256   ;;  %s4542_s18 = smov 16  }
  0x26   :  { %102 = dma.hbm_to_vmem [thread:$0]  %s5646_s9, 16384, %s97_s16, [#allocation12], %s4541_s17, %s4541_s17, %s4542_s18  }
  0x27   :  { %s4543_s22 = smov [#allocation14]   ;;  %s4544_s5 = smov [#allocation17]  }
  0x28   :  { %s120_s23 = sshll.u32 %s4543_s22, 4  ;;  %s142_s21 = sshll.u32 %s4544_s5, 4  ;;  %s121_s23 = int_to_ptr.vmem [resolvable:$true] %s120_s23  ;;  %s143_s21 = int_to_ptr.vmem [resolvable:$true] %s142_s21 }
  0x29   :  { %s4350_s24 = scalar_lea.vmem %s121_s23, 65536  ;;  %p4355_p2 = scmp.lt.s32.totalorder %s121_s23, %s121_s23 }
  0x2a   :  { %p4351_p1 = scmp.ne.s32.totalorder %s121_s23, %s4350_s24  ;;  %p4356_p3 = scmp.lt.s32.totalorder %s4350_s24, %s4350_s24 }
  0x2c   :  { %p4357_p4 = por %p4356_p3, %p4355_p2 }
  0x2e   :  { %p4358_p5 = pnand %p4357_p4, %p4351_p1 }
  0x30   :  { %4361 = shalt.err (!%p4358_p5)
}
  0x31   :  { %126 = dma.hbm_to_vmem [thread:$0]  %s5648_s11, 65536, %s121_s23, [#allocation15], %s4541_s17, %s4541_s17, %s4542_s18  }
  0x32   :  { %s4370_s29 = scalar_lea.vmem %s143_s21, 4096  ;;  %p4375_p7 = scmp.lt.s32.totalorder %s143_s21, %s143_s21 }
  0x33   :  { %p4371_p6 = scmp.ne.s32.totalorder %s143_s21, %s4370_s29  ;;  %p4376_p8 = scmp.lt.s32.totalorder %s4370_s29, %s4370_s29 }
  0x35   :  { %p4377_p9 = por %p4376_p8, %p4375_p7 }
  0x37   :  { %p4378_p10 = pnand %p4377_p9, %p4371_p6 }
  0x39   :  { %4381 = shalt.err (!%p4378_p10)
}
  0x3a   :  { %148 = dma.hbm_to_vmem [thread:$0]  %s5650_s13, 4096, %s143_s21, [#allocation18], %s4538_s26, %s4538_s26, %s4539_s27  }
  0x3b   :  { %s4545_s16 = smov [#allocation2]  }
  0x3c   :  { %s32_s1 = sshll.u32 %s4545_s16, 4  ;;  %s33_s1 = int_to_ptr.vmem [resolvable:$true] %s32_s1 }
  0x3d   :  { %s4390_s19 = scalar_lea.vmem %s33_s1, 1024  ;;  %p4395_p12 = scmp.lt.s32.totalorder %s33_s1, %s33_s1 }
  0x3e   :  { %p4391_p11 = scmp.ne.s32.totalorder %s33_s1, %s4390_s19  ;;  %p4396_p13 = scmp.lt.s32.totalorder %s4390_s19, %s4390_s19 }
  0x40   :  { %p4397_p0 = por %p4396_p13, %p4395_p12 }
  0x42   :  { %p4398_p1 = pnand %p4397_p0, %p4391_p11 }
  0x44   :  { %4401 = shalt.err (!%p4398_p1)
}
  0x45   :  { %s4546_s11 = smov 512   ;;  %s4547_s17 = smov 32  }
  0x46   :  { %38 = dma.hbm_to_vmem [thread:$0]  %s5637_s0, 1024, %s33_s1, [#allocation3], %s4546_s11, %s4546_s11, %s4547_s17  }
  0x47   :  { %s4548_s22 = smov [#allocation7]   ;;  %s4549_s5 = smov [#allocation10]  }
  0x48   :  { %s57_s23 = sshll.u32 %s4548_s22, 4  ;;  %s82_s13 = sshll.u32 %s4549_s5, 4  ;;  %s58_s23 = int_to_ptr.vmem [resolvable:$true] %s57_s23  ;;  %s83_s13 = int_to_ptr.vmem [resolvable:$true] %s82_s13 }
  0x49   :  { %s4410_s21 = scalar_lea.vmem %s58_s23, 128  ;;  %p4415_p3 = scmp.lt.s32.totalorder %s58_s23, %s58_s23 }
  0x4a   :  { %p4411_p2 = scmp.ne.s32.totalorder %s58_s23, %s4410_s21  ;;  %p4416_p4 = scmp.lt.s32.totalorder %s4410_s21, %s4410_s21 }
  0x4c   :  { %p4417_p5 = por %p4416_p4, %p4415_p3 }
  0x4e   :  { %p4418_p6 = pnand %p4417_p5, %p4411_p2 }
  0x50   :  { %4421 = shalt.err (!%p4418_p6)
}
  0x51   :  { %60 = dma.hbm_to_vmem [thread:$0]  %s5640_s3, 128, %s58_s23, [#allocation6]  }
  0x52   :  { %s4430_s28 = scalar_lea.vmem %s83_s13, 256  ;;  %p4435_p8 = scmp.lt.s32.totalorder %s83_s13, %s83_s13 }
  0x53   :  { %p4431_p7 = scmp.ne.s32.totalorder %s83_s13, %s4430_s28  ;;  %p4436_p9 = scmp.lt.s32.totalorder %s4430_s28, %s4430_s28 }
  0x55   :  { %p4437_p10 = por %p4436_p9, %p4435_p8 }
  0x57   :  { %p4438_p11 = pnand %p4437_p10, %p4431_p7 }
  0x59   :  { %4441 = shalt.err (!%p4438_p11)
}
  0x5a   :  { %88 = dma.hbm_to_vmem [thread:$0]  %s5644_s7, 256, %s83_s13, [#allocation9], %s4538_s26, %s4538_s26, %s4539_s27  }
  0x5b   :  { %s4550_s9 = smov [#allocation13]   ;;  %s4551_s16 = smov [#allocation16]  }
  0x5c   :  { %s108_s30 = sshll.u32 %s4550_s9, 4  ;;  %s133_s1 = sshll.u32 %s4551_s16, 4  ;;  %s109_s30 = int_to_ptr.vmem [resolvable:$true] %s108_s30  ;;  %s134_s1 = int_to_ptr.vmem [resolvable:$true] %s133_s1 }
  0x5d   :  { %s4450_s3 = scalar_lea.vmem %s109_s30, 4096  ;;  %p4455_p13 = scmp.lt.s32.totalorder %s109_s30, %s109_s30 }
  0x5e   :  { %p4451_p12 = scmp.ne.s32.totalorder %s109_s30, %s4450_s3  ;;  %p4456_p0 = scmp.lt.s32.totalorder %s4450_s3, %s4450_s3 }
  0x60   :  { %p4457_p1 = por %p4456_p0, %p4455_p13 }
  0x62   :  { %p4458_p2 = pnand %p4457_p1, %p4451_p12 }
  0x64   :  { %4461 = shalt.err (!%p4458_p2)
}
  0x65   :  { %114 = dma.hbm_to_vmem [thread:$0]  %s5647_s10, 4096, %s109_s30, [#allocation12], %s4538_s26, %s4538_s26, %s4539_s27  }
  0x66   :  { %s4470_s7 = scalar_lea.vmem %s134_s1, 32  ;;  %p4475_p4 = scmp.lt.s32.totalorder %s134_s1, %s134_s1 }
  0x67   :  { %p4471_p3 = scmp.ne.s32.totalorder %s134_s1, %s4470_s7  ;;  %p4476_p5 = scmp.lt.s32.totalorder %s4470_s7, %s4470_s7 }
  0x69   :  { %p4477_p6 = por %p4476_p5, %p4475_p4 }
  0x6b   :  { %p4478_p7 = pnand %p4477_p6, %p4471_p3 }
  0x6d   :  { %4481 = shalt.err (!%p4478_p7)
}
  0x6e   :  { %136 = dma.hbm_to_vmem [thread:$0]  %s5649_s12, 32, %s134_s1, [#allocation15]  }
  0x6f   :  { %s4552_s20 = smov [#allocation19]  }
  0x70   :  { %s155_s22 = sshll.u32 %s4552_s20, 4  ;;  %s156_s22 = int_to_ptr.vmem [resolvable:$true] %s155_s22 }
  0x71   :  { %s4490_s23 = scalar_lea.vmem %s156_s22, 16  ;;  %s4494_s5 = scalar_lea.vmem %s156_s22, 32 }
  0x72   :  { %p4491_p8 = scmp.ne.s32.totalorder %s156_s22, %s4490_s23  ;;  %p4495_p9 = scmp.lt.s32.totalorder %s156_s22, %s156_s22 }
  0x73   :  { %p4496_p10 = scmp.lt.s32.totalorder %s4494_s5, %s4490_s23 }
  0x75   :  { %p4497_p11 = por %p4496_p10, %p4495_p9 }
  0x77   :  { %p4498_p12 = pnand %p4497_p11, %p4491_p8 }
  0x79   :  { %4501 = shalt.err (!%p4498_p12)
}
  0x7a   :  { %158 = dma.hbm_to_vmem [thread:$0]  %s5651_s14, 16, %s156_s22, [#allocation18]  }
  0x7b   :  { %4522 = dma.done.wait [#allocation3], 1024  }
  0x7c   :  { %4523 = vsyncadd [#allocation3], 4294966272 }
  0x7d   :  { %4524 = dma.done.wait [#allocation6], 256  }
  0x7e   :  { %4525 = vsyncadd [#allocation6], 4294967040 }
  0x7f   :  { %4526 = dma.done.wait [#allocation9], 512  }
  0x80   :  { %4527 = vsyncadd [#allocation9], 4294966784 }
  0x81   :  { %4528 = dma.done.wait [#allocation12], 20480  }
  0x82   :  { %4529 = vsyncadd [#allocation12], 4294946816 }
  0x83   :  { %4530 = dma.done.wait [#allocation15], 65568  }
  0x84   :  { %4531 = vsyncadd [#allocation15], 4294901728 }
  0x85   :  { %4532 = dma.done.wait [#allocation18], 4112  }
  0x86   :  { %4533 = vsyncadd [#allocation18], 4294963184  ;;  %v209_v0 = vld [vmem:[#allocation2 + $0x10] sm:$0xff]  ;;  %v207_v1 = vld [vmem:[#allocation2] sm:$0xff]  ;;  %s4553_s12 = smov 127   ;;  %v5654_v4 = vmov 0.0   ;;  %v5653_v7 = vlaneseq }
  0x87   :  { %240 = vrot.lane.b32.xlu1 %v209_v0, %s4553_s12  ;;  %236 = vrot.lane.b32.xlu0 %v207_v1, %s4553_s12  ;;  %v210_v2 = vld [vmem:[#allocation2 + $0x18] sm:$0xff]  ;;  %v208_v3 = vld [vmem:[#allocation2 + $0x8] sm:$0xff]  ;;  %v4555_v5 = vmov 0   ;;  %s4556_s14 = smov 1   ;;  %v262_v6 = vld [vmem:[%s5639_s2] sm:$0xff]  ;;  %vm268_vm4 = vcmask 195584  }
  0x88   :  { %336 = vmatprep.mubr.f32.mxu0 %v5654_v4  ;;  %407 = vmatprep.mubr.f32.mxu1 %v5654_v4  ;;  %v4697_v8 = vand.u32 127, %v5653_v7  ;;  %v4718_v23 = vld [vmem:[#allocation5] sm:$0xff]  ;;  %v450_v54 = vld [vmem:[#allocation7] sm:$0xff]  ;;  %v651_v62 = vld [vmem:[#allocation11 + $0xe8] sm:$0xff]  ;;  %vm1059_vm6 = vcmask 392192   ;;  %vm2093_vm7 = vcmask 1040384  }
  0x89   :  { %4172 = vset.pattern.permute.xlu0 %v4555_v5  ;;  %4183 = vset.pattern.permute.xlu1 %v4555_v5  ;;  %v451_v40 = vld [vmem:[%s5641_s4] sm:$0xff]  ;;  %v653_v58 = vld [vmem:[#allocation11 + $0xf8] sm:$0xff]  ;;  %v715_v63 = vld [vmem:[#allocation11 + $0x2e8] sm:$0xff] }
  0x8a   :  { %v4700_v9 = vadd.s32 384, %v4697_v8  ;;  %vm244_vm0 = vcmp.lt.s32.totalorder %v4697_v8, 127  ;;  %vm219_vm2 = vcmp.lt.s32.totalorder %v4697_v8, 1  ;;  %vm197_vm3 = vcmp.ge.s32.totalorder %v4697_v8, 1  ;;  %v717_v59 = vld [vmem:[#allocation11 + $0x2f8] sm:$0xff]  ;;  %v652_v60 = vld [vmem:[#allocation11 + $0xf0] sm:$0xff] }
  0x8b   :  { %242 = vrot.lane.b32.xlu1 %v210_v2, %s4553_s12  ;;  %238 = vrot.lane.b32.xlu0 %v208_v3, %s4553_s12  ;;  %v716_v61 = vld [vmem:[#allocation11 + $0x2f0] sm:$0xff] }
  0x8c   :  { %vm204_vm1 = vcmp.lt.s32.totalorder %v4700_v9, 511  ;;  %v648_v5 = vld [vmem:[#allocation11 + $0xd0] sm:$0xff]  ;;  %v5253_v9 = vld [vmem:[#allocation13 + $0x88] sm:$0xff] }
  0x8f   :  { %213 = vrot.lane.b32.xlu1 %v208_v3, %s4556_s14  ;;  %211 = vrot.lane.b32.xlu0 %v207_v1, %s4556_s14 }
  0x93   :  { %217 = vrot.lane.b32.xlu1 %v210_v2, %s4556_s14  ;;  %215 = vrot.lane.b32.xlu0 %v209_v0, %s4556_s14 }
  0x97   :  { %265 = vperm.xlu0 %4172, %v262_v6   ;;  %v712_v6 = vld [vmem:[#allocation11 + $0x2d0] sm:$0xff] }
  0xf9   :  { %v241_v10 = vpop.permute.xlu1 %240  ;;  %v237_v11 = vpop.permute.xlu0 %236 }
  0xfd   :  { %v243_v12 = vpop.permute.xlu1 %242  ;;  %v239_v13 = vpop.permute.xlu0 %238 }
  0xfe   :  { %v246_v14 = vsel %vm244_vm0, %v239_v13, %v241_v10  ;;  %v248_v15 = vsel %vm244_vm0, %v243_v12, %v237_v11  ;;  %v247_v16 = vsel %vm244_vm0, %v237_v11, %v239_v13  ;;  %v245_v17 = vsel %vm244_vm0, %v241_v10, %v243_v12  ;;  %v647_v10 = vld [vmem:[#allocation11 + $0xc8] sm:$0xff]  ;;  %v646_v12 = vld [vmem:[#allocation11 + $0xc0] sm:$0xff] }
  0xff   :  { %298 = vmatprep.subr.mxu0 %v246_v14  ;;  %4004 = vmatprep.subr.msk.mxu1 %vm204_vm1, %v248_v15  ;;  %v711_v11 = vld [vmem:[#allocation11 + $0x2c8] sm:$0xff]  ;;  %v710_v13 = vld [vmem:[#allocation11 + $0x2c0] sm:$0xff]  ;;  %v645_v14 = vld [vmem:[#allocation11 + $0xb8] sm:$0xff] }
 0x100   :  { %299 = vmatpush1.msra.mxu0 %v247_v16  ;;  %370 = vmatpush1.msra.mxu1 %v245_v17  ;;  %v709_v15 = vld [vmem:[#allocation11 + $0x2b8] sm:$0xff]  ;;  %v644_v16 = vld [vmem:[#allocation11 + $0xb0] sm:$0xff] }
 0x101   :  { %v214_v18 = vpop.permute.xlu1 %213  ;;  %300 = vmatprep.subr.mxu0 %v208_v3  ;;  %v212_v19 = vpop.permute.xlu0 %211  ;;  %371 = vmatprep.subr.mxu1 %v210_v2  ;;  %v649_v2 = vld [vmem:[#allocation11 + $0xd8] sm:$0xff]  ;;  %v708_v17 = vld [vmem:[#allocation11 + $0x2b0] sm:$0xff] }
 0x102   :  { %301 = vmatpush1.msra.mxu0 %v207_v1  ;;  %v222_v20 = vsel %vm219_vm2, %v212_v19, %v214_v18  ;;  %372 = vmatpush1.msra.mxu1 %v209_v0  ;;  %v650_v0 = vld [vmem:[#allocation11 + $0xe0] sm:$0xff]  ;;  %v713_v3 = vld [vmem:[#allocation11 + $0x2d8] sm:$0xff] }
 0x103   :  { %302 = vmatprep.subr.mxu0 %v222_v20  ;;  %v714_v1 = vld [vmem:[#allocation11 + $0x2e0] sm:$0xff] }
 0x104   :  { %v642_v20 = vld [vmem:[#allocation11 + $0xa0] sm:$0xff] }
 0x105   :  { %v218_v21 = vpop.permute.xlu1 %217  ;;  %v216_v22 = vpop.permute.xlu0 %215 }
 0x106   :  { %v223_v24 = vsel %vm219_vm2, %v218_v21, %v212_v19  ;;  %v220_v25 = vsel %vm219_vm2, %v216_v22, %v218_v21  ;;  %v221_v26 = vsel %vm219_vm2, %v214_v18, %v216_v22  ;;  %v643_v18 = vld [vmem:[#allocation11 + $0xa8] sm:$0xff]  ;;  %v706_v21 = vld [vmem:[#allocation11 + $0x2a0] sm:$0xff]  ;;  %v641_v22 = vld [vmem:[#allocation11 + $0x98] sm:$0xff] }
 0x107   :  { %4002 = vmatpush1.msk.msra.mxu0 %vm197_vm3, %v223_v24  ;;  %373 = vmatprep.subr.mxu1 %v220_v25  ;;  %v707_v19 = vld [vmem:[#allocation11 + $0x2a8] sm:$0xff]  ;;  %v705_v24 = vld [vmem:[#allocation11 + $0x298] sm:$0xff]  ;;  %v640_v25 = vld [vmem:[#allocation11 + $0x90] sm:$0xff] }
 0x108   :  { %4003 = vmatmul.mubr.msk.f32.vlgmr.msra.gmra.mxu0 %vm268_vm4, %v4718_v23  ;;  %374 = vmatpush1.msra.mxu1 %v221_v26  ;;  %v704_v26 = vld [vmem:[#allocation11 + $0x290] sm:$0xff] }
 0x109   :  { %4005 = vmatmul.mubr.msk.f32.vlgmr.msra.gmra.mxu1 %vm268_vm4, %v4718_v23  ;;  %524 = vmatprep.mubr.f32.mxu0 %v5654_v4 }
 0x10a   :  { %595 = vmatprep.mubr.f32.mxu1 %v5654_v4  ;;  %v4946_v4 = vld [vmem:[#allocation11 + $0x108] sm:$0xff] }
 0x10b   :  { %5739 = vst [vmem:[#allocation48_spill] sm:$0xff] %v4946_v4 }
 0x112   :  { %v4734_v27 = vpop.permute.xlu0 %265 }
 0x1c8   :  { %v338_v28 = vpop.f32.mrf.mxu0 }
 0x1c9   :  { %v409_v29 = vpop.f32.mrf.mxu1  ;;  %v339_v30 = vadd.f32 %v338_v28, %v4734_v27  ;;  %v639_v28 = vld [vmem:[#allocation11 + $0x88] sm:$0xff] }
 0x1ca   :  { %v410_v31 = vadd.f32 %v409_v29, %v4734_v27  ;;  %v340_v32 = vpop.f32.mrf.mxu0  ;;  %v703_v29 = vld [vmem:[#allocation11 + $0x288] sm:$0xff] }
 0x1cb   :  { %v341_v33 = vadd.f32 %v340_v32, %v4734_v27  ;;  %v414_v34 = vmax.f32 %v339_v30, 0.0  ;;  %v411_v36 = vpop.f32.mrf.mxu1  ;;  %v638_v30 = vld [vmem:[#allocation11 + $0x80] sm:$0xff]  ;;  %v637_v32 = vld [vmem:[#allocation11 + $0x78] sm:$0xff] }
 0x1cc   :  { %v416_v35 = vmax.f32 %v410_v31, 0.0  ;;  %v412_v38 = vadd.f32 %v411_v36, %v4734_v27  ;;  %v702_v31 = vld [vmem:[#allocation11 + $0x280] sm:$0xff]  ;;  %v635_v36 = vld [vmem:[#allocation11 + $0x68] sm:$0xff] }
 0x1cd   :  { %434 = vrot.lane.b32.xlu1 %v414_v34, %s4553_s12  ;;  %v415_v37 = vmax.f32 %v341_v33, 0.0  ;;  %v701_v33 = vld [vmem:[#allocation11 + $0x278] sm:$0xff] }
 0x1ce   :  { %438 = vrot.lane.b32.xlu0 %v416_v35, %s4553_s12  ;;  %v417_v39 = vmax.f32 %v412_v38, 0.0  ;;  %v634_v38 = vld [vmem:[#allocation11 + $0x60] sm:$0xff] }
 0x1d1   :  { %436 = vrot.lane.b32.xlu1 %v415_v37, %s4553_s12 }
 0x1d2   :  { %418 = vrot.lane.b32.xlu0 %v414_v34, %s4556_s14 }
 0x1d5   :  { %440 = vrot.lane.b32.xlu1 %v417_v39, %s4553_s12 }
 0x1d6   :  { %422 = vrot.lane.b32.xlu0 %v416_v35, %s4556_s14 }
 0x1d9   :  { %420 = vrot.lane.b32.xlu1 %v415_v37, %s4556_s14 }
 0x1da   :  { %454 = vperm.xlu0 %4172, %v451_v40   ;;  %v633_v40 = vld [vmem:[#allocation11 + $0x58] sm:$0xff] }
 0x1dd   :  { %424 = vrot.lane.b32.xlu1 %v417_v39, %s4556_s14 }
 0x23f   :  { %v435_v41 = vpop.permute.xlu1 %434 }
 0x240   :  { %v439_v42 = vpop.permute.xlu0 %438 }
 0x243   :  { %v437_v43 = vpop.permute.xlu1 %436 }
 0x244   :  { %v444_v44 = vsel %vm244_vm0, %v435_v41, %v437_v43  ;;  %v443_v45 = vsel %vm244_vm0, %v437_v43, %v439_v42  ;;  %v419_v49 = vpop.permute.xlu0 %418  ;;  %v4775_v43 = vld [vmem:[#allocation11 + $0x250] sm:$0xff] }
 0x245   :  { %486 = vmatprep.subr.mxu0 %v443_v45  ;;  %v4777_v45 = vld [vmem:[#allocation11 + $0x248] sm:$0xff] }
 0x246   :  { %487 = vmatpush1.msra.mxu0 %v444_v44  ;;  %v631_v44 = vld [vmem:[#allocation11 + $0x48] sm:$0xff] }
 0x247   :  { %488 = vmatprep.subr.mxu0 %v415_v37  ;;  %v441_v46 = vpop.permute.xlu1 %440  ;;  %v699_v37 = vld [vmem:[#allocation11 + $0x268] sm:$0xff] }
 0x248   :  { %v442_v47 = vsel %vm244_vm0, %v439_v42, %v441_v46  ;;  %v445_v48 = vsel %vm244_vm0, %v441_v46, %v435_v41  ;;  %489 = vmatpush1.msra.mxu0 %v414_v34  ;;  %v423_v52 = vpop.permute.xlu0 %422  ;;  %v636_v34 = vld [vmem:[#allocation11 + $0x70] sm:$0xff]  ;;  %v4773_v41 = vld [vmem:[#allocation11 + $0x258] sm:$0xff]  ;;  %v630_v46 = vld [vmem:[#allocation11 + $0x40] sm:$0xff] }
 0x249   :  { %4008 = vmatprep.subr.msk.mxu1 %vm204_vm1, %v445_v48  ;;  %v632_v42 = vld [vmem:[#allocation11 + $0x50] sm:$0xff]  ;;  %v629_v48 = vld [vmem:[#allocation11 + $0x38] sm:$0xff] }
 0x24a   :  { %558 = vmatpush1.msra.mxu1 %v442_v47  ;;  %v4780_v47 = vld [vmem:[#allocation11 + $0x240] sm:$0xff] }
 0x24b   :  { %559 = vmatprep.subr.mxu1 %v417_v39  ;;  %v421_v50 = vpop.permute.xlu1 %420  ;;  %v698_v39 = vld [vmem:[#allocation11 + $0x260] sm:$0xff] }
 0x24c   :  { %560 = vmatpush1.msra.mxu1 %v416_v35  ;;  %v428_v51 = vsel %vm219_vm2, %v419_v49, %v421_v50  ;;  %v427_v57 = vsel %vm219_vm2, %v421_v50, %v423_v52  ;;  %v700_v35 = vld [vmem:[#allocation11 + $0x270] sm:$0xff] }
 0x24d   :  { %490 = vmatprep.subr.mxu0 %v428_v51  ;;  %v628_v50 = vld [vmem:[#allocation11 + $0x30] sm:$0xff] }
 0x24e   :  { %v4786_v51 = vld [vmem:[#allocation11 + $0x230] sm:$0xff] }
 0x24f   :  { %v425_v53 = vpop.permute.xlu1 %424 }
 0x250   :  { %v429_v55 = vsel %vm219_vm2, %v425_v53, %v419_v49  ;;  %v426_v56 = vsel %vm219_vm2, %v423_v52, %v425_v53  ;;  %v4783_v49 = vld [vmem:[#allocation11 + $0x238] sm:$0xff]  ;;  %v627_v52 = vld [vmem:[#allocation11 + $0x28] sm:$0xff] }
 0x251   :  { %4006 = vmatpush1.msk.msra.mxu0 %vm197_vm3, %v429_v55  ;;  %561 = vmatprep.subr.mxu1 %v426_v56  ;;  %v4789_v53 = vld [vmem:[#allocation11 + $0x228] sm:$0xff]  ;;  %v4792_v55 = vld [vmem:[#allocation11 + $0x220] sm:$0xff]  ;;  %v625_v56 = vld [vmem:[#allocation11 + $0x18] sm:$0xff] }
 0x252   :  { %4007 = vmatmul.mubr.msk.f32.vlgmr.msra.gmra.mxu0 %vm268_vm4, %v450_v54  ;;  %562 = vmatpush1.msra.mxu1 %v427_v57  ;;  %v4795_v57 = vld [vmem:[#allocation11 + $0x218] sm:$0xff] }
 0x253   :  { %4009 = vmatmul.mubr.msk.f32.vlgmr.msra.gmra.mxu1 %vm268_vm4, %v450_v54  ;;  %750 = vmatprep.subr.mxu0 %v653_v58  ;;  %v626_v54 = vld [vmem:[#allocation11 + $0x20] sm:$0xff]  ;;  %v624_v58 = vld [vmem:[#allocation11 + $0x10] sm:$0xff] }
 0x254   :  { %821 = vmatprep.subr.mxu1 %v717_v59  ;;  %751 = vmatpush1.msra.mxu0 %v652_v60  ;;  %v4798_v59 = vld [vmem:[#allocation11 + $0x210] sm:$0xff]  ;;  %v623_v60 = vld [vmem:[#allocation11 + $0x8] sm:$0xff] }
 0x255   :  { %822 = vmatpush1.msra.mxu1 %v716_v61  ;;  %752 = vmatprep.subr.mxu0 %v651_v62  ;;  %v4801_v61 = vld [vmem:[#allocation11 + $0x208] sm:$0xff]  ;;  %v622_v62 = vld [vmem:[#allocation11] sm:$0xff] }
 0x256   :  { %823 = vmatprep.subr.mxu1 %v715_v63  ;;  %753 = vmatpush1.msra.mxu0 %v650_v0  ;;  %v4804_v63 = vld [vmem:[#allocation11 + $0x200] sm:$0xff]  ;;  %v685_v0 = vld [vmem:[#allocation11 + $0x1f8] sm:$0xff] }
 0x257   :  { %824 = vmatpush1.msra.mxu1 %v714_v1  ;;  %754 = vmatprep.subr.mxu0 %v649_v2  ;;  %v4807_v1 = vld [vmem:[#allocation11 + $0x3f8] sm:$0xff]  ;;  %v684_v2 = vld [vmem:[#allocation11 + $0x1f0] sm:$0xff] }
 0x258   :  { %825 = vmatprep.subr.mxu1 %v713_v3  ;;  %755 = vmatpush1.msra.mxu0 %v648_v5  ;;  %v4810_v3 = vld [vmem:[#allocation11 + $0x3f0] sm:$0xff]  ;;  %v683_v5 = vld [vmem:[#allocation11 + $0x1e8] sm:$0xff] }
 0x259   :  { %826 = vmatpush1.msra.mxu1 %v712_v6  ;;  %756 = vmatprep.subr.mxu0 %v647_v10  ;;  %v4813_v6 = vld [vmem:[#allocation11 + $0x3e8] sm:$0xff]  ;;  %v682_v10 = vld [vmem:[#allocation11 + $0x1e0] sm:$0xff] }
 0x25a   :  { %827 = vmatprep.subr.mxu1 %v711_v11  ;;  %757 = vmatpush1.msra.mxu0 %v646_v12  ;;  %v4816_v11 = vld [vmem:[#allocation11 + $0x3e0] sm:$0xff]  ;;  %v681_v12 = vld [vmem:[#allocation11 + $0x1d8] sm:$0xff] }
 0x25b   :  { %828 = vmatpush1.msra.mxu1 %v710_v13  ;;  %758 = vmatprep.subr.mxu0 %v645_v14  ;;  %v4819_v13 = vld [vmem:[#allocation11 + $0x3d8] sm:$0xff]  ;;  %v680_v14 = vld [vmem:[#allocation11 + $0x1d0] sm:$0xff] }
 0x25c   :  { %829 = vmatprep.subr.mxu1 %v709_v15  ;;  %759 = vmatpush1.msra.mxu0 %v644_v16  ;;  %v4822_v15 = vld [vmem:[#allocation11 + $0x3d0] sm:$0xff]  ;;  %v679_v16 = vld [vmem:[#allocation11 + $0x1c8] sm:$0xff] }
 0x25d   :  { %830 = vmatpush1.msra.mxu1 %v708_v17  ;;  %760 = vmatprep.subr.mxu0 %v643_v18  ;;  %v4825_v17 = vld [vmem:[#allocation11 + $0x3c8] sm:$0xff]  ;;  %v678_v18 = vld [vmem:[#allocation11 + $0x1c0] sm:$0xff] }
 0x25e   :  { %831 = vmatprep.subr.mxu1 %v707_v19  ;;  %761 = vmatpush1.msra.mxu0 %v642_v20  ;;  %v4828_v19 = vld [vmem:[#allocation11 + $0x3c0] sm:$0xff]  ;;  %v677_v20 = vld [vmem:[#allocation11 + $0x1b8] sm:$0xff] }
 0x25f   :  { %832 = vmatpush1.msra.mxu1 %v706_v21  ;;  %762 = vmatprep.subr.mxu0 %v641_v22  ;;  %v4831_v21 = vld [vmem:[#allocation11 + $0x3b8] sm:$0xff]  ;;  %v676_v22 = vld [vmem:[#allocation11 + $0x1b0] sm:$0xff] }
 0x260   :  { %833 = vmatprep.subr.mxu1 %v705_v24  ;;  %763 = vmatpush1.msra.mxu0 %v640_v25  ;;  %v4834_v24 = vld [vmem:[#allocation11 + $0x3b0] sm:$0xff]  ;;  %v675_v25 = vld [vmem:[#allocation11 + $0x1a8] sm:$0xff] }
 0x261   :  { %834 = vmatpush1.msra.mxu1 %v704_v26  ;;  %764 = vmatprep.subr.mxu0 %v639_v28  ;;  %v4837_v26 = vld [vmem:[#allocation11 + $0x3a8] sm:$0xff]  ;;  %v674_v28 = vld [vmem:[#allocation11 + $0x1a0] sm:$0xff] }
 0x262   :  { %835 = vmatprep.subr.mxu1 %v703_v29  ;;  %765 = vmatpush1.msra.mxu0 %v638_v30  ;;  %v4840_v29 = vld [vmem:[#allocation11 + $0x3a0] sm:$0xff]  ;;  %v673_v30 = vld [vmem:[#allocation11 + $0x198] sm:$0xff] }
 0x263   :  { %836 = vmatpush1.msra.mxu1 %v702_v31  ;;  %766 = vmatprep.subr.mxu0 %v637_v32  ;;  %v4843_v31 = vld [vmem:[#allocation11 + $0x398] sm:$0xff]  ;;  %v672_v32 = vld [vmem:[#allocation11 + $0x190] sm:$0xff] }
 0x264   :  { %837 = vmatprep.subr.mxu1 %v701_v33  ;;  %767 = vmatpush1.msra.mxu0 %v636_v34  ;;  %v4846_v33 = vld [vmem:[#allocation11 + $0x390] sm:$0xff]  ;;  %v671_v34 = vld [vmem:[#allocation11 + $0x188] sm:$0xff] }
 0x265   :  { %838 = vmatpush1.msra.mxu1 %v700_v35  ;;  %768 = vmatprep.subr.mxu0 %v635_v36  ;;  %v4849_v35 = vld [vmem:[#allocation11 + $0x388] sm:$0xff]  ;;  %v4852_v36 = vld [vmem:[#allocation11 + $0x180] sm:$0xff] }
 0x266   :  { %839 = vmatprep.subr.mxu1 %v699_v37  ;;  %769 = vmatpush1.msra.mxu0 %v634_v38  ;;  %5719 = vst [vmem:[#allocation28_spill] sm:$0xff] %v4852_v36  ;;  %v4854_v37 = vld [vmem:[#allocation11 + $0x380] sm:$0xff]  ;;  %v4857_v38 = vld [vmem:[#allocation11 + $0x178] sm:$0xff] }
 0x267   :  { %840 = vmatpush1.msra.mxu1 %v698_v39  ;;  %770 = vmatprep.subr.mxu0 %v633_v40  ;;  %5720 = vst [vmem:[#allocation29_spill] sm:$0xff] %v4857_v38  ;;  %v4859_v39 = vld [vmem:[#allocation11 + $0x378] sm:$0xff]  ;;  %v4862_v40 = vld [vmem:[#allocation11 + $0x170] sm:$0xff] }
 0x268   :  { %841 = vmatprep.subr.mxu1 %v4773_v41  ;;  %771 = vmatpush1.msra.mxu0 %v632_v42  ;;  %5721 = vst [vmem:[#allocation30_spill] sm:$0xff] %v4862_v40  ;;  %v4864_v42 = vld [vmem:[#allocation11 + $0x370] sm:$0xff] }
 0x269   :  { %842 = vmatpush1.msra.mxu1 %v4775_v43  ;;  %772 = vmatprep.subr.mxu0 %v631_v44  ;;  %v4868_v44 = vld [vmem:[#allocation11 + $0x168] sm:$0xff] }
 0x26a   :  { %843 = vmatprep.subr.mxu1 %v4777_v45  ;;  %773 = vmatpush1.msra.mxu0 %v630_v46  ;;  %5722 = vst [vmem:[#allocation31_spill] sm:$0xff] %v4868_v44  ;;  %v4870_v46 = vld [vmem:[#allocation11 + $0x368] sm:$0xff] }
 0x26b   :  { %844 = vmatpush1.msra.mxu1 %v4780_v47  ;;  %774 = vmatprep.subr.mxu0 %v629_v48  ;;  %v4874_v48 = vld [vmem:[#allocation11 + $0x160] sm:$0xff] }
 0x26c   :  { %845 = vmatprep.subr.mxu1 %v4783_v49  ;;  %775 = vmatpush1.msra.mxu0 %v628_v50  ;;  %5723 = vst [vmem:[#allocation32_spill] sm:$0xff] %v4874_v48  ;;  %v4876_v50 = vld [vmem:[#allocation11 + $0x360] sm:$0xff] }
 0x26d   :  { %846 = vmatpush1.msra.mxu1 %v4786_v51  ;;  %776 = vmatprep.subr.mxu0 %v627_v52  ;;  %v4880_v52 = vld [vmem:[#allocation11 + $0x158] sm:$0xff] }
 0x26e   :  { %847 = vmatprep.subr.mxu1 %v4789_v53  ;;  %777 = vmatpush1.msra.mxu0 %v626_v54  ;;  %5724 = vst [vmem:[#allocation33_spill] sm:$0xff] %v4880_v52  ;;  %v4882_v54 = vld [vmem:[#allocation11 + $0x358] sm:$0xff] }
 0x26f   :  { %848 = vmatpush1.msra.mxu1 %v4792_v55  ;;  %778 = vmatprep.subr.mxu0 %v625_v56  ;;  %v4886_v56 = vld [vmem:[#allocation11 + $0x150] sm:$0xff] }
 0x270   :  { %849 = vmatprep.subr.mxu1 %v4795_v57  ;;  %779 = vmatpush1.msra.mxu0 %v624_v58  ;;  %5725 = vst [vmem:[#allocation34_spill] sm:$0xff] %v4886_v56  ;;  %v4888_v58 = vld [vmem:[#allocation11 + $0x350] sm:$0xff] }
 0x271   :  { %850 = vmatpush1.msra.mxu1 %v4798_v59  ;;  %780 = vmatprep.subr.mxu0 %v623_v60  ;;  %v4892_v60 = vld [vmem:[#allocation11 + $0x148] sm:$0xff] }
 0x272   :  { %851 = vmatprep.subr.mxu1 %v4801_v61  ;;  %781 = vmatpush1.msra.mxu0 %v622_v62  ;;  %5726 = vst [vmem:[#allocation35_spill] sm:$0xff] %v4892_v60  ;;  %v4894_v62 = vld [vmem:[#allocation11 + $0x348] sm:$0xff] }
 0x273   :  { %852 = vmatpush1.msra.mxu1 %v4804_v63  ;;  %782 = vmatprep.subr.mxu0 %v685_v0  ;;  %v4898_v0 = vld [vmem:[#allocation11 + $0x140] sm:$0xff] }
 0x274   :  { %853 = vmatprep.subr.mxu1 %v4807_v1  ;;  %783 = vmatpush2.msra.mxu0 %v684_v2  ;;  %5727 = vst [vmem:[#allocation36_spill] sm:$0xff] %v4898_v0  ;;  %v4900_v2 = vld [vmem:[#allocation11 + $0x340] sm:$0xff] }
 0x275   :  { %854 = vmatpush2.msra.mxu1 %v4810_v3  ;;  %784 = vmatprep.subr.mxu0 %v683_v5  ;;  %v4904_v5 = vld [vmem:[#allocation11 + $0x138] sm:$0xff] }
 0x276   :  { %855 = vmatprep.subr.mxu1 %v4813_v6  ;;  %785 = vmatpush2.msra.mxu0 %v682_v10  ;;  %5728 = vst [vmem:[#allocation37_spill] sm:$0xff] %v4904_v5  ;;  %v4911_v10 = vld [vmem:[#allocation11 + $0x338] sm:$0xff] }
 0x277   :  { %856 = vmatpush2.msra.mxu1 %v4816_v11  ;;  %786 = vmatprep.subr.mxu0 %v681_v12  ;;  %v4914_v12 = vld [vmem:[#allocation11 + $0x130] sm:$0xff] }
 0x278   :  { %857 = vmatprep.subr.mxu1 %v4819_v13  ;;  %787 = vmatpush2.msra.mxu0 %v680_v14  ;;  %5729 = vst [vmem:[#allocation38_spill] sm:$0xff] %v4914_v12  ;;  %v4916_v14 = vld [vmem:[#allocation11 + $0x330] sm:$0xff] }
 0x279   :  { %858 = vmatpush2.msra.mxu1 %v4822_v15  ;;  %788 = vmatprep.subr.mxu0 %v679_v16  ;;  %v4920_v16 = vld [vmem:[#allocation11 + $0x128] sm:$0xff] }
 0x27a   :  { %859 = vmatprep.subr.mxu1 %v4825_v17  ;;  %789 = vmatpush2.msra.mxu0 %v678_v18  ;;  %5730 = vst [vmem:[#allocation39_spill] sm:$0xff] %v4920_v16  ;;  %v4922_v18 = vld [vmem:[#allocation11 + $0x328] sm:$0xff] }
 0x27b   :  { %860 = vmatpush2.msra.mxu1 %v4828_v19  ;;  %790 = vmatprep.subr.mxu0 %v677_v20  ;;  %5731 = vst [vmem:[#allocation40_spill] sm:$0xff] %v4922_v18  ;;  %v4926_v20 = vld [vmem:[#allocation11 + $0x120] sm:$0xff] }
 0x27c   :  { %861 = vmatprep.subr.mxu1 %v4831_v21  ;;  %791 = vmatpush2.msra.mxu0 %v676_v22  ;;  %5732 = vst [vmem:[#allocation41_spill] sm:$0xff] %v4926_v20  ;;  %v4928_v22 = vld [vmem:[#allocation11 + $0x320] sm:$0xff] }
 0x27d   :  { %862 = vmatpush2.msra.mxu1 %v4834_v24  ;;  %792 = vmatprep.subr.mxu0 %v675_v25  ;;  %5733 = vst [vmem:[#allocation42_spill] sm:$0xff] %v4928_v22  ;;  %v4932_v25 = vld [vmem:[#allocation11 + $0x118] sm:$0xff] }
 0x27e   :  { %863 = vmatprep.subr.mxu1 %v4837_v26  ;;  %793 = vmatpush2.msra.mxu0 %v674_v28  ;;  %5734 = vst [vmem:[#allocation43_spill] sm:$0xff] %v4932_v25  ;;  %v4934_v28 = vld [vmem:[#allocation11 + $0x318] sm:$0xff] }
 0x27f   :  { %864 = vmatpush2.msra.mxu1 %v4840_v29  ;;  %794 = vmatprep.subr.mxu0 %v673_v30  ;;  %5735 = vst [vmem:[#allocation44_spill] sm:$0xff] %v4934_v28  ;;  %v4938_v30 = vld [vmem:[#allocation11 + $0x110] sm:$0xff] }
 0x280   :  { %865 = vmatprep.subr.mxu1 %v4843_v31  ;;  %795 = vmatpush2.msra.mxu0 %v672_v32  ;;  %5736 = vst [vmem:[#allocation45_spill] sm:$0xff] %v4938_v30  ;;  %v4940_v32 = vld [vmem:[#allocation11 + $0x310] sm:$0xff] }
 0x281   :  { %866 = vmatpush2.msra.mxu1 %v4846_v33  ;;  %796 = vmatprep.subr.mxu0 %v671_v34  ;;  %5737 = vst [vmem:[#allocation46_spill] sm:$0xff] %v4940_v32  ;;  %v4942_v34 = vpop.permute.xlu0 %454 }
 0x282   :  { %867 = vmatprep.subr.mxu1 %v4849_v35  ;;  %797 = vmatpush2.msra.mxu0 %v4852_v36  ;;  %5738 = vst [vmem:[#allocation47_spill] sm:$0xff] %v4942_v34 }
 0x283   :  { %868 = vmatpush2.msra.mxu1 %v4854_v37  ;;  %798 = vmatprep.subr.mxu0 %v4857_v38 }
 0x284   :  { %869 = vmatprep.subr.mxu1 %v4859_v39  ;;  %799 = vmatpush2.msra.mxu0 %v4862_v40 }
 0x285   :  { %870 = vmatpush2.msra.mxu1 %v4864_v42  ;;  %800 = vmatprep.subr.mxu0 %v4868_v44 }
 0x286   :  { %871 = vmatprep.subr.mxu1 %v4870_v46  ;;  %801 = vmatpush2.msra.mxu0 %v4874_v48 }
 0x287   :  { %872 = vmatpush2.msra.mxu1 %v4876_v50  ;;  %802 = vmatprep.subr.mxu0 %v4880_v52 }
 0x288   :  { %873 = vmatprep.subr.mxu1 %v4882_v54  ;;  %803 = vmatpush2.msra.mxu0 %v4886_v56 }
 0x289   :  { %874 = vmatpush2.msra.mxu1 %v4888_v58  ;;  %804 = vmatprep.subr.mxu0 %v4892_v60 }
 0x28a   :  { %875 = vmatprep.subr.mxu1 %v4894_v62  ;;  %805 = vmatpush2.msra.mxu0 %v4898_v0 }
 0x28b   :  { %876 = vmatpush2.msra.mxu1 %v4900_v2  ;;  %806 = vmatprep.subr.mxu0 %v4904_v5  ;;  %v4955_v5 = vld [vmem:[#allocation11 + $0x300] sm:$0xff] }
 0x28c   :  { %877 = vmatprep.subr.mxu1 %v4911_v10  ;;  %807 = vmatpush2.msra.mxu0 %v4914_v12  ;;  %5742 = vst [vmem:[#allocation51_spill] sm:$0xff] %v4955_v5 }
 0x28d   :  { %878 = vmatpush2.msra.mxu1 %v4916_v14  ;;  %808 = vmatprep.subr.mxu0 %v4920_v16  ;;  %v4950_v16 = vld [vmem:[#allocation11 + $0x100] sm:$0xff] }
 0x28e   :  { %879 = vmatprep.subr.mxu1 %v4922_v18  ;;  %809 = vmatpush2.msra.mxu0 %v4926_v20  ;;  %v4948_v20 = vld [vmem:[#allocation11 + $0x308] sm:$0xff]  ;;  %5741 = vst [vmem:[#allocation50_spill] sm:$0xff] %v4950_v16 }
 0x28f   :  { %880 = vmatpush2.msra.mxu1 %v4928_v22  ;;  %810 = vmatprep.subr.mxu0 %v4932_v25  ;;  %5740 = vst [vmem:[#allocation49_spill] sm:$0xff] %v4948_v20 }
 0x290   :  { %881 = vmatprep.subr.mxu1 %v4934_v28  ;;  %811 = vmatpush2.msra.mxu0 %v4938_v30 }
 0x291   :  { %882 = vmatpush2.msra.mxu1 %v4940_v32  ;;  %812 = vmatprep.subr.mxu0 %v4946_v4 }
 0x292   :  { %883 = vmatprep.subr.mxu1 %v4948_v20  ;;  %813 = vmatpush2.msra.mxu0 %v4950_v16 }
 0x293   :  { %884 = vmatpush2.msra.mxu1 %v4955_v5 }
 0x312   :  { %v526_v7 = vpop.f32.mrf.mxu0 }
 0x313   :  { %v527_v25 = vadd.f32 %v526_v7, %v4942_v34  ;;  %v597_v12 = vpop.f32.mrf.mxu1 }
 0x314   :  { %v598_v0 = vadd.f32 %v597_v12, %v4942_v34  ;;  %v528_v30 = vpop.f32.mrf.mxu0 }
 0x315   :  { %v529_v60 = vadd.f32 %v528_v30, %v4942_v34  ;;  %v599_v56 = vpop.f32.mrf.mxu1  ;;  %v602_v7 = vmax.f32 %v527_v25, 0.0 }
 0x316   :  { %v600_v52 = vadd.f32 %v599_v56, %v4942_v34  ;;  %v604_v44 = vmax.f32 %v598_v0, 0.0 }
 0x317   :  { %v603_v48 = vmax.f32 %v529_v60, 0.0 }
 0x318   :  { %v605_v4 = vmax.f32 %v600_v52, 0.0 }
 0x319   :  { %v4173_v40 = vpack.i.bf16 %v603_v48, %v602_v7 }
 0x31a   :  { %v4178_v38 = vpack.i.bf16 %v605_v4, %v604_v44 }
 0x31b   :  { %4174 = vrot.lane.b32.xlu1 %v4173_v40, %s4553_s12 }
 0x31c   :  { %4179 = vrot.lane.b32.xlu0 %v4178_v38, %s4553_s12 }
 0x38d   :  { %v4175_v12 = vpop.permute.xlu1 %4174 }
 0x38e   :  { %v4177_v36 = vunpack.i.h.bf16 %v4175_v12  ;;  %v4176_v16 = vunpack.i.l.bf16 %v4175_v12  ;;  %v4180_v20 = vpop.permute.xlu0 %4179 }
 0x38f   :  { %v4182_v5 = vunpack.i.h.bf16 %v4180_v20  ;;  %v4181_v32 = vunpack.i.l.bf16 %v4180_v20  ;;  %v5743_v20 = vmov 0.0  }
 0x390   :  { %v616_v30 = vsel %vm244_vm0, %v4176_v16, %v4177_v36 }
 0x391   :  { %v614_v56 = vsel %vm244_vm0, %v4181_v32, %v4182_v5  ;;  %v615_v52 = vsel %vm244_vm0, %v4177_v36, %v4181_v32  ;;  %v617_v40 = vsel %vm244_vm0, %v4182_v5, %v4176_v16  ;;  %v618_v25 = vmax.f32 %v602_v7, %v616_v30 }
 0x392   :  { %v620_v60 = vmax.f32 %v604_v44, %v614_v56  ;;  %v619_v38 = vmax.f32 %v603_v48, %v615_v52  ;;  %v621_v0 = vmax.f32 %v605_v4, %v617_v40  ;;  %v915_v4 = vld [vmem:[%s5643_s6 + $0x8] sm:$0xff]  ;;  %v914_v44 = vld [vmem:[%s5643_s6] sm:$0xff]  ;;  %v4985_v48 = vadd.s32 128, %v4697_v8  ;;  %v4998_v40 = vld [vmem:[#allocation8] sm:$0xff] }
 0x393   :  { %5744 = vst [vmem:[#allocation52_spill] sm:$0xff] %v4998_v40  ;;  %v2118_v8 = vld [vmem:[#allocation14 + $0xb8] sm:$0xff] }
 0x394   :  { %814 = vmatprep.mubr.f32.mxu0 %v619_v38  ;;  %885 = vmatprep.mubr.f32.mxu1 %v621_v0  ;;  %vm206_vm5 = vcmp.lt.s32.totalorder %v4985_v48, 255 }
 0x395   :  { %815 = vmatmul.mubr.f32.vlgmr.msra.gmra.mxu0 %v618_v25  ;;  %886 = vmatmul.mubr.f32.vlgmr.msra.gmra.mxu1 %v620_v60  ;;  %v5005_v60 = vld [vmem:[#allocation8 + $0x8] sm:$0xff] }
 0x396   :  { %996 = vmatprep.mubr.f32.mxu0 %v5743_v20  ;;  %1130 = vmatprep.mubr.f32.mxu1 %v5743_v20  ;;  %5745 = vst [vmem:[#allocation53_spill] sm:$0xff] %v5005_v60 }
 0x455   :  { %v816_v12 = vpop.f32.mrf.mxu0  ;;  %v887_v34 = vpop.f32.mrf.mxu1 }
 0x456   :  { %v888_v28 = vadd.f32 %v887_v34, %v816_v12 }
 0x457   :  { %v818_v22 = vpop.f32.mrf.mxu0  ;;  %v889_v36 = vpop.f32.mrf.mxu1 }
 0x458   :  { %v890_v32 = vadd.f32 %v889_v36, %v818_v22  ;;  %900 = vrot.lane.b32.xlu1 %v888_v28, %s4553_s12 }
 0x45a   :  { %902 = vrot.lane.b32.xlu0 %v890_v32, %s4553_s12 }
 0x45c   :  { %892 = vrot.lane.b32.xlu1 %v888_v28, %s4556_s14 }
 0x45e   :  { %894 = vrot.lane.b32.xlu0 %v890_v32, %s4556_s14 }
 0x460   :  { %923 = vperm.xlu1 %4183, %v915_v4  }
 0x462   :  { %918 = vperm.xlu0 %4172, %v914_v44  }
 0x4ca   :  { %v901_v5 = vpop.permute.xlu1 %900 }
 0x4cc   :  { %v903_v16 = vpop.permute.xlu0 %902 }
 0x4cd   :  { %v904_v22 = vsel %vm244_vm0, %v901_v5, %v903_v16  ;;  %v905_v34 = vsel %vm244_vm0, %v903_v16, %v901_v5 }
 0x4ce   :  { %4010 = vmatprep.subr.msk.mxu0 %vm206_vm5, %v905_v34  ;;  %v893_v7 = vpop.permute.xlu1 %892 }
 0x4cf   :  { %959 = vmatpush1.msra.mxu0 %v904_v22 }
 0x4d0   :  { %v895_v30 = vpop.permute.xlu0 %894  ;;  %960 = vmatprep.subr.mxu0 %v890_v32 }
 0x4d1   :  { %v897_v56 = vsel %vm219_vm2, %v895_v30, %v893_v7  ;;  %961 = vmatpush1.msra.mxu0 %v888_v28  ;;  %v896_v52 = vsel %vm219_vm2, %v893_v7, %v895_v30  ;;  %v1272_v30 = vld [vmem:[#allocation2 + $0x28] sm:$0xff] }
 0x4d2   :  { %962 = vmatprep.subr.mxu0 %v896_v52  ;;  %v1271_v52 = vld [vmem:[#allocation2 + $0x20] sm:$0xff] }
 0x4d3   :  { %4011 = vmatpush1.msk.msra.mxu0 %vm197_vm3, %v897_v56  ;;  %v5025_v56 = vld [vmem:[#allocation2 + $0x30] sm:$0xff] }
 0x4d4   :  { %4012 = vmatmul.mubr.msk.f32.vlgmr.msra.gmra.mxu0 %vm268_vm4, %v4998_v40 }
 0x4d5   :  { %1002 = vmatprep.mubr.f32.mxu0 %v5743_v20 }
 0x4d8   :  { %4013 = vmatmul.mubr.msk.f32.gmra.mxu0 %vm268_vm4, %v5005_v60 }
 0x4db   :  { %v5013_v4 = vpop.permute.xlu1 %923 }
 0x4dc   :  { %5747 = vst [vmem:[#allocation55_spill] sm:$0xff] %v5013_v4 }
 0x4dd   :  { %v5009_v28 = vpop.permute.xlu0 %918 }
 0x4de   :  { %5746 = vst [vmem:[#allocation54_spill] sm:$0xff] %v5009_v28 }
 0x594   :  { %v998_v38 = vpop.f32.mrf.mxu0 }
 0x595   :  { %v999_v0 = vadd.f32 %v998_v38, %v5009_v28  ;;  %v5032_v38 = vld [vmem:[#allocation2 + $0x38] sm:$0xff] }
 0x596   :  { %v1000_v25 = vpop.f32.mrf.mxu0 }
 0x597   :  { %v1009_v12 = vmax.f32 %v999_v0, 0.0  ;;  %v1001_v36 = vadd.f32 %v1000_v25, %v5009_v28 }
 0x598   :  { %v1004_v32 = vpop.f32.mrf.mxu0 }
 0x599   :  { %v1010_v44 = vmax.f32 %v1001_v36, 0.0  ;;  %1029 = vrot.lane.b32.xlu1 %v1009_v12, %s4553_s12  ;;  %v1005_v22 = vadd.f32 %v1004_v32, %v5013_v4 }
 0x59a   :  { %v1006_v5 = vpop.f32.mrf.mxu0 }
 0x59b   :  { %v1007_v16 = vadd.f32 %v1006_v5, %v5013_v4  ;;  %1033 = vrot.lane.b32.xlu0 %v1010_v44, %s4553_s12  ;;  %v1011_v7 = vmax.f32 %v1005_v22, 0.0 }
 0x59d   :  { %v1012_v34 = vmax.f32 %v1007_v16, 0.0  ;;  %1013 = vrot.lane.b32.xlu1 %v1009_v12, %s4556_s14 }
 0x59f   :  { %1035 = vrot.lane.b32.xlu0 %v1012_v34, %s4553_s12 }
 0x5a1   :  { %1031 = vrot.lane.b32.xlu1 %v1011_v7, %s4553_s12 }
 0x5a3   :  { %1017 = vrot.lane.b32.xlu0 %v1010_v44, %s4556_s14 }
 0x5a5   :  { %1015 = vrot.lane.b32.xlu1 %v1011_v7, %s4556_s14 }
 0x5a7   :  { %1019 = vrot.lane.b32.xlu0 %v1012_v34, %s4556_s14 }
 0x5a9   :  { %1293 = vrot.lane.b32.xlu1 %v1272_v30, %s4553_s12 }
 0x5ab   :  { %1295 = vrot.lane.b32.xlu0 %v5025_v56, %s4553_s12 }
 0x5ad   :  { %1291 = vrot.lane.b32.xlu1 %v1271_v52, %s4553_s12 }
 0x5af   :  { %1275 = vrot.lane.b32.xlu0 %v1271_v52, %s4556_s14 }
 0x5b1   :  { %1277 = vrot.lane.b32.xlu1 %v1272_v30, %s4556_s14 }
 0x5b3   :  { %1281 = vrot.lane.b32.xlu0 %v5032_v38, %s4556_s14 }
 0x5b5   :  { %1297 = vrot.lane.b32.xlu1 %v5032_v38, %s4553_s12 }
 0x5b7   :  { %1279 = vrot.lane.b32.xlu0 %v5025_v56, %s4556_s14 }
 0x60b   :  { %v1030_v0 = vpop.permute.xlu1 %1029 }
 0x60d   :  { %v1034_v25 = vpop.permute.xlu0 %1033 }
 0x60e   :  { %v1039_v4 = vsel %vm244_vm0, %v1034_v25, %v1030_v0  ;;  %v1037_v60 = vsel %vm244_vm0, %v1030_v0, %v1034_v25 }
 0x60f   :  { %v1014_v36 = vpop.permute.xlu1 %1013 }
 0x611   :  { %v1036_v32 = vpop.permute.xlu0 %1035 }
 0x613   :  { %v1032_v5 = vpop.permute.xlu1 %1031 }
 0x614   :  { %v1038_v16 = vsel %vm244_vm0, %v1032_v5, %v1036_v32  ;;  %v1040_v22 = vsel %vm244_vm0, %v1036_v32, %v1032_v5 }
 0x615   :  { %v1018_v28 = vpop.permute.xlu0 %1017  ;;  %4014 = vmatprep.subr.msk.mxu1 %vm206_vm5, %v1040_v22 }
 0x616   :  { %1087 = vmatpush1.msra.mxu1 %v1038_v16 }
 0x617   :  { %4015 = vmatprep.subr.msk.mxu1 %vm206_vm5, %v1039_v4  ;;  %v1016_v40 = vpop.permute.xlu1 %1015  ;;  %v5061_v4 = vld [vmem:[#allocation10] sm:$0xff] }
 0x618   :  { %1089 = vmatpush1.msra.mxu1 %v1037_v60  ;;  %v1021_v60 = vsel %vm219_vm2, %v1014_v36, %v1018_v28  ;;  %5748 = vst [vmem:[#allocation56_spill] sm:$0xff] %v5061_v4 }
 0x619   :  { %v1020_v18 = vpop.permute.xlu0 %1019  ;;  %1090 = vmatprep.subr.mxu1 %v1012_v34 }
 0x61a   :  { %1091 = vmatpush1.msra.mxu1 %v1011_v7  ;;  %v1022_v5 = vsel %vm219_vm2, %v1016_v40, %v1020_v18  ;;  %v1024_v16 = vsel %vm219_vm2, %v1020_v18, %v1016_v40 }
 0x61b   :  { %1092 = vmatprep.subr.mxu1 %v1010_v44  ;;  %v1294_v32 = vpop.permute.xlu1 %1293 }
 0x61c   :  { %1093 = vmatpush1.msra.mxu1 %v1009_v12  ;;  %v1023_v12 = vsel %vm219_vm2, %v1018_v28, %v1014_v36  ;;  %v5074_v28 = vld [vmem:[#allocation10 + $0x8] sm:$0xff] }
 0x61d   :  { %v1296_v22 = vpop.permute.xlu0 %1295  ;;  %1094 = vmatprep.subr.mxu1 %v1022_v5  ;;  %5749 = vst [vmem:[#allocation57_spill] sm:$0xff] %v5074_v28 }
 0x61e   :  { %4016 = vmatpush1.msk.msra.mxu1 %vm197_vm3, %v1024_v16  ;;  %v1300_v18 = vsel %vm244_vm0, %v1294_v32, %v1296_v22 }
 0x61f   :  { %1096 = vmatprep.subr.mxu1 %v1021_v60  ;;  %v1292_v44 = vpop.permute.xlu1 %1291 }
 0x620   :  { %v1301_v34 = vsel %vm244_vm0, %v1292_v44, %v1294_v32  ;;  %4017 = vmatpush1.msk.msra.mxu1 %vm197_vm3, %v1023_v12 }
 0x621   :  { %v1276_v40 = vpop.permute.xlu0 %1275  ;;  %4018 = vmatmul.mubr.msk.f32.vlgmr.msra.gmra.mxu1 %vm1059_vm6, %v5061_v4  ;;  %1333 = vmatprep.subr.mxu1 %v1300_v18  ;;  %v5182_v4 = vld [vmem:[#allocation13 + $0x48] sm:$0xff] }
 0x622   :  { %1334 = vmatpush1.msra.mxu1 %v1301_v34  ;;  %1136 = vmatprep.mubr.f32.mxu1 %v5743_v20  ;;  %5760 = vst [vmem:[#allocation68_spill] sm:$0xff] %v5182_v4 }
 0x623   :  { %1335 = vmatprep.subr.mxu1 %v1272_v30  ;;  %v1278_v7 = vpop.permute.xlu1 %1277 }
 0x624   :  { %1336 = vmatpush1.msra.mxu1 %v1271_v52  ;;  %v1285_v0 = vsel %vm219_vm2, %v1276_v40, %v1278_v7 }
 0x625   :  { %v1282_v25 = vpop.permute.xlu0 %1281  ;;  %4019 = vmatmul.mubr.msk.f32.gmra.mxu1 %vm1059_vm6, %v5074_v28  ;;  %1337 = vmatprep.subr.mxu1 %v1285_v0  ;;  %v5179_v28 = vld [vmem:[#allocation13 + $0xc8] sm:$0xff] }
 0x626   :  { %v1286_v36 = vsel %vm219_vm2, %v1282_v25, %v1276_v40  ;;  %1371 = vmatprep.mubr.f32.mxu1 %v5743_v20  ;;  %5759 = vst [vmem:[#allocation67_spill] sm:$0xff] %v5179_v28 }
 0x627   :  { %4020 = vmatpush1.msk.msra.mxu1 %vm197_vm3, %v1286_v36  ;;  %v1298_v32 = vpop.permute.xlu1 %1297 }
 0x628   :  { %v1299_v30 = vsel %vm244_vm0, %v1296_v22, %v1298_v32  ;;  %v1302_v52 = vsel %vm244_vm0, %v1298_v32, %v1292_v44 }
 0x629   :  { %v1280_v5 = vpop.permute.xlu0 %1279  ;;  %4021 = vmatmul.mubr.msk.f32.vlgmr.msra.gmra.mxu1 %vm268_vm4, %v4718_v23  ;;  %4022 = vmatprep.subr.msk.mxu1 %vm204_vm1, %v1302_v52 }
 0x62a   :  { %1405 = vmatpush1.msra.mxu1 %v1299_v30  ;;  %1442 = vmatprep.mubr.f32.mxu1 %v5743_v20  ;;  %v1283_v16 = vsel %vm219_vm2, %v1280_v5, %v1282_v25  ;;  %v1284_v22 = vsel %vm219_vm2, %v1278_v7, %v1280_v5  ;;  %v1047_v5 = vld [vmem:[%s5645_s8] sm:$0xff] }
 0x62b   :  { %1406 = vmatprep.subr.mxu1 %v5032_v38 }
 0x62c   :  { %1407 = vmatpush1.msra.mxu1 %v5025_v56 }
 0x62d   :  { %1408 = vmatprep.subr.mxu1 %v1283_v16  ;;  %v5145_v16 = vld [vmem:[#allocation13 + $0xf8] sm:$0xff] }
 0x62e   :  { %1409 = vmatpush1.msra.mxu1 %v1284_v22  ;;  %v5147_v22 = vld [vmem:[#allocation13 + $0x78] sm:$0xff]  ;;  %4039 = vmatprep.subr.mxu0 %v5145_v16 }
 0x62f   :  { %4023 = vmatmul.mubr.msk.f32.vlgmr.msra.gmra.mxu1 %vm268_vm4, %v4718_v23  ;;  %4040 = vmatpush3.msra.mxu0 %v5147_v22 }
 0x630   :  { %1549 = vmatprep.mubr.f32.mxu1 %v5743_v20 }
 0x6e1   :  { %v5103_v60 = vpop.f32.mrf.mxu1 }
 0x6e3   :  { %v5105_v12 = vpop.f32.mrf.mxu1 }
 0x6e5   :  { %v5107_v38 = vpop.f32.mrf.mxu1 }
 0x6e7   :  { %v5109_v56 = vpop.f32.mrf.mxu1 }
 0x6e9   :  { %v1373_v44 = vpop.f32.mrf.mxu1 }
 0x6ea   :  { %v1374_v34 = vadd.f32 %v1373_v44, %v4734_v27  ;;  %v5149_v44 = vld [vmem:[#allocation13 + $0xf0] sm:$0xff] }
 0x6eb   :  { %v1375_v18 = vpop.f32.mrf.mxu1  ;;  %4041 = vmatprep.subr.mxu0 %v5149_v44 }
 0x6ec   :  { %v5112_v40 = vmax.f32 %v1374_v34, 0.0  ;;  %v1376_v7 = vadd.f32 %v1375_v18, %v4734_v27  ;;  %v5152_v34 = vld [vmem:[#allocation13 + $0x70] sm:$0xff]  ;;  %v5155_v18 = vld [vmem:[#allocation13 + $0xe8] sm:$0xff] }
 0x6ed   :  { %5750 = vst [vmem:[#allocation58_spill] sm:$0xff] %v5152_v34  ;;  %5751 = vst [vmem:[#allocation59_spill] sm:$0xff] %v5155_v18  ;;  %4042 = vmatpush3.msra.mxu0 %v5152_v34 }
 0x6ee   :  { %1469 = vrot.lane.b32.xlu1 %v5112_v40, %s4553_s12  ;;  %v5117_v0 = vmax.f32 %v1376_v7, 0.0  ;;  %v5158_v7 = vld [vmem:[#allocation13 + $0x68] sm:$0xff]  ;;  %4043 = vmatprep.subr.mxu0 %v5155_v18 }
 0x6ef   :  { %v1444_v23 = vpop.f32.mrf.mxu1  ;;  %5752 = vst [vmem:[#allocation60_spill] sm:$0xff] %v5158_v7  ;;  %4044 = vmatpush3.msra.mxu0 %v5158_v7 }
 0x6f0   :  { %v1445_v25 = vadd.f32 %v1444_v23, %v4734_v27  ;;  %v5161_v23 = vld [vmem:[#allocation13 + $0xe0] sm:$0xff] }
 0x6f1   :  { %v1446_v36 = vpop.f32.mrf.mxu1  ;;  %5753 = vst [vmem:[#allocation61_spill] sm:$0xff] %v5161_v23  ;;  %4045 = vmatprep.subr.mxu0 %v5161_v23  ;;  %v5185_v23 = vld [vmem:[#allocation13 + $0xc0] sm:$0xff] }
 0x6f2   :  { %v5120_v32 = vmax.f32 %v1445_v25, 0.0  ;;  %1471 = vrot.lane.b32.xlu1 %v5117_v0, %s4553_s12  ;;  %v1447_v30 = vadd.f32 %v1446_v36, %v4734_v27  ;;  %v1048_v27 = vld [vmem:[%s5645_s8 + $0x8] sm:$0xff]  ;;  %v5164_v25 = vld [vmem:[#allocation13 + $0x60] sm:$0xff]  ;;  %5761 = vst [vmem:[#allocation69_spill] sm:$0xff] %v5185_v23  ;;  %s4557_s8 = smov [#allocation20]  }
 0x6f3   :  { %5754 = vst [vmem:[#allocation62_spill] sm:$0xff] %v5164_v25  ;;  %v5167_v36 = vld [vmem:[#allocation13 + $0xd8] sm:$0xff]  ;;  %4046 = vmatpush3.msra.mxu0 %v5164_v25  ;;  %v5188_v25 = vld [vmem:[#allocation13 + $0x40] sm:$0xff]  ;;  %s3988_s30 = sshll.u32 %s4557_s8, 4  ;;  %s3989_s30 = int_to_ptr.vmem [resolvable:$true] %s3988_s30 }
 0x6f4   :  { %1473 = vrot.lane.b32.xlu0 %v5120_v32, %s4553_s12  ;;  %v5129_v52 = vmax.f32 %v1447_v30, 0.0  ;;  %5755 = vst [vmem:[#allocation63_spill] sm:$0xff] %v5167_v36  ;;  %v5170_v30 = vld [vmem:[#allocation13 + $0x58] sm:$0xff]  ;;  %4047 = vmatprep.subr.mxu0 %v5167_v36  ;;  %5762 = vst [vmem:[#allocation70_spill] sm:$0xff] %v5188_v25  ;;  %s4502_s16 = scalar_lea.vmem %s3989_s30, 32  ;;  %p4507_p0 = scmp.lt.s32.totalorder %s3989_s30, %s3989_s30 }
 0x6f5   :  { %5756 = vst [vmem:[#allocation64_spill] sm:$0xff] %v5170_v30  ;;  %4048 = vmatpush3.msra.mxu0 %v5170_v30  ;;  %v5191_v36 = vld [vmem:[#allocation13 + $0xb8] sm:$0xff]  ;;  %p4503_p13 = scmp.ne.s32.totalorder %s3989_s30, %s4502_s16  ;;  %p4508_p1 = scmp.lt.s32.totalorder %s4502_s16, %s4502_s16 }
 0x6f6   :  { %1455 = vrot.lane.b32.xlu1 %v5117_v0, %s4556_s14  ;;  %5763 = vst [vmem:[#allocation71_spill] sm:$0xff] %v5191_v36  ;;  %v5194_v30 = vld [vmem:[#allocation13 + $0x38] sm:$0xff] }
 0x6f7   :  { %5764 = vst [vmem:[#allocation72_spill] sm:$0xff] %v5194_v30  ;;  %p4509_p2 = por %p4508_p1, %p4507_p0 }
 0x6f8   :  { %1453 = vrot.lane.b32.xlu0 %v5112_v40, %s4556_s14 }
 0x6f9   :  { %p4510_p3 = pnand %p4509_p2, %p4503_p13 }
 0x6fa   :  { %1475 = vrot.lane.b32.xlu1 %v5129_v52, %s4553_s12 }
 0x6fc   :  { %1459 = vrot.lane.b32.xlu0 %v5129_v52, %s4556_s14 }
 0x6fe   :  { %1051 = vperm.xlu1 %4183, %v1047_v5   ;;  %v5173_v5 = vld [vmem:[#allocation13 + $0xd0] sm:$0xff] }
 0x6ff   :  { %5757 = vst [vmem:[#allocation65_spill] sm:$0xff] %v5173_v5  ;;  %4049 = vmatprep.subr.mxu0 %v5173_v5  ;;  %v5197_v5 = vld [vmem:[#allocation13 + $0xb0] sm:$0xff] }
 0x700   :  { %1457 = vrot.lane.b32.xlu0 %v5120_v32, %s4556_s14  ;;  %5765 = vst [vmem:[#allocation73_spill] sm:$0xff] %v5197_v5 }
 0x704   :  { %1056 = vperm.xlu0 %4172, %v1048_v27   ;;  %v5176_v27 = vld [vmem:[#allocation13 + $0x50] sm:$0xff] }
 0x705   :  { %5758 = vst [vmem:[#allocation66_spill] sm:$0xff] %v5176_v27  ;;  %4050 = vmatpush3.msra.mxu0 %v5176_v27  ;;  %v5200_v27 = vld [vmem:[#allocation13 + $0x30] sm:$0xff] }
 0x706   :  { %4051 = vmatprep.subr.mxu0 %v5179_v28  ;;  %5766 = vst [vmem:[#allocation74_spill] sm:$0xff] %v5200_v27  ;;  %v5203_v28 = vld [vmem:[#allocation13 + $0xa8] sm:$0xff] }
 0x707   :  { %4052 = vmatpush3.msra.mxu0 %v5182_v4  ;;  %5767 = vst [vmem:[#allocation75_spill] sm:$0xff] %v5203_v28  ;;  %v5206_v4 = vld [vmem:[#allocation13 + $0x28] sm:$0xff] }
 0x708   :  { %4053 = vmatprep.subr.mxu0 %v5185_v23  ;;  %5768 = vst [vmem:[#allocation76_spill] sm:$0xff] %v5206_v4  ;;  %v5209_v23 = vld [vmem:[#allocation13 + $0xa0] sm:$0xff] }
 0x709   :  { %4054 = vmatpush3.msra.mxu0 %v5188_v25  ;;  %5769 = vst [vmem:[#allocation77_spill] sm:$0xff] %v5209_v23  ;;  %v5212_v25 = vld [vmem:[#allocation13 + $0x20] sm:$0xff] }
 0x70a   :  { %4055 = vmatprep.subr.mxu0 %v5191_v36  ;;  %5770 = vst [vmem:[#allocation78_spill] sm:$0xff] %v5212_v25  ;;  %v5215_v36 = vld [vmem:[#allocation13 + $0x98] sm:$0xff] }
 0x70b   :  { %4056 = vmatpush3.msra.mxu0 %v5194_v30  ;;  %5771 = vst [vmem:[#allocation79_spill] sm:$0xff] %v5215_v36  ;;  %v5218_v30 = vld [vmem:[#allocation13 + $0x18] sm:$0xff] }
 0x70c   :  { %4057 = vmatprep.subr.mxu0 %v5197_v5  ;;  %5772 = vst [vmem:[#allocation80_spill] sm:$0xff] %v5218_v30 }
 0x70d   :  { %4058 = vmatpush3.msra.mxu0 %v5200_v27 }
 0x70e   :  { %4059 = vmatprep.subr.mxu0 %v5203_v28 }
 0x70f   :  { %4060 = vmatpush3.msra.mxu0 %v5206_v4 }
 0x710   :  { %4061 = vmatprep.subr.mxu0 %v5209_v23 }
 0x711   :  { %4062 = vmatpush3.msra.mxu0 %v5212_v25 }
 0x712   :  { %4063 = vmatprep.subr.mxu0 %v5215_v36 }
 0x713   :  { %4064 = vmatpush3.msra.mxu0 %v5218_v30 }
 0x760   :  { %v1470_v27 = vpop.permute.xlu1 %1469 }
 0x764   :  { %v1472_v5 = vpop.permute.xlu1 %1471 }
 0x765   :  { %v1479_v4 = vsel %vm244_vm0, %v1470_v27, %v1472_v5 }
 0x766   :  { %v1474_v7 = vpop.permute.xlu0 %1473 }
 0x767   :  { %v1478_v28 = vsel %vm244_vm0, %v1472_v5, %v1474_v7 }
 0x768   :  { %1511 = vmatprep.subr.mxu1 %v1478_v28  ;;  %v1456_v18 = vpop.permute.xlu1 %1455  ;;  %v4214_v28 = vld [vmem:[#allocation7] sm:$0xff] }
 0x769   :  { %1512 = vmatpush1.msra.mxu1 %v1479_v4 }
 0x76a   :  { %v1454_v23 = vpop.permute.xlu0 %1453  ;;  %1513 = vmatprep.subr.mxu1 %v5117_v0  ;;  %v5243_v0 = vld [vmem:[#allocation13 + $0x90] sm:$0xff] }
 0x76b   :  { %1514 = vmatpush1.msra.mxu1 %v5112_v40  ;;  %v1463_v30 = vsel %vm219_vm2, %v1454_v23, %v1456_v18  ;;  %4065 = vmatprep.subr.mxu0 %v5243_v0 }
 0x76c   :  { %1515 = vmatprep.subr.mxu1 %v1463_v30  ;;  %v1476_v36 = vpop.permute.xlu1 %1475  ;;  %v4216_v30 = vld [vmem:[#allocation11 + $0xf8] sm:$0xff] }
 0x76d   :  { %v1480_v5 = vsel %vm244_vm0, %v1476_v36, %v1470_v27  ;;  %v1477_v4 = vsel %vm244_vm0, %v1474_v7, %v1476_v36  ;;  %v5249_v7 = vld [vmem:[#allocation13 + $0x10] sm:$0xff]  ;;  %v5263_v36 = vld [vmem:[#allocation13] sm:$0xff] }
 0x76e   :  { %v1460_v25 = vpop.permute.xlu0 %1459  ;;  %4066 = vmatpush3.msra.mxu0 %v5249_v7  ;;  %5773 = vst [vmem:[#allocation81_spill] sm:$0xff] %v5263_v36  ;;  %v4217_v27 = vld [vmem:[#allocation11 + $0x2f0] sm:$0xff] }
 0x76f   :  { %v1464_v34 = vsel %vm219_vm2, %v1460_v25, %v1454_v23  ;;  %4067 = vmatprep.subr.mxu0 %v5253_v9 }
 0x770   :  { %4024 = vmatpush1.msk.msra.mxu1 %vm197_vm3, %v1464_v34 }
 0x771   :  { %4025 = vmatmul.mubr.msk.f32.vlgmr.msra.gmra.mxu1 %vm268_vm4, %v4214_v28  ;;  %4026 = vmatprep.subr.msk.mxu1 %vm204_vm1, %v1480_v5 }
 0x772   :  { %v1458_v40 = vpop.permute.xlu0 %1457  ;;  %1583 = vmatpush1.msra.mxu1 %v1477_v4  ;;  %1620 = vmatprep.mubr.f32.mxu1 %v5743_v20 }
 0x773   :  { %1584 = vmatprep.subr.mxu1 %v5129_v52  ;;  %v1461_v34 = vsel %vm219_vm2, %v1458_v40, %v1460_v25  ;;  %v1462_v23 = vsel %vm219_vm2, %v1456_v18, %v1458_v40  ;;  %v5258_v52 = vld [vmem:[#allocation13 + $0x8] sm:$0xff]  ;;  %v5261_v25 = vld [vmem:[#allocation13 + $0x80] sm:$0xff] }
 0x774   :  { %1585 = vmatpush1.msra.mxu1 %v5120_v32  ;;  %4068 = vmatpush3.msra.mxu0 %v5258_v52  ;;  %v4215_v32 = vld [vmem:[#allocation11 + $0x2f8] sm:$0xff]  ;;  %v4219_v40 = vld [vmem:[#allocation11 + $0x2e0] sm:$0xff] }
 0x775   :  { %1586 = vmatprep.subr.mxu1 %v1461_v34  ;;  %4069 = vmatprep.subr.mxu0 %v5261_v25 }
 0x776   :  { %1587 = vmatpush1.msra.mxu1 %v1462_v23  ;;  %4070 = vmatpush3.msra.mxu0 %v5263_v36  ;;  %v4235_v36 = vld [vmem:[#allocation11 + $0x260] sm:$0xff] }
 0x777   :  { %4027 = vmatmul.mubr.msk.f32.vlgmr.msra.gmra.mxu1 %vm268_vm4, %v4214_v28  ;;  %1718 = vmatprep.subr.mxu1 %v4215_v32  ;;  %v4218_v28 = vld [vmem:[#allocation11 + $0x2e8] sm:$0xff]  ;;  %v4220_v32 = vld [vmem:[#allocation11 + $0x2d8] sm:$0xff] }
 0x778   :  { %1647 = vmatprep.subr.mxu0 %v4216_v30  ;;  %1719 = vmatpush1.msra.mxu1 %v4217_v27  ;;  %v4221_v30 = vld [vmem:[#allocation11 + $0x2d0] sm:$0xff]  ;;  %v4222_v27 = vld [vmem:[#allocation11 + $0x2c8] sm:$0xff] }
 0x779   :  { %v5268_v18 = vpop.permute.xlu1 %1051  ;;  %1720 = vmatprep.subr.mxu1 %v4218_v28  ;;  %v4223_v28 = vld [vmem:[#allocation11 + $0x2c0] sm:$0xff] }
 0x77a   :  { %5774 = vst [vmem:[#allocation82_spill] sm:$0xff] %v5268_v18  ;;  %v5272_v5 = vadd.f32 %v5103_v60, %v5268_v18  ;;  %v5276_v4 = vadd.f32 %v5105_v12, %v5268_v18  ;;  %1721 = vmatpush1.msra.mxu1 %v4219_v40  ;;  %v4225_v18 = vld [vmem:[#allocation11 + $0x2b0] sm:$0xff] }
 0x77b   :  { %1722 = vmatprep.subr.mxu1 %v4220_v32 }
 0x77c   :  { %v5715_v34 = vmax.f32 %v5272_v5, 0.0  ;;  %v5714_v23 = vmax.f32 %v5276_v4, 0.0  ;;  %1723 = vmatpush1.msra.mxu1 %v4221_v30  ;;  %v4224_v30 = vld [vmem:[#allocation11 + $0x2b8] sm:$0xff] }
 0x77d   :  { %1724 = vmatprep.subr.mxu1 %v4222_v27 }
 0x77e   :  { %v4184_v60 = vpack.i.bf16 %v5714_v23, %v5715_v34  ;;  %1725 = vmatpush1.msra.mxu1 %v4223_v28  ;;  %v4226_v34 = vld [vmem:[#allocation11 + $0x2a8] sm:$0xff]  ;;  %v4227_v28 = vld [vmem:[#allocation11 + $0x2a0] sm:$0xff] }
 0x77f   :  { %v5284_v12 = vpop.permute.xlu0 %1056  ;;  %1726 = vmatprep.subr.mxu1 %v4224_v30  ;;  %v4231_v30 = vld [vmem:[#allocation11 + $0x280] sm:$0xff] }
 0x780   :  { %5775 = vst [vmem:[#allocation83_spill] sm:$0xff] %v5284_v12  ;;  %v5288_v40 = vadd.f32 %v5107_v38, %v5284_v12  ;;  %v5292_v32 = vadd.f32 %v5109_v56, %v5284_v12  ;;  %4185 = vrot.lane.b32.xlu1 %v4184_v60, %s4553_s12  ;;  %1727 = vmatpush1.msra.mxu1 %v4225_v18  ;;  %v4228_v56 = vld [vmem:[#allocation11 + $0x298] sm:$0xff]  ;;  %v4229_v60 = vld [vmem:[#allocation11 + $0x290] sm:$0xff]  ;;  %v4230_v18 = vld [vmem:[#allocation11 + $0x288] sm:$0xff] }
 0x781   :  { %1728 = vmatprep.subr.mxu1 %v4226_v34  ;;  %v4232_v12 = vld [vmem:[#allocation11 + $0x278] sm:$0xff]  ;;  %v4233_v34 = vld [vmem:[#allocation11 + $0x270] sm:$0xff] }
 0x782   :  { %v1145_v27 = vmax.f32 %v5288_v40, 0.0  ;;  %v1146_v23 = vmax.f32 %v5292_v32, 0.0  ;;  %1729 = vmatpush1.msra.mxu1 %v4227_v28  ;;  %v4234_v28 = vld [vmem:[#allocation11 + $0x268] sm:$0xff]  ;;  %v4258_v32 = vld [vmem:[#allocation11 + $0x40] sm:$0xff] }
 0x783   :  { %1730 = vmatprep.subr.mxu1 %v4228_v56  ;;  %v4257_v40 = vld [vmem:[#allocation11 + $0x48] sm:$0xff] }
 0x784   :  { %v4189_v38 = vpack.i.bf16 %v1146_v23, %v1145_v27  ;;  %1731 = vmatpush1.msra.mxu1 %v4229_v60  ;;  %v4261_v56 = vld [vmem:[#allocation11 + $0x28] sm:$0xff]  ;;  %v4262_v60 = vld [vmem:[#allocation11 + $0x20] sm:$0xff] }
 0x785   :  { %1732 = vmatprep.subr.mxu1 %v4230_v18  ;;  %v4263_v18 = vld [vmem:[#allocation11 + $0x18] sm:$0xff] }
 0x786   :  { %4190 = vrot.lane.b32.xlu0 %v4189_v38, %s4553_s12  ;;  %1733 = vmatpush1.msra.mxu1 %v4231_v30  ;;  %v4260_v38 = vld [vmem:[#allocation11 + $0x30] sm:$0xff] }
 0x787   :  { %1734 = vmatprep.subr.mxu1 %v4232_v12  ;;  %v4256_v12 = vld [vmem:[#allocation11 + $0x50] sm:$0xff] }
 0x788   :  { %1735 = vmatpush1.msra.mxu1 %v4233_v34  ;;  %v4264_v30 = vld [vmem:[#allocation11 + $0x10] sm:$0xff]  ;;  %v4265_v34 = vld [vmem:[#allocation11 + $0x8] sm:$0xff] }
 0x789   :  { %1736 = vmatprep.subr.mxu1 %v4234_v28  ;;  %v4266_v28 = vld [vmem:[#allocation11] sm:$0xff] }
 0x78a   :  { %1737 = vmatpush1.msra.mxu1 %v4235_v36  ;;  %v4252_v36 = vld [vmem:[#allocation11 + $0x70] sm:$0xff] }
 0x78b   :  { %1738 = vmatprep.subr.mxu1 %v4773_v41  ;;  %v5776_v41 = vld [vmem:[#allocation40_spill] sm:$0xff] }
 0x78c   :  { %1739 = vmatpush1.msra.mxu1 %v4775_v43  ;;  %v5777_v43 = vld [vmem:[#allocation42_spill] sm:$0xff] }
 0x78d   :  { %1740 = vmatprep.subr.mxu1 %v4777_v45  ;;  %v5778_v45 = vld [vmem:[#allocation44_spill] sm:$0xff] }
 0x78e   :  { %1741 = vmatpush1.msra.mxu1 %v4780_v47  ;;  %v5779_v47 = vld [vmem:[#allocation46_spill] sm:$0xff] }
 0x78f   :  { %1742 = vmatprep.subr.mxu1 %v4783_v49  ;;  %v5780_v49 = vld [vmem:[#allocation49_spill] sm:$0xff] }
 0x790   :  { %1743 = vmatpush1.msra.mxu1 %v4786_v51  ;;  %v5781_v51 = vld [vmem:[#allocation51_spill] sm:$0xff] }
 0x791   :  { %1744 = vmatprep.subr.mxu1 %v4789_v53 }
 0x792   :  { %1745 = vmatpush1.msra.mxu1 %v4792_v55 }
 0x793   :  { %1746 = vmatprep.subr.mxu1 %v4795_v57 }
 0x794   :  { %1747 = vmatpush1.msra.mxu1 %v4798_v59 }
 0x795   :  { %1748 = vmatprep.subr.mxu1 %v4801_v61 }
 0x796   :  { %1749 = vmatpush1.msra.mxu1 %v4804_v63  ;;  %v5782_v63 = vmax.f32 %v5272_v5, 0.0  ;;  %v4253_v5 = vld [vmem:[#allocation11 + $0x68] sm:$0xff] }
 0x797   :  { %1750 = vmatprep.subr.mxu1 %v4807_v1 }
 0x798   :  { %1751 = vmatpush2.msra.mxu1 %v4810_v3  ;;  %v5783_v3 = vmax.f32 %v5276_v4, 0.0  ;;  %v4254_v4 = vld [vmem:[#allocation11 + $0x60] sm:$0xff] }
 0x799   :  { %1752 = vmatprep.subr.mxu1 %v4813_v6 }
 0x79a   :  { %1753 = vmatpush2.msra.mxu1 %v4816_v11 }
 0x79b   :  { %1754 = vmatprep.subr.mxu1 %v4819_v13 }
 0x79c   :  { %1755 = vmatpush2.msra.mxu1 %v4822_v15 }
 0x79d   :  { %1756 = vmatprep.subr.mxu1 %v4825_v17  ;;  %v4236_v17 = vld [vmem:[#allocation11 + $0xf0] sm:$0xff] }
 0x79e   :  { %1757 = vmatpush2.msra.mxu1 %v4828_v19 }
 0x79f   :  { %1758 = vmatprep.subr.mxu1 %v4831_v21 }
 0x7a0   :  { %1759 = vmatpush2.msra.mxu1 %v4834_v24  ;;  %v4237_v24 = vld [vmem:[#allocation11 + $0xe8] sm:$0xff] }
 0x7a1   :  { %1760 = vmatprep.subr.mxu1 %v4837_v26 }
 0x7a2   :  { %1761 = vmatpush2.msra.mxu1 %v4840_v29 }
 0x7a3   :  { %1762 = vmatprep.subr.mxu1 %v4843_v31  ;;  %v4238_v31 = vld [vmem:[#allocation11 + $0xe0] sm:$0xff] }
 0x7a4   :  { %1763 = vmatpush2.msra.mxu1 %v4846_v33  ;;  %v4239_v33 = vld [vmem:[#allocation11 + $0xd8] sm:$0xff] }
 0x7a5   :  { %1764 = vmatprep.subr.mxu1 %v4849_v35  ;;  %v4240_v35 = vld [vmem:[#allocation11 + $0xd0] sm:$0xff] }
 0x7a6   :  { %1765 = vmatpush2.msra.mxu1 %v4854_v37  ;;  %v4241_v37 = vld [vmem:[#allocation11 + $0xc8] sm:$0xff] }
 0x7a7   :  { %1766 = vmatprep.subr.mxu1 %v4859_v39  ;;  %v4242_v39 = vld [vmem:[#allocation11 + $0xc0] sm:$0xff] }
 0x7a8   :  { %1767 = vmatpush2.msra.mxu1 %v4864_v42  ;;  %v4243_v42 = vld [vmem:[#allocation11 + $0xb8] sm:$0xff] }
 0x7a9   :  { %1768 = vmatprep.subr.mxu1 %v4870_v46  ;;  %v4244_v46 = vld [vmem:[#allocation11 + $0xb0] sm:$0xff] }
 0x7aa   :  { %1769 = vmatpush2.msra.mxu1 %v4876_v50  ;;  %v4245_v50 = vld [vmem:[#allocation11 + $0xa8] sm:$0xff] }
 0x7ab   :  { %1770 = vmatprep.subr.mxu1 %v4882_v54  ;;  %v4246_v54 = vld [vmem:[#allocation11 + $0xa0] sm:$0xff] }
 0x7ac   :  { %1771 = vmatpush2.msra.mxu1 %v4888_v58  ;;  %v4247_v58 = vld [vmem:[#allocation11 + $0x98] sm:$0xff] }
 0x7ad   :  { %1772 = vmatprep.subr.mxu1 %v4894_v62  ;;  %v4248_v62 = vld [vmem:[#allocation11 + $0x90] sm:$0xff] }
 0x7ae   :  { %1773 = vmatpush2.msra.mxu1 %v4900_v2  ;;  %v4249_v2 = vld [vmem:[#allocation11 + $0x88] sm:$0xff] }
 0x7af   :  { %1774 = vmatprep.subr.mxu1 %v4911_v10  ;;  %v4250_v10 = vld [vmem:[#allocation11 + $0x80] sm:$0xff] }
 0x7b0   :  { %1775 = vmatpush2.msra.mxu1 %v4916_v14  ;;  %v4251_v14 = vld [vmem:[#allocation11 + $0x78] sm:$0xff] }
 0x7b1   :  { %1776 = vmatprep.subr.mxu1 %v5776_v41  ;;  %v4267_v41 = vld [vmem:[#allocation11 + $0x1f8] sm:$0xff] }
 0x7b2   :  { %1777 = vmatpush2.msra.mxu1 %v5777_v43  ;;  %v4268_v43 = vld [vmem:[#allocation11 + $0x1f0] sm:$0xff] }
 0x7b3   :  { %1778 = vmatprep.subr.mxu1 %v5778_v45  ;;  %v4269_v45 = vld [vmem:[#allocation11 + $0x1e8] sm:$0xff] }
 0x7b4   :  { %1779 = vmatpush2.msra.mxu1 %v5779_v47  ;;  %v4270_v47 = vld [vmem:[#allocation11 + $0x1e0] sm:$0xff] }
 0x7b5   :  { %1780 = vmatprep.subr.mxu1 %v5780_v49  ;;  %v4271_v49 = vld [vmem:[#allocation11 + $0x1d8] sm:$0xff] }
 0x7b6   :  { %1781 = vmatpush2.msra.mxu1 %v5781_v51  ;;  %v4272_v51 = vld [vmem:[#allocation11 + $0x1d0] sm:$0xff] }
 0x7f2   :  { %v4186_v53 = vpop.permute.xlu1 %4185 }
 0x7f3   :  { %v4188_v55 = vunpack.i.h.bf16 %v4186_v53  ;;  %v4187_v57 = vunpack.i.l.bf16 %v4186_v53  ;;  %v4273_v53 = vld [vmem:[#allocation11 + $0x1c8] sm:$0xff] }
 0x7f5   :  { %v1155_v59 = vsel %vm244_vm0, %v4187_v57, %v4188_v55  ;;  %v1157_v61 = vsel %vm244_vm0, %v4188_v55, %v4187_v57  ;;  %v4274_v55 = vld [vmem:[#allocation11 + $0x1c0] sm:$0xff]  ;;  %v4275_v57 = vld [vmem:[#allocation11 + $0x1b8] sm:$0xff] }
 0x7f6   :  { %v1159_v1 = vmax.f32 %v5782_v63, %v1155_v59  ;;  %v1160_v6 = vmax.f32 %v5783_v3, %v1157_v61  ;;  %v4276_v59 = vld [vmem:[#allocation11 + $0x1b0] sm:$0xff]  ;;  %v4277_v61 = vld [vmem:[#allocation11 + $0x1a8] sm:$0xff]  ;;  %v4278_v63 = vld [vmem:[#allocation11 + $0x1a0] sm:$0xff] }
 0x7f7   :  { %v4280_v3 = vld [vmem:[#allocation11 + $0x190] sm:$0xff] }
 0x7f8   :  { %v4191_v11 = vpop.permute.xlu0 %4190  ;;  %1259 = vmatprep.mubr.f32.mxu0 %v1160_v6  ;;  %v4281_v6 = vld [vmem:[#allocation11 + $0x188] sm:$0xff] }
 0x7f9   :  { %v4193_v13 = vunpack.i.h.bf16 %v4191_v11  ;;  %v4192_v15 = vunpack.i.l.bf16 %v4191_v11  ;;  %1260 = vmatmul.mubr.f32.vlgmr.msra.gmra.mxu0 %v1159_v1  ;;  %v4279_v1 = vld [vmem:[#allocation11 + $0x198] sm:$0xff]  ;;  %v5784_v11 = vld [vmem:[#allocation28_spill] sm:$0xff] }
 0x7fa   :  { %1648 = vmatpush1.msra.mxu0 %v4236_v17  ;;  %v5787_v17 = vld [vmem:[#allocation31_spill] sm:$0xff] }
 0x7fb   :  { %v1158_v19 = vsel %vm244_vm0, %v4193_v13, %v4192_v15  ;;  %v1156_v21 = vsel %vm244_vm0, %v4192_v15, %v4193_v13  ;;  %1649 = vmatprep.subr.mxu0 %v4237_v24  ;;  %v5785_v13 = vld [vmem:[#allocation29_spill] sm:$0xff]  ;;  %v5786_v15 = vld [vmem:[#allocation30_spill] sm:$0xff] }
 0x7fc   :  { %v1162_v26 = vmax.f32 %v1146_v23, %v1158_v19  ;;  %v1161_v29 = vmax.f32 %v1145_v27, %v1156_v21  ;;  %1650 = vmatpush1.msra.mxu0 %v4238_v31  ;;  %v4255_v23 = vld [vmem:[#allocation11 + $0x58] sm:$0xff]  ;;  %v5788_v19 = vld [vmem:[#allocation32_spill] sm:$0xff]  ;;  %v5789_v21 = vld [vmem:[#allocation33_spill] sm:$0xff] }
 0x7fd   :  { %1651 = vmatprep.subr.mxu0 %v4239_v33  ;;  %v4259_v27 = vld [vmem:[#allocation11 + $0x38] sm:$0xff]  ;;  %v5793_v33 = vld [vmem:[#allocation37_spill] sm:$0xff] }
 0x7fe   :  { %1264 = vmatprep.mubr.f32.mxu0 %v1162_v26  ;;  %1652 = vmatpush1.msra.mxu0 %v4240_v35  ;;  %v5790_v24 = vld [vmem:[#allocation34_spill] sm:$0xff]  ;;  %v5791_v26 = vld [vmem:[#allocation35_spill] sm:$0xff] }
 0x7ff   :  { %1265 = vmatmul.mubr.f32.gmra.mxu0 %v1161_v29  ;;  %1653 = vmatprep.subr.mxu0 %v4241_v37  ;;  %v5792_v29 = vld [vmem:[#allocation36_spill] sm:$0xff]  ;;  %v5794_v35 = vld [vmem:[#allocation47_spill] sm:$0xff] }
 0x800   :  { %1654 = vmatpush1.msra.mxu0 %v4242_v39  ;;  %v5795_v39 = vld [vmem:[#allocation38_spill] sm:$0xff] }
 0x801   :  { %1655 = vmatprep.subr.mxu0 %v4243_v42 }
 0x802   :  { %1656 = vmatpush1.msra.mxu0 %v4244_v46  ;;  %v5796_v46 = vld [vmem:[#allocation39_spill] sm:$0xff] }
 0x803   :  { %1657 = vmatprep.subr.mxu0 %v4245_v50 }
 0x804   :  { %1658 = vmatpush1.msra.mxu0 %v4246_v54  ;;  %v5797_v54 = vld [vmem:[#allocation41_spill] sm:$0xff] }
 0x805   :  { %1659 = vmatprep.subr.mxu0 %v4247_v58  ;;  %v5798_v58 = vld [vmem:[#allocation43_spill] sm:$0xff] }
 0x806   :  { %1660 = vmatpush1.msra.mxu0 %v4248_v62 }
 0x807   :  { %1661 = vmatprep.subr.mxu0 %v4249_v2 }
 0x808   :  { %1662 = vmatpush1.msra.mxu0 %v4250_v10  ;;  %v5799_v10 = vld [vmem:[#allocation45_spill] sm:$0xff] }
 0x809   :  { %1663 = vmatprep.subr.mxu0 %v4251_v14 }
 0x80a   :  { %1664 = vmatpush1.msra.mxu0 %v4252_v36  ;;  %v5800_v36 = vld [vmem:[#allocation48_spill] sm:$0xff] }
 0x80b   :  { %1665 = vmatprep.subr.mxu0 %v4253_v5 }
 0x80c   :  { %1666 = vmatpush1.msra.mxu0 %v4254_v4 }
 0x80d   :  { %1667 = vmatprep.subr.mxu0 %v4255_v23  ;;  %v5801_v23 = vld [vmem:[#allocation50_spill] sm:$0xff] }
 0x80e   :  { %1668 = vmatpush1.msra.mxu0 %v4256_v12 }
 0x80f   :  { %1669 = vmatprep.subr.mxu0 %v4257_v40 }
 0x810   :  { %1670 = vmatpush1.msra.mxu0 %v4258_v32 }
 0x811   :  { %1671 = vmatprep.subr.mxu0 %v4259_v27 }
 0x812   :  { %1672 = vmatpush1.msra.mxu0 %v4260_v38 }
 0x813   :  { %1673 = vmatprep.subr.mxu0 %v4261_v56 }
 0x814   :  { %1674 = vmatpush1.msra.mxu0 %v4262_v60 }
 0x815   :  { %1675 = vmatprep.subr.mxu0 %v4263_v18 }
 0x816   :  { %1676 = vmatpush1.msra.mxu0 %v4264_v30 }
 0x817   :  { %1677 = vmatprep.subr.mxu0 %v4265_v34 }
 0x818   :  { %1678 = vmatpush1.msra.mxu0 %v4266_v28 }
 0x819   :  { %1679 = vmatprep.subr.mxu0 %v4267_v41 }
 0x81a   :  { %1680 = vmatpush2.msra.mxu0 %v4268_v43 }
 0x81b   :  { %1681 = vmatprep.subr.mxu0 %v4269_v45 }
 0x81c   :  { %1682 = vmatpush2.msra.mxu0 %v4270_v47 }
 0x81d   :  { %1683 = vmatprep.subr.mxu0 %v4271_v49 }
 0x81e   :  { %1684 = vmatpush2.msra.mxu0 %v4272_v51 }
 0x81f   :  { %1685 = vmatprep.subr.mxu0 %v4273_v53 }
 0x820   :  { %1686 = vmatpush2.msra.mxu0 %v4274_v55 }
 0x821   :  { %1687 = vmatprep.subr.mxu0 %v4275_v57 }
 0x822   :  { %1688 = vmatpush2.msra.mxu0 %v4276_v59 }
 0x823   :  { %1689 = vmatprep.subr.mxu0 %v4277_v61 }
 0x824   :  { %1690 = vmatpush2.msra.mxu0 %v4278_v63 }
 0x825   :  { %1691 = vmatprep.subr.mxu0 %v4279_v1 }
 0x826   :  { %1692 = vmatpush2.msra.mxu0 %v4280_v3 }
 0x827   :  { %1693 = vmatprep.subr.mxu0 %v4281_v6 }
 0x828   :  { %1694 = vmatpush2.msra.mxu0 %v5784_v11 }
 0x829   :  { %1695 = vmatprep.subr.mxu0 %v5785_v13 }
 0x82a   :  { %1696 = vmatpush2.msra.mxu0 %v5786_v15 }
 0x82b   :  { %1697 = vmatprep.subr.mxu0 %v5787_v17 }
 0x82c   :  { %1698 = vmatpush2.msra.mxu0 %v5788_v19 }
 0x82d   :  { %1699 = vmatprep.subr.mxu0 %v5789_v21 }
 0x82e   :  { %1700 = vmatpush2.msra.mxu0 %v5790_v24 }
 0x82f   :  { %1701 = vmatprep.subr.mxu0 %v5791_v26 }
 0x830   :  { %1702 = vmatpush2.msra.mxu0 %v5792_v29 }
 0x831   :  { %v1551_v31 = vpop.f32.mrf.mxu1  ;;  %1703 = vmatprep.subr.mxu0 %v5793_v33 }
 0x832   :  { %v1552_v37 = vadd.f32 %v1551_v31, %v5794_v35  ;;  %1704 = vmatpush2.msra.mxu0 %v5795_v39  ;;  %v5803_v39 = vld [vmem:[#allocation58_spill] sm:$0xff] }
 0x833   :  { %v1553_v42 = vpop.f32.mrf.mxu1  ;;  %1705 = vmatprep.subr.mxu0 %v5796_v46  ;;  %v5805_v46 = vld [vmem:[#allocation59_spill] sm:$0xff] }
 0x834   :  { %v1554_v50 = vadd.f32 %v1553_v42, %v5794_v35  ;;  %1706 = vmatpush2.msra.mxu0 %v5797_v54  ;;  %v1627_v62 = vmax.f32 %v1552_v37, 0.0  ;;  %v5802_v37 = vld [vmem:[#allocation52_spill] sm:$0xff]  ;;  %v5804_v42 = vld [vmem:[#allocation53_spill] sm:$0xff] }
 0x835   :  { %1707 = vmatprep.subr.mxu0 %v5798_v58  ;;  %v5807_v54 = vld [vmem:[#allocation61_spill] sm:$0xff]  ;;  %v5808_v58 = vld [vmem:[#allocation62_spill] sm:$0xff] }
 0x836   :  { %v1628_v2 = vmax.f32 %v1554_v50, 0.0  ;;  %1708 = vmatpush2.msra.mxu0 %v5799_v10  ;;  %v5806_v50 = vld [vmem:[#allocation60_spill] sm:$0xff] }
 0x837   :  { %v1622_v14 = vpop.f32.mrf.mxu1  ;;  %1709 = vmatprep.subr.mxu0 %v5800_v36  ;;  %v5814_v10 = vld [vmem:[#allocation68_spill] sm:$0xff]  ;;  %v5816_v36 = vld [vmem:[#allocation70_spill] sm:$0xff] }
 0x838   :  { %v4194_v5 = vpack.i.bf16 %v1628_v2, %v1627_v62  ;;  %v1623_v4 = vadd.f32 %v1622_v14, %v5794_v35  ;;  %1710 = vmatpush2.msra.mxu0 %v5801_v23  ;;  %v5815_v14 = vld [vmem:[#allocation69_spill] sm:$0xff] }
 0x839   :  { %v1624_v12 = vpop.f32.mrf.mxu1  ;;  %v5819_v23 = vld [vmem:[#allocation73_spill] sm:$0xff] }
 0x83a   :  { %v1625_v40 = vadd.f32 %v1624_v12, %v5794_v35  ;;  %4195 = vrot.lane.b32.xlu1 %v4194_v5, %s4553_s12  ;;  %v1629_v32 = vmax.f32 %v1623_v4, 0.0  ;;  %v5817_v5 = vld [vmem:[#allocation71_spill] sm:$0xff]  ;;  %v5818_v4 = vld [vmem:[#allocation72_spill] sm:$0xff]  ;;  %v5820_v12 = vld [vmem:[#allocation74_spill] sm:$0xff] }
 0x83c   :  { %v1630_v27 = vmax.f32 %v1625_v40, 0.0  ;;  %v5821_v40 = vld [vmem:[#allocation75_spill] sm:$0xff] }
 0x83e   :  { %v4199_v38 = vpack.i.bf16 %v1630_v27, %v1629_v32 }
 0x840   :  { %4200 = vrot.lane.b32.xlu0 %v4199_v38, %s4553_s12  ;;  %v5824_v38 = vld [vmem:[#allocation78_spill] sm:$0xff] }
 0x8ac   :  { %v4196_v56 = vpop.permute.xlu1 %4195 }
 0x8ad   :  { %v4198_v60 = vunpack.i.h.bf16 %v4196_v56  ;;  %v4197_v18 = vunpack.i.l.bf16 %v4196_v56  ;;  %v5825_v56 = vld [vmem:[#allocation79_spill] sm:$0xff] }
 0x8af   :  { %v1641_v41 = vsel %vm244_vm0, %v4197_v18, %v4198_v60 }
 0x8b0   :  { %v1643_v55 = vmax.f32 %v1627_v62, %v1641_v41  ;;  %v5810_v62 = vld [vmem:[#allocation64_spill] sm:$0xff]  ;;  %v5828_v41 = vld [vmem:[#allocation55_spill] sm:$0xff] }
 0x8b2   :  { %v4201_v30 = vpop.permute.xlu0 %4200 }
 0x8b3   :  { %v4203_v34 = vunpack.i.h.bf16 %v4201_v30  ;;  %v4202_v28 = vunpack.i.l.bf16 %v4201_v30 }
 0x8b5   :  { %v1639_v43 = vsel %vm244_vm0, %v4202_v28, %v4203_v34  ;;  %v1640_v45 = vsel %vm244_vm0, %v4198_v60, %v4202_v28  ;;  %v1642_v47 = vsel %vm244_vm0, %v4203_v34, %v4197_v18  ;;  %v5826_v60 = vld [vmem:[#allocation80_spill] sm:$0xff]  ;;  %v5827_v18 = vld [vmem:[#allocation81_spill] sm:$0xff] }
 0x8b6   :  { %v1645_v49 = vmax.f32 %v1629_v32, %v1639_v43  ;;  %v1644_v51 = vmax.f32 %v1628_v2, %v1640_v45  ;;  %v1646_v53 = vmax.f32 %v1630_v27, %v1642_v47  ;;  %v5813_v2 = vld [vmem:[#allocation67_spill] sm:$0xff]  ;;  %v5822_v32 = vld [vmem:[#allocation76_spill] sm:$0xff]  ;;  %v5823_v27 = vld [vmem:[#allocation77_spill] sm:$0xff] }
 0x8b7   :  { %v5829_v47 = vld [vmem:[#allocation54_spill] sm:$0xff] }
 0x8b8   :  { %1711 = vmatprep.mubr.f32.mxu0 %v1644_v51  ;;  %1782 = vmatprep.mubr.f32.mxu1 %v1646_v53 }
 0x8b9   :  { %v4071_v57 = vpop.f32.mrf.mxu0  ;;  %1712 = vmatmul.mubr.f32.vlgmr.msra.gmra.mxu0 %v1643_v55  ;;  %1783 = vmatmul.mubr.f32.vlgmr.msra.gmra.mxu1 %v1645_v49 }
 0x8ba   :  { %1869 = vmatprep.mubr.f32.mxu0 %v5743_v20  ;;  %1982 = vmatprep.mubr.f32.mxu1 %v5743_v20 }
 0x8bb   :  { %v4072_v59 = vpop.f32.mrf.mxu0 }
 0x8bc   :  { %v5395_v61 = vadd.f32 %v4072_v59, %v4071_v57 }
 0x8bf   :  { %v5397_v63 = vpop.f32.mrf.mxu0 }
 0x8c1   :  { %v5399_v1 = vpop.f32.mrf.mxu0 }
 0x979   :  { %v1713_v3 = vpop.f32.mrf.mxu0  ;;  %v1784_v6 = vpop.f32.mrf.mxu1 }
 0x97a   :  { %v1785_v11 = vadd.f32 %v1784_v6, %v1713_v3 }
 0x97b   :  { %v1715_v13 = vpop.f32.mrf.mxu0  ;;  %v1786_v15 = vpop.f32.mrf.mxu1 }
 0x97c   :  { %v1787_v17 = vadd.f32 %v1786_v15, %v1715_v13  ;;  %1797 = vrot.lane.b32.xlu1 %v1785_v11, %s4553_s12 }
 0x97e   :  { %1799 = vrot.lane.b32.xlu0 %v1787_v17, %s4553_s12 }
 0x980   :  { %1789 = vrot.lane.b32.xlu1 %v1785_v11, %s4556_s14 }
 0x982   :  { %1791 = vrot.lane.b32.xlu0 %v1787_v17, %s4556_s14 }
 0x9ee   :  { %v1798_v19 = vpop.permute.xlu1 %1797 }
 0x9f0   :  { %v1800_v21 = vpop.permute.xlu0 %1799 }
 0x9f1   :  { %v1801_v24 = vsel %vm244_vm0, %v1798_v19, %v1800_v21  ;;  %v1802_v26 = vsel %vm244_vm0, %v1800_v21, %v1798_v19 }
 0x9f2   :  { %4028 = vmatprep.subr.msk.mxu0 %vm206_vm5, %v1802_v26  ;;  %v1790_v29 = vpop.permute.xlu1 %1789 }
 0x9f3   :  { %1832 = vmatpush1.msra.mxu0 %v1801_v24 }
 0x9f4   :  { %1833 = vmatprep.subr.mxu0 %v1787_v17  ;;  %v1792_v31 = vpop.permute.xlu0 %1791 }
 0x9f5   :  { %v1794_v33 = vsel %vm219_vm2, %v1792_v31, %v1790_v29  ;;  %1834 = vmatpush1.msra.mxu0 %v1785_v11  ;;  %v1793_v35 = vsel %vm219_vm2, %v1790_v29, %v1792_v31  ;;  %v5830_v31 = vld [vmem:[#allocation56_spill] sm:$0xff] }
 0x9f6   :  { %1835 = vmatprep.subr.mxu0 %v1793_v35 }
 0x9f7   :  { %4029 = vmatpush1.msk.msra.mxu0 %vm197_vm3, %v1794_v33  ;;  %v5831_v33 = vld [vmem:[#allocation57_spill] sm:$0xff] }
 0x9f8   :  { %4030 = vmatmul.mubr.msk.f32.vlgmr.msra.gmra.mxu0 %vm268_vm4, %v5802_v37  ;;  %4077 = vmatprep.subr.mxu0 %v5145_v16  ;;  %v5809_v16 = vld [vmem:[#allocation63_spill] sm:$0xff]  ;;  %v5832_v37 = vld [vmem:[#allocation82_spill] sm:$0xff] }
 0x9f9   :  { %1875 = vmatprep.mubr.f32.mxu0 %v5743_v20  ;;  %4078 = vmatpush3.msra.mxu0 %v5147_v22  ;;  %v5811_v22 = vld [vmem:[#allocation65_spill] sm:$0xff] }
 0x9fa   :  { %4079 = vmatprep.subr.mxu0 %v5149_v44  ;;  %v5812_v44 = vld [vmem:[#allocation66_spill] sm:$0xff] }
 0x9fb   :  { %4080 = vmatpush3.msra.mxu0 %v5803_v39 }
 0x9fc   :  { %4031 = vmatmul.mubr.msk.f32.gmra.mxu0 %vm268_vm4, %v5804_v42  ;;  %4081 = vmatprep.subr.mxu0 %v5805_v46 }
 0x9fd   :  { %4082 = vmatpush3.msra.mxu0 %v5806_v50 }
 0x9fe   :  { %4083 = vmatprep.subr.mxu0 %v5807_v54 }
 0x9ff   :  { %4084 = vmatpush3.msra.mxu0 %v5808_v58 }
 0xa00   :  { %4085 = vmatprep.subr.mxu0 %v5809_v16  ;;  %v5833_v16 = vld [vmem:[#allocation83_spill] sm:$0xff] }
 0xa01   :  { %4086 = vmatpush3.msra.mxu0 %v5810_v62 }
 0xa02   :  { %4087 = vmatprep.subr.mxu0 %v5811_v22 }
 0xa03   :  { %4088 = vmatpush3.msra.mxu0 %v5812_v44  ;;  %v2163_v44 = vld [vmem:[#allocation14 + $0x1f8] sm:$0xff] }
 0xa04   :  { %4089 = vmatprep.subr.mxu0 %v5813_v2  ;;  %v2162_v2 = vld [vmem:[#allocation14 + $0x1f0] sm:$0xff] }
 0xa05   :  { %4090 = vmatpush3.msra.mxu0 %v5814_v10  ;;  %v2161_v10 = vld [vmem:[#allocation14 + $0x1e8] sm:$0xff] }
 0xa06   :  { %4091 = vmatprep.subr.mxu0 %v5815_v14 }
 0xa07   :  { %4092 = vmatpush3.msra.mxu0 %v5816_v36 }
 0xa08   :  { %4093 = vmatprep.subr.mxu0 %v5817_v5  ;;  %v2126_v5 = vld [vmem:[#allocation14 + $0xf8] sm:$0xff] }
 0xa09   :  { %4094 = vmatpush3.msra.mxu0 %v5818_v4  ;;  %v2160_v4 = vld [vmem:[#allocation14 + $0x1e0] sm:$0xff] }
 0xa0a   :  { %4095 = vmatprep.subr.mxu0 %v5819_v23  ;;  %v2159_v23 = vld [vmem:[#allocation14 + $0x1d8] sm:$0xff] }
 0xa0b   :  { %4096 = vmatpush3.msra.mxu0 %v5820_v12 }
 0xa0c   :  { %4097 = vmatprep.subr.mxu0 %v5821_v40 }
 0xa0d   :  { %4098 = vmatpush3.msra.mxu0 %v5822_v32  ;;  %v2158_v32 = vld [vmem:[#allocation14 + $0x1d0] sm:$0xff] }
 0xa0e   :  { %4099 = vmatprep.subr.mxu0 %v5823_v27  ;;  %v2157_v27 = vld [vmem:[#allocation14 + $0x1c8] sm:$0xff] }
 0xa0f   :  { %4100 = vmatpush3.msra.mxu0 %v5824_v38 }
 0xa10   :  { %4101 = vmatprep.subr.mxu0 %v5825_v56  ;;  %v2156_v56 = vld [vmem:[#allocation14 + $0x1c0] sm:$0xff] }
 0xa11   :  { %4102 = vmatpush3.msra.mxu0 %v5826_v60  ;;  %v2155_v60 = vld [vmem:[#allocation14 + $0x1b8] sm:$0xff] }
 0xa12   :  { %4103 = vmatprep.subr.mxu0 %v5243_v0 }
 0xa13   :  { %4104 = vmatpush3.msra.mxu0 %v5249_v7 }
 0xa14   :  { %4105 = vmatprep.subr.mxu0 %v5253_v9 }
 0xa15   :  { %4106 = vmatpush3.msra.mxu0 %v5258_v52 }
 0xa16   :  { %4107 = vmatprep.subr.mxu0 %v5261_v25 }
 0xa17   :  { %4108 = vmatpush3.msra.mxu0 %v5827_v18  ;;  %v2154_v18 = vld [vmem:[#allocation14 + $0x1b0] sm:$0xff] }
 0xa18   :  { %2235 = vmatprep.subr.mxu0 %v2126_v5  ;;  %v2107_v5 = vld [vmem:[#allocation14 + $0x60] sm:$0xff] }
 0xab8   :  { %v1871_v30 = vpop.f32.mrf.mxu0 }
 0xab9   :  { %v1872_v49 = vadd.f32 %v1871_v30, %v5829_v47  ;;  %v2153_v30 = vld [vmem:[#allocation14 + $0x1a8] sm:$0xff] }
 0xaba   :  { %v1873_v34 = vpop.f32.mrf.mxu0 }
 0xabb   :  { %v1874_v7 = vadd.f32 %v1873_v34, %v5829_v47  ;;  %v1882_v52 = vmax.f32 %v1872_v49, 0.0  ;;  %v2152_v34 = vld [vmem:[#allocation14 + $0x1a0] sm:$0xff]  ;;  %v2147_v47 = vld [vmem:[#allocation14 + $0x178] sm:$0xff]  ;;  %v2146_v49 = vld [vmem:[#allocation14 + $0x170] sm:$0xff] }
 0xabc   :  { %v1877_v28 = vpop.f32.mrf.mxu0 }
 0xabd   :  { %v1878_v43 = vadd.f32 %v1877_v28, %v5828_v41  ;;  %v1883_v25 = vmax.f32 %v1874_v7, 0.0  ;;  %v2151_v28 = vld [vmem:[#allocation14 + $0x198] sm:$0xff] }
 0xabe   :  { %v1879_v45 = vpop.f32.mrf.mxu0  ;;  %v2143_v7 = vld [vmem:[#allocation14 + $0x158] sm:$0xff] }
 0xabf   :  { %v1884_v51 = vmax.f32 %v1878_v43, 0.0  ;;  %v1880_v0 = vadd.f32 %v1879_v45, %v5828_v41  ;;  %v2150_v41 = vld [vmem:[#allocation14 + $0x190] sm:$0xff]  ;;  %v2149_v43 = vld [vmem:[#allocation14 + $0x188] sm:$0xff]  ;;  %v2148_v45 = vld [vmem:[#allocation14 + $0x180] sm:$0xff] }
 0xac1   :  { %v1885_v9 = vmax.f32 %v1880_v0, 0.0  ;;  %1904 = vrot.lane.b32.xlu1 %v1884_v51, %s4553_s12  ;;  %v2144_v0 = vld [vmem:[#allocation14 + $0x160] sm:$0xff] }
 0xac3   :  { %1908 = vrot.lane.b32.xlu0 %v1885_v9, %s4553_s12 }
 0xac5   :  { %1902 = vrot.lane.b32.xlu1 %v1882_v52, %s4553_s12 }
 0xac7   :  { %1906 = vrot.lane.b32.xlu0 %v1883_v25, %s4553_s12 }
 0xac9   :  { %1888 = vrot.lane.b32.xlu1 %v1884_v51, %s4556_s14 }
 0xacb   :  { %1892 = vrot.lane.b32.xlu0 %v1885_v9, %s4556_s14 }
 0xacd   :  { %1886 = vrot.lane.b32.xlu1 %v1882_v52, %s4556_s14 }
 0xacf   :  { %1890 = vrot.lane.b32.xlu0 %v1883_v25, %s4556_s14 }
 0xb33   :  { %v1905_v53 = vpop.permute.xlu1 %1904 }
 0xb35   :  { %v1909_v55 = vpop.permute.xlu0 %1908 }
 0xb36   :  { %v1911_v57 = vsel %vm244_vm0, %v1905_v53, %v1909_v55  ;;  %v1913_v59 = vsel %vm244_vm0, %v1909_v55, %v1905_v53  ;;  %v2139_v53 = vld [vmem:[#allocation14 + $0x138] sm:$0xff]  ;;  %v2138_v55 = vld [vmem:[#allocation14 + $0x130] sm:$0xff] }
 0xb37   :  { %4032 = vmatprep.subr.msk.mxu1 %vm206_vm5, %v1913_v59  ;;  %v1903_v3 = vpop.permute.xlu1 %1902 }
 0xb38   :  { %1939 = vmatpush1.msra.mxu1 %v1911_v57  ;;  %v2137_v57 = vld [vmem:[#allocation14 + $0x128] sm:$0xff] }
 0xb39   :  { %v1907_v6 = vpop.permute.xlu0 %1906 }
 0xb3a   :  { %v1910_v11 = vsel %vm244_vm0, %v1903_v3, %v1907_v6  ;;  %v1912_v13 = vsel %vm244_vm0, %v1907_v6, %v1903_v3 }
 0xb3b   :  { %4033 = vmatprep.subr.msk.mxu1 %vm206_vm5, %v1912_v13  ;;  %v1889_v15 = vpop.permute.xlu1 %1888 }
 0xb3c   :  { %1941 = vmatpush1.msra.mxu1 %v1910_v11 }
 0xb3d   :  { %v1893_v17 = vpop.permute.xlu0 %1892  ;;  %1942 = vmatprep.subr.mxu1 %v1885_v9  ;;  %v2142_v9 = vld [vmem:[#allocation14 + $0x150] sm:$0xff] }
 0xb3e   :  { %1943 = vmatpush1.msra.mxu1 %v1884_v51  ;;  %v1895_v19 = vsel %vm219_vm2, %v1889_v15, %v1893_v17  ;;  %v1897_v21 = vsel %vm219_vm2, %v1893_v17, %v1889_v15  ;;  %v2145_v51 = vld [vmem:[#allocation14 + $0x168] sm:$0xff] }
 0xb3f   :  { %1944 = vmatprep.subr.mxu1 %v1883_v25  ;;  %v1887_v24 = vpop.permute.xlu1 %1886  ;;  %v2140_v25 = vld [vmem:[#allocation14 + $0x140] sm:$0xff] }
 0xb40   :  { %1945 = vmatpush1.msra.mxu1 %v1882_v52  ;;  %v2141_v52 = vld [vmem:[#allocation14 + $0x148] sm:$0xff] }
 0xb41   :  { %v1891_v26 = vpop.permute.xlu0 %1890  ;;  %1946 = vmatprep.subr.mxu1 %v1895_v19 }
 0xb42   :  { %v1896_v48 = vsel %vm219_vm2, %v1891_v26, %v1887_v24  ;;  %4034 = vmatpush1.msk.msra.mxu1 %vm197_vm3, %v1897_v21  ;;  %v1894_v29 = vsel %vm219_vm2, %v1887_v24, %v1891_v26  ;;  %v2125_v26 = vld [vmem:[#allocation14 + $0xf0] sm:$0xff] }
 0xb43   :  { %1948 = vmatprep.subr.mxu1 %v1894_v29 }
 0xb44   :  { %4035 = vmatpush1.msk.msra.mxu1 %vm197_vm3, %v1896_v48  ;;  %v2124_v48 = vld [vmem:[#allocation14 + $0xe8] sm:$0xff] }
 0xb45   :  { %4036 = vmatmul.mubr.msk.f32.vlgmr.msra.gmra.mxu1 %vm1059_vm6, %v5830_v31  ;;  %2164 = vmatprep.subr.mxu1 %v2163_v44  ;;  %v2112_v44 = vld [vmem:[#allocation14 + $0x88] sm:$0xff] }
 0xb46   :  { %1988 = vmatprep.mubr.f32.mxu1 %v5743_v20  ;;  %2165 = vmatpush1.msra.mxu1 %v2162_v2  ;;  %v2111_v2 = vld [vmem:[#allocation14 + $0x80] sm:$0xff] }
 0xb47   :  { %2166 = vmatprep.subr.mxu1 %v2161_v10  ;;  %v2110_v10 = vld [vmem:[#allocation14 + $0x78] sm:$0xff] }
 0xb48   :  { %2167 = vmatpush1.msra.mxu1 %v2160_v4  ;;  %v2106_v4 = vld [vmem:[#allocation14 + $0x58] sm:$0xff] }
 0xb49   :  { %4037 = vmatmul.mubr.msk.f32.gmra.mxu1 %vm1059_vm6, %v5831_v33  ;;  %2168 = vmatprep.subr.mxu1 %v2159_v23  ;;  %v2123_v33 = vld [vmem:[#allocation14 + $0xe0] sm:$0xff]  ;;  %v2105_v23 = vld [vmem:[#allocation14 + $0x50] sm:$0xff] }
 0xb4a   :  { %2228 = vmatprep.mubr.f32.mxu1 %v5743_v20  ;;  %2169 = vmatpush1.msra.mxu1 %v2158_v32  ;;  %v2102_v32 = vld [vmem:[#allocation14 + $0x38] sm:$0xff] }
 0xb4b   :  { %2170 = vmatprep.subr.mxu1 %v2157_v27  ;;  %v2136_v27 = vld [vmem:[#allocation14 + $0x120] sm:$0xff] }
 0xb4c   :  { %2171 = vmatpush1.msra.mxu1 %v2156_v56  ;;  %v2135_v56 = vld [vmem:[#allocation14 + $0x118] sm:$0xff] }
 0xb4d   :  { %2172 = vmatprep.subr.mxu1 %v2155_v60  ;;  %v2100_v60 = vld [vmem:[#allocation14 + $0x28] sm:$0xff] }
 0xb4e   :  { %2173 = vmatpush1.msra.mxu1 %v2154_v18  ;;  %v2134_v18 = vld [vmem:[#allocation14 + $0x110] sm:$0xff] }
 0xb4f   :  { %2174 = vmatprep.subr.mxu1 %v2153_v30  ;;  %v2099_v30 = vld [vmem:[#allocation14 + $0x20] sm:$0xff] }
 0xb50   :  { %2175 = vmatpush1.msra.mxu1 %v2152_v34  ;;  %v2133_v34 = vld [vmem:[#allocation14 + $0x108] sm:$0xff] }
 0xb51   :  { %2176 = vmatprep.subr.mxu1 %v2151_v28  ;;  %v2098_v28 = vld [vmem:[#allocation14 + $0x18] sm:$0xff] }
 0xb52   :  { %2177 = vmatpush1.msra.mxu1 %v2150_v41  ;;  %v2132_v41 = vld [vmem:[#allocation14 + $0x100] sm:$0xff] }
 0xb53   :  { %2178 = vmatprep.subr.mxu1 %v2149_v43  ;;  %v2097_v43 = vld [vmem:[#allocation14 + $0x10] sm:$0xff] }
 0xb54   :  { %2179 = vmatpush1.msra.mxu1 %v2148_v45  ;;  %v2096_v45 = vld [vmem:[#allocation14 + $0x8] sm:$0xff] }
 0xb55   :  { %2180 = vmatprep.subr.mxu1 %v2147_v47  ;;  %v2343_v47 = vld [vmem:[#allocation14 + $0x2f8] sm:$0xff] }
 0xb56   :  { %2181 = vmatpush1.msra.mxu1 %v2146_v49  ;;  %v2095_v49 = vld [vmem:[#allocation14] sm:$0xff] }
 0xb57   :  { %2182 = vmatprep.subr.mxu1 %v2145_v51  ;;  %v2454_v51 = vld [vmem:[#allocation14 + $0x3f8] sm:$0xff] }
 0xb58   :  { %2183 = vmatpush1.msra.mxu1 %v2144_v0 }
 0xb59   :  { %2184 = vmatprep.subr.mxu1 %v2143_v7 }
 0xb5a   :  { %2185 = vmatpush1.msra.mxu1 %v2142_v9 }
 0xb5b   :  { %2186 = vmatprep.subr.mxu1 %v2141_v52  ;;  %v2128_v52 = vrot.slane %v5395_v61, 1 }
 0xb5c   :  { %2187 = vmatpush1.msra.mxu1 %v2140_v25 }
 0xb5d   :  { %2188 = vmatprep.subr.mxu1 %v2139_v53  ;;  %v2342_v53 = vld [vmem:[#allocation14 + $0x2f0] sm:$0xff] }
 0xb5e   :  { %2189 = vmatpush1.msra.mxu1 %v2138_v55  ;;  %v2528_v55 = vrot.slane %v5395_v61, 4 }
 0xb5f   :  { %2190 = vmatprep.subr.mxu1 %v2137_v57  ;;  %v5545_v57 = vadd.f32 %v5399_v1, %v5397_v63 }
 0xb60   :  { %2191 = vmatpush1.msra.mxu1 %v2136_v27  ;;  %v2333_v27 = vld [vmem:[#allocation14 + $0x2a8] sm:$0xff] }
 0xb61   :  { %2192 = vmatprep.subr.mxu1 %v2135_v56 }
 0xb62   :  { %2193 = vmatpush1.msra.mxu1 %v2134_v18 }
 0xb63   :  { %2194 = vmatprep.subr.mxu1 %v2133_v34  ;;  %v2445_v34 = vld [vmem:[#allocation14 + $0x3b0] sm:$0xff] }
 0xb64   :  { %2195 = vmatpush1.msra.mxu1 %v2132_v41  ;;  %v2444_v41 = vld [vmem:[#allocation14 + $0x3a8] sm:$0xff] }
 0xb65   :  { %2344 = vmatprep.subr.mxu1 %v2343_v47  ;;  %v2329_v47 = vld [vmem:[#allocation14 + $0x288] sm:$0xff] }
 0xc05   :  { %v1984_v35 = vpop.f32.mrf.mxu1 }
 0xc06   :  { %v5497_v39 = vadd.f32 %v1984_v35, %v5832_v37 }
 0xc07   :  { %v1986_v42 = vpop.f32.mrf.mxu1 }
 0xc08   :  { %v5500_v46 = vadd.f32 %v1986_v42, %v5832_v37  ;;  %v1995_v54 = vmax.f32 %v5497_v39, 0.0  ;;  %v2122_v39 = vld [vmem:[#allocation14 + $0xd8] sm:$0xff]  ;;  %v2121_v42 = vld [vmem:[#allocation14 + $0xd0] sm:$0xff] }
 0xc09   :  { %v1990_v50 = vpop.f32.mrf.mxu1 }
 0xc0a   :  { %v1996_v58 = vmax.f32 %v5500_v46, 0.0  ;;  %v5505_v62 = vadd.f32 %v1990_v50, %v5833_v16  ;;  %v2120_v46 = vld [vmem:[#allocation14 + $0xc8] sm:$0xff]  ;;  %v2119_v50 = vld [vmem:[#allocation14 + $0xc0] sm:$0xff] }
 0xc0b   :  { %v1992_v22 = vpop.f32.mrf.mxu1 }
 0xc0c   :  { %v4204_v14 = vpack.i.bf16 %v1996_v58, %v1995_v54  ;;  %v5512_v36 = vadd.f32 %v1992_v22, %v5833_v16  ;;  %v1997_v12 = vmax.f32 %v5505_v62, 0.0  ;;  %v2115_v16 = vld [vmem:[#allocation14 + $0xa0] sm:$0xff]  ;;  %v2114_v62 = vld [vmem:[#allocation14 + $0x98] sm:$0xff]  ;;  %v2113_v22 = vld [vmem:[#allocation14 + $0x90] sm:$0xff] }
 0xc0e   :  { %v1998_v40 = vmax.f32 %v5512_v36, 0.0  ;;  %4205 = vrot.lane.b32.xlu1 %v4204_v14, %s4553_s12  ;;  %v2109_v14 = vld [vmem:[#allocation14 + $0x70] sm:$0xff]  ;;  %v2108_v36 = vld [vmem:[#allocation14 + $0x68] sm:$0xff] }
 0xc10   :  { %v4209_v38 = vpack.i.bf16 %v1998_v40, %v1997_v12 }
 0xc12   :  { %4210 = vrot.lane.b32.xlu0 %v4209_v38, %s4553_s12  ;;  %v2101_v38 = vld [vmem:[#allocation14 + $0x30] sm:$0xff] }
 0xc80   :  { %v4206_v59 = vpop.permute.xlu1 %4205 }
 0xc81   :  { %v4208_v3 = vunpack.i.h.bf16 %v4206_v59  ;;  %v4207_v6 = vunpack.i.l.bf16 %v4206_v59 }
 0xc83   :  { %v2007_v11 = vsel %vm244_vm0, %v4207_v6, %v4208_v3  ;;  %v2009_v13 = vsel %vm244_vm0, %v4208_v3, %v4207_v6  ;;  %v2341_v3 = vld [vmem:[#allocation14 + $0x2e8] sm:$0xff] }
 0xc84   :  { %v2011_v15 = vmax.f32 %v1995_v54, %v2007_v11  ;;  %v4211_v17 = vpop.permute.xlu0 %4210  ;;  %v2012_v19 = vmax.f32 %v1996_v58, %v2009_v13  ;;  %v2117_v54 = vld [vmem:[#allocation14 + $0xb0] sm:$0xff]  ;;  %v2116_v58 = vld [vmem:[#allocation14 + $0xa8] sm:$0xff]  ;;  %v2639_v11 = vrot.slane %v5395_v61, 5 }
 0xc85   :  { %v4213_v21 = vunpack.i.h.bf16 %v4211_v17  ;;  %v4212_v24 = vunpack.i.l.bf16 %v4211_v17  ;;  %v2453_v17 = vld [vmem:[#allocation14 + $0x3f0] sm:$0xff] }
 0xc86   :  { %2079 = vmatprep.mubr.f32.mxu0 %v2012_v19 }
 0xc87   :  { %2080 = vmatmul.mubr.f32.vlgmr.msra.gmra.mxu0 %v2011_v15  ;;  %v2010_v29 = vsel %vm244_vm0, %v4213_v21, %v4212_v24  ;;  %v2008_v31 = vsel %vm244_vm0, %v4212_v24, %v4213_v21  ;;  %v2340_v15 = vld [vmem:[#allocation14 + $0x2e0] sm:$0xff] }
 0xc88   :  { %v2014_v35 = vmax.f32 %v1998_v40, %v2010_v29  ;;  %v2013_v37 = vmax.f32 %v1997_v12, %v2008_v31  ;;  %2236 = vmatpush1.msra.mxu0 %v2125_v26  ;;  %v2104_v12 = vld [vmem:[#allocation14 + $0x48] sm:$0xff]  ;;  %v2103_v40 = vld [vmem:[#allocation14 + $0x40] sm:$0xff]  ;;  %v2750_v31 = vrot.slane %v5395_v61, 6 }
 0xc89   :  { %2237 = vmatprep.subr.mxu0 %v2124_v48  ;;  %v2339_v48 = vld [vmem:[#allocation14 + $0x2d8] sm:$0xff]  ;;  %v2452_v29 = vld [vmem:[#allocation14 + $0x3e8] sm:$0xff] }
 0xc8a   :  { %2084 = vmatprep.mubr.f32.mxu0 %v2014_v35  ;;  %2238 = vmatpush1.msra.mxu0 %v2123_v33  ;;  %v2861_v33 = vrot.slane %v5395_v61, 7  ;;  %v2338_v35 = vld [vmem:[#allocation14 + $0x2d0] sm:$0xff] }
 0xc8b   :  { %2085 = vmatmul.mubr.f32.gmra.mxu0 %v2013_v37  ;;  %2239 = vmatprep.subr.mxu0 %v2122_v39  ;;  %v2451_v37 = vld [vmem:[#allocation14 + $0x3e0] sm:$0xff] }
 0xc8c   :  { %2240 = vmatpush1.msra.mxu0 %v2121_v42  ;;  %2299 = vmatprep.mubr.f32.mxu0 %v5743_v20 }
 0xc8d   :  { %2241 = vmatprep.subr.mxu0 %v2120_v46  ;;  %v2337_v46 = vld [vmem:[#allocation14 + $0x2c8] sm:$0xff] }
 0xc8e   :  { %2242 = vmatpush1.msra.mxu0 %v2119_v50  ;;  %v2450_v50 = vld [vmem:[#allocation14 + $0x3d8] sm:$0xff] }
 0xc8f   :  { %2243 = vmatprep.subr.mxu0 %v2118_v8 }
 0xc90   :  { %2244 = vmatpush1.msra.mxu0 %v2117_v54 }
 0xc91   :  { %2245 = vmatprep.subr.mxu0 %v2116_v58  ;;  %v2336_v58 = vld [vmem:[#allocation14 + $0x2c0] sm:$0xff] }
 0xc92   :  { %2246 = vmatpush1.msra.mxu0 %v2115_v16  ;;  %v2449_v16 = vld [vmem:[#allocation14 + $0x3d0] sm:$0xff] }
 0xc93   :  { %2247 = vmatprep.subr.mxu0 %v2114_v62  ;;  %v3414_v62 = vrot.slane %v5545_v57, 4 }
 0xc94   :  { %2248 = vmatpush1.msra.mxu0 %v2113_v22 }
 0xc95   :  { %2249 = vmatprep.subr.mxu0 %v2112_v44  ;;  %v3525_v44 = vrot.slane %v5545_v57, 5 }
 0xc96   :  { %2250 = vmatpush1.msra.mxu0 %v2111_v2 }
 0xc97   :  { %2251 = vmatprep.subr.mxu0 %v2110_v10  ;;  %v2335_v10 = vld [vmem:[#allocation14 + $0x2b8] sm:$0xff] }
 0xc98   :  { %2252 = vmatpush1.msra.mxu0 %v2109_v14  ;;  %v2448_v14 = vld [vmem:[#allocation14 + $0x3c8] sm:$0xff] }
 0xc99   :  { %2253 = vmatprep.subr.mxu0 %v2108_v36  ;;  %v3636_v36 = vrot.slane %v5545_v57, 6 }
 0xc9a   :  { %2254 = vmatpush1.msra.mxu0 %v2107_v5 }
 0xc9b   :  { %2255 = vmatprep.subr.mxu0 %v2106_v4  ;;  %v3747_v4 = vrot.slane %v5545_v57, 7 }
 0xc9c   :  { %2256 = vmatpush1.msra.mxu0 %v2105_v23 }
 0xc9d   :  { %2257 = vmatprep.subr.mxu0 %v2104_v12  ;;  %v2334_v12 = vld [vmem:[#allocation14 + $0x2b0] sm:$0xff] }
 0xc9e   :  { %2258 = vmatpush1.msra.mxu0 %v2103_v40  ;;  %v2447_v40 = vld [vmem:[#allocation14 + $0x3c0] sm:$0xff] }
 0xc9f   :  { %2259 = vmatprep.subr.mxu0 %v2102_v32 }
 0xca0   :  { %2260 = vmatpush1.msra.mxu0 %v2101_v38  ;;  %v2446_v38 = vld [vmem:[#allocation14 + $0x3b8] sm:$0xff] }
 0xca1   :  { %2261 = vmatprep.subr.mxu0 %v2100_v60 }
 0xca2   :  { %2262 = vmatpush1.msra.mxu0 %v2099_v30  ;;  %v2332_v30 = vld [vmem:[#allocation14 + $0x2a0] sm:$0xff] }
 0xca3   :  { %2263 = vmatprep.subr.mxu0 %v2098_v28  ;;  %v2331_v28 = vld [vmem:[#allocation14 + $0x298] sm:$0xff] }
 0xca4   :  { %2264 = vmatpush1.msra.mxu0 %v2097_v43  ;;  %v2330_v43 = vld [vmem:[#allocation14 + $0x290] sm:$0xff] }
 0xca5   :  { %2265 = vmatprep.subr.mxu0 %v2096_v45  ;;  %v2443_v45 = vld [vmem:[#allocation14 + $0x3a0] sm:$0xff] }
 0xca6   :  { %2266 = vmatpush1.msra.mxu0 %v2095_v49  ;;  %v2442_v49 = vld [vmem:[#allocation14 + $0x398] sm:$0xff] }
 0xca7   :  { %2455 = vmatprep.subr.mxu0 %v2454_v51  ;;  %v2328_v51 = vld [vmem:[#allocation14 + $0x280] sm:$0xff] }
 0xd47   :  { %v4109_v0 = vpop.f32.mrf.mxu0 }
 0xd49   :  { %v4110_v7 = vpop.f32.mrf.mxu0 }
 0xd4a   :  { %v5539_v9 = vadd.f32 %v4110_v7, %v4109_v0  ;;  %v2441_v0 = vld [vmem:[#allocation14 + $0x390] sm:$0xff]  ;;  %v2327_v7 = vld [vmem:[#allocation14 + $0x278] sm:$0xff] }
 0xd4b   :  { %v4112_v25 = vpop.f32.mrf.mxu0 }
 0xd4c   :  { %v2130_v59 = vsel %vm2093_vm7, %v2128_v52, %v5539_v9  ;;  %v2091_v6 = vrot.slane %v5539_v9, 7  ;;  %v2530_v19 = vrot.slane %v5539_v9, 3  ;;  %v2641_v21 = vrot.slane %v5539_v9, 4  ;;  %v2440_v52 = vld [vmem:[#allocation14 + $0x388] sm:$0xff] }
 0xd4d   :  { %v4113_v13 = vpop.f32.mrf.mxu0  ;;  %2229 = vmatmul.mubr.f32.vlgmr.msra.gmra.mxu1 %v2130_v59  ;;  %v2752_v24 = vrot.slane %v5539_v9, 5  ;;  %v2863_v63 = vrot.slane %v5539_v9, 6  ;;  %v2438_v59 = vld [vmem:[#allocation14 + $0x378] sm:$0xff] }
 0xd4e   :  { %v5555_v1 = vadd.f32 %v4113_v13, %v4112_v25  ;;  %2345 = vmatpush1.msra.mxu1 %v2342_v53  ;;  %v2094_v26 = vsel %vm2093_vm7, %v5395_v61, %v2091_v6  ;;  %2408 = vmatprep.mubr.f32.mxu1 %v5743_v20  ;;  %v5563_v39 = vsel %vm2093_vm7, %v2528_v55, %v2530_v19  ;;  %v2326_v25 = vld [vmem:[#allocation14 + $0x270] sm:$0xff]  ;;  %v2439_v53 = vld [vmem:[#allocation14 + $0x380] sm:$0xff]  ;;  %v2325_v55 = vld [vmem:[#allocation14 + $0x268] sm:$0xff] }
 0xd4f   :  { %2346 = vmatprep.subr.mxu1 %v2341_v3  ;;  %2300 = vmatmul.mubr.f32.vlgmr.msra.gmra.mxu0 %v2094_v26  ;;  %v5566_v42 = vsel %vm2093_vm7, %v2639_v11, %v2641_v21  ;;  %v5569_v8 = vsel %vm2093_vm7, %v2750_v31, %v2752_v24  ;;  %v5572_v54 = vsel %vm2093_vm7, %v2861_v33, %v2863_v63  ;;  %v2324_v3 = vld [vmem:[#allocation14 + $0x260] sm:$0xff]  ;;  %v2437_v6 = vld [vmem:[#allocation14 + $0x370] sm:$0xff]  ;;  %v2323_v11 = vld [vmem:[#allocation14 + $0x258] sm:$0xff] }
 0xd50   :  { %2347 = vmatpush1.msra.mxu1 %v2340_v15  ;;  %2456 = vmatpush1.msra.mxu0 %v2453_v17  ;;  %v3416_v22 = vrot.slane %v5555_v1, 3  ;;  %v3527_v2 = vrot.slane %v5555_v1, 4  ;;  %v3638_v5 = vrot.slane %v5555_v1, 5  ;;  %v3749_v23 = vrot.slane %v5555_v1, 6  ;;  %v2436_v13 = vld [vmem:[#allocation14 + $0x368] sm:$0xff]  ;;  %v2322_v15 = vld [vmem:[#allocation14 + $0x250] sm:$0xff] }
 0xd51   :  { %2348 = vmatprep.subr.mxu1 %v2339_v48  ;;  %2457 = vmatprep.subr.mxu0 %v2452_v29  ;;  %v2435_v17 = vld [vmem:[#allocation14 + $0x360] sm:$0xff]  ;;  %v2321_v19 = vld [vmem:[#allocation14 + $0x248] sm:$0xff]  ;;  %v2434_v21 = vld [vmem:[#allocation14 + $0x358] sm:$0xff] }
 0xd52   :  { %2349 = vmatpush1.msra.mxu1 %v2338_v35  ;;  %2458 = vmatpush1.msra.mxu0 %v2451_v37  ;;  %v5583_v32 = vsel %vm2093_vm7, %v3414_v62, %v3416_v22  ;;  %v5586_v56 = vsel %vm2093_vm7, %v3525_v44, %v3527_v2  ;;  %v5589_v60 = vsel %vm2093_vm7, %v3636_v36, %v3638_v5  ;;  %v2320_v24 = vld [vmem:[#allocation14 + $0x240] sm:$0xff]  ;;  %v2433_v63 = vld [vmem:[#allocation14 + $0x350] sm:$0xff]  ;;  %v2319_v26 = vld [vmem:[#allocation14 + $0x238] sm:$0xff]  ;;  %v2308_v2 = vrot.slane %v5539_v9, 1 }
 0xd53   :  { %2350 = vmatprep.subr.mxu1 %v2337_v46  ;;  %2459 = vmatprep.subr.mxu0 %v2450_v50  ;;  %v5592_v18 = vsel %vm2093_vm7, %v3747_v4, %v3749_v23  ;;  %v2432_v48 = vld [vmem:[#allocation14 + $0x348] sm:$0xff]  ;;  %v2318_v29 = vld [vmem:[#allocation14 + $0x230] sm:$0xff]  ;;  %v2431_v31 = vld [vmem:[#allocation14 + $0x340] sm:$0xff]  ;;  %v2306_v36 = vrot.slane %v5395_v61, 2 }
 0xd54   :  { %2351 = vmatpush1.msra.mxu1 %v2336_v58  ;;  %2460 = vmatpush1.msra.mxu0 %v2449_v16  ;;  %v2317_v33 = vld [vmem:[#allocation14 + $0x228] sm:$0xff]  ;;  %v2430_v35 = vld [vmem:[#allocation14 + $0x338] sm:$0xff]  ;;  %v2316_v37 = vld [vmem:[#allocation14 + $0x220] sm:$0xff] }
 0xd55   :  { %2352 = vmatprep.subr.mxu1 %v2335_v10  ;;  %2461 = vmatprep.subr.mxu0 %v2448_v14  ;;  %v2429_v46 = vld [vmem:[#allocation14 + $0x330] sm:$0xff]  ;;  %v2315_v50 = vld [vmem:[#allocation14 + $0x218] sm:$0xff]  ;;  %v2428_v58 = vld [vmem:[#allocation14 + $0x328] sm:$0xff] }
 0xd56   :  { %2353 = vmatpush1.msra.mxu1 %v2334_v12  ;;  %2462 = vmatpush1.msra.mxu0 %v2447_v40  ;;  %v2314_v16 = vld [vmem:[#allocation14 + $0x210] sm:$0xff]  ;;  %v2427_v62 = vld [vmem:[#allocation14 + $0x320] sm:$0xff]  ;;  %v2313_v22 = vld [vmem:[#allocation14 + $0x208] sm:$0xff]  ;;  %v2419_v12 = vrot.slane %v5539_v9, 2  ;;  %v2310_v40 = vsel %vm2093_vm7, %v2306_v36, %v2308_v2 }
 0xd57   :  { %2354 = vmatprep.subr.mxu1 %v2333_v27  ;;  %2463 = vmatprep.subr.mxu0 %v2446_v38  ;;  %v2426_v44 = vld [vmem:[#allocation14 + $0x318] sm:$0xff]  ;;  %v2312_v10 = vld [vmem:[#allocation14 + $0x200] sm:$0xff]  ;;  %v2425_v14 = vld [vmem:[#allocation14 + $0x310] sm:$0xff]  ;;  %v2417_v38 = vrot.slane %v5395_v61, 3 }
 0xd58   :  { %2355 = vmatpush1.msra.mxu1 %v2332_v30  ;;  %2464 = vmatpush1.msra.mxu0 %v2445_v34  ;;  %v2424_v5 = vld [vmem:[#allocation14 + $0x308] sm:$0xff]  ;;  %v2565_v4 = vld [vmem:[#allocation14 + $0x4f8] sm:$0xff]  ;;  %v2423_v23 = vld [vmem:[#allocation14 + $0x300] sm:$0xff] }
 0xd59   :  { %2356 = vmatprep.subr.mxu1 %v2331_v28  ;;  %2465 = vmatprep.subr.mxu0 %v2444_v41  ;;  %v2564_v27 = vld [vmem:[#allocation14 + $0x4f0] sm:$0xff]  ;;  %v2563_v30 = vld [vmem:[#allocation14 + $0x4e8] sm:$0xff]  ;;  %v2676_v34 = vld [vmem:[#allocation14 + $0x5f8] sm:$0xff]  ;;  %v2421_v41 = vsel %vm2093_vm7, %v2417_v38, %v2419_v12 }
 0xd5a   :  { %2357 = vmatpush1.msra.mxu1 %v2330_v43  ;;  %2466 = vmatpush1.msra.mxu0 %v2443_v45  ;;  %v2562_v28 = vld [vmem:[#allocation14 + $0x4e0] sm:$0xff]  ;;  %v2675_v9 = vld [vmem:[#allocation14 + $0x5f0] sm:$0xff]  ;;  %v2561_v43 = vld [vmem:[#allocation14 + $0x4d8] sm:$0xff] }
 0xd5b   :  { %2358 = vmatprep.subr.mxu1 %v2329_v47  ;;  %2467 = vmatprep.subr.mxu0 %v2442_v49  ;;  %v2674_v45 = vld [vmem:[#allocation14 + $0x5e8] sm:$0xff]  ;;  %v2560_v47 = vld [vmem:[#allocation14 + $0x4d0] sm:$0xff]  ;;  %v2673_v49 = vld [vmem:[#allocation14 + $0x5e0] sm:$0xff] }
 0xd5c   :  { %2359 = vmatpush1.msra.mxu1 %v2328_v51  ;;  %2468 = vmatpush1.msra.mxu0 %v2441_v0  ;;  %v2559_v61 = vld [vmem:[#allocation14 + $0x4c8] sm:$0xff]  ;;  %v2672_v51 = vld [vmem:[#allocation14 + $0x5d8] sm:$0xff]  ;;  %v2558_v0 = vld [vmem:[#allocation14 + $0x4c0] sm:$0xff] }
 0xd5d   :  { %2360 = vmatprep.subr.mxu1 %v2327_v7  ;;  %2469 = vmatprep.subr.mxu0 %v2440_v52  ;;  %v2671_v7 = vld [vmem:[#allocation14 + $0x5d0] sm:$0xff]  ;;  %v2557_v52 = vld [vmem:[#allocation14 + $0x4b8] sm:$0xff]  ;;  %v2539_v12 = vld [vmem:[#allocation14 + $0x428] sm:$0xff] }
 0xd5e   :  { %2361 = vmatpush1.msra.mxu1 %v2326_v25  ;;  %2470 = vmatpush1.msra.mxu0 %v2439_v53  ;;  %v2670_v25 = vld [vmem:[#allocation14 + $0x5c8] sm:$0xff]  ;;  %v2556_v53 = vld [vmem:[#allocation14 + $0x4b0] sm:$0xff]  ;;  %v2656_v2 = vld [vmem:[#allocation14 + $0x558] sm:$0xff] }
 0xd5f   :  { %2362 = vmatprep.subr.mxu1 %v2325_v55  ;;  %2471 = vmatprep.subr.mxu0 %v2438_v59  ;;  %v2669_v55 = vld [vmem:[#allocation14 + $0x5c0] sm:$0xff]  ;;  %v2555_v59 = vld [vmem:[#allocation14 + $0x4a8] sm:$0xff]  ;;  %v2541_v36 = vld [vmem:[#allocation14 + $0x438] sm:$0xff] }
 0xd60   :  { %2363 = vmatpush1.msra.mxu1 %v2324_v3  ;;  %2472 = vmatpush1.msra.mxu0 %v2437_v6  ;;  %v2668_v3 = vld [vmem:[#allocation14 + $0x5b8] sm:$0xff]  ;;  %v2554_v6 = vld [vmem:[#allocation14 + $0x4a0] sm:$0xff]  ;;  %v2651_v38 = vld [vmem:[#allocation14 + $0x530] sm:$0xff] }
 0xd61   :  { %2364 = vmatprep.subr.mxu1 %v2323_v11  ;;  %2473 = vmatprep.subr.mxu0 %v2436_v13  ;;  %v2667_v11 = vld [vmem:[#allocation14 + $0x5b0] sm:$0xff]  ;;  %v2553_v13 = vld [vmem:[#allocation14 + $0x498] sm:$0xff] }
 0xd62   :  { %2365 = vmatpush1.msra.mxu1 %v2322_v15  ;;  %2474 = vmatpush1.msra.mxu0 %v2435_v17  ;;  %v2666_v15 = vld [vmem:[#allocation14 + $0x5a8] sm:$0xff]  ;;  %v2552_v17 = vld [vmem:[#allocation14 + $0x490] sm:$0xff] }
 0xd63   :  { %2366 = vmatprep.subr.mxu1 %v2321_v19  ;;  %2475 = vmatprep.subr.mxu0 %v2434_v21  ;;  %v2665_v19 = vld [vmem:[#allocation14 + $0x5a0] sm:$0xff]  ;;  %v2551_v21 = vld [vmem:[#allocation14 + $0x488] sm:$0xff] }
 0xd64   :  { %2367 = vmatpush1.msra.mxu1 %v2320_v24  ;;  %2476 = vmatpush1.msra.mxu0 %v2433_v63  ;;  %v2664_v24 = vld [vmem:[#allocation14 + $0x598] sm:$0xff]  ;;  %v2550_v63 = vld [vmem:[#allocation14 + $0x480] sm:$0xff] }
 0xd65   :  { %2368 = vmatprep.subr.mxu1 %v2319_v26  ;;  %2477 = vmatprep.subr.mxu0 %v2432_v48  ;;  %v2663_v26 = vld [vmem:[#allocation14 + $0x590] sm:$0xff]  ;;  %v2549_v48 = vld [vmem:[#allocation14 + $0x478] sm:$0xff] }
 0xd66   :  { %2369 = vmatpush1.msra.mxu1 %v2318_v29  ;;  %2478 = vmatpush1.msra.mxu0 %v2431_v31  ;;  %v2662_v29 = vld [vmem:[#allocation14 + $0x588] sm:$0xff]  ;;  %v2548_v31 = vld [vmem:[#allocation14 + $0x470] sm:$0xff] }
 0xd67   :  { %2370 = vmatprep.subr.mxu1 %v2317_v33  ;;  %2479 = vmatprep.subr.mxu0 %v2430_v35  ;;  %v2661_v33 = vld [vmem:[#allocation14 + $0x580] sm:$0xff]  ;;  %v2547_v35 = vld [vmem:[#allocation14 + $0x468] sm:$0xff] }
 0xd68   :  { %2371 = vmatpush1.msra.mxu1 %v2316_v37  ;;  %2480 = vmatpush1.msra.mxu0 %v2429_v46  ;;  %v2660_v37 = vld [vmem:[#allocation14 + $0x578] sm:$0xff]  ;;  %v2546_v46 = vld [vmem:[#allocation14 + $0x460] sm:$0xff] }
 0xd69   :  { %2372 = vmatprep.subr.mxu1 %v2315_v50  ;;  %2481 = vmatprep.subr.mxu0 %v2428_v58  ;;  %v2659_v50 = vld [vmem:[#allocation14 + $0x570] sm:$0xff]  ;;  %v2545_v58 = vld [vmem:[#allocation14 + $0x458] sm:$0xff] }
 0xd6a   :  { %2373 = vmatpush1.msra.mxu1 %v2314_v16  ;;  %2482 = vmatpush1.msra.mxu0 %v2427_v62  ;;  %v2658_v16 = vld [vmem:[#allocation14 + $0x568] sm:$0xff]  ;;  %v2544_v62 = vld [vmem:[#allocation14 + $0x450] sm:$0xff] }
 0xd6b   :  { %2374 = vmatprep.subr.mxu1 %v2313_v22  ;;  %2483 = vmatprep.subr.mxu0 %v2426_v44  ;;  %v2657_v22 = vld [vmem:[#allocation14 + $0x560] sm:$0xff]  ;;  %v2543_v44 = vld [vmem:[#allocation14 + $0x448] sm:$0xff] }
 0xd6c   :  { %2375 = vmatpush1.msra.mxu1 %v2312_v10  ;;  %2484 = vmatpush1.msra.mxu0 %v2425_v14  ;;  %v2542_v10 = vld [vmem:[#allocation14 + $0x440] sm:$0xff]  ;;  %v2655_v14 = vld [vmem:[#allocation14 + $0x550] sm:$0xff] }
 0xd6d   :  { %2409 = vmatmul.mubr.f32.vlgmr.msra.gmra.mxu1 %v2310_v40  ;;  %2485 = vmatprep.subr.mxu0 %v2424_v5  ;;  %v2654_v5 = vld [vmem:[#allocation14 + $0x548] sm:$0xff]  ;;  %v2652_v40 = vld [vmem:[#allocation14 + $0x538] sm:$0xff] }
 0xd6e   :  { %2566 = vmatprep.subr.mxu1 %v2565_v4  ;;  %2486 = vmatpush1.msra.mxu0 %v2423_v23  ;;  %v2540_v4 = vld [vmem:[#allocation14 + $0x430] sm:$0xff]  ;;  %v2653_v23 = vld [vmem:[#allocation14 + $0x540] sm:$0xff] }
 0xd6f   :  { %2519 = vmatprep.mubr.f32.mxu0 %v5743_v20  ;;  %2567 = vmatpush1.msra.mxu1 %v2564_v27  ;;  %v2538_v27 = vld [vmem:[#allocation14 + $0x420] sm:$0xff] }
 0xd70   :  { %2520 = vmatmul.mubr.f32.vlgmr.msra.gmra.mxu0 %v2421_v41  ;;  %2568 = vmatprep.subr.mxu1 %v2563_v30  ;;  %v2537_v30 = vld [vmem:[#allocation14 + $0x418] sm:$0xff]  ;;  %v2649_v41 = vld [vmem:[#allocation14 + $0x520] sm:$0xff] }
 0xd71   :  { %2677 = vmatprep.subr.mxu0 %v2676_v34  ;;  %2569 = vmatpush1.msra.mxu1 %v2562_v28  ;;  %v2650_v34 = vld [vmem:[#allocation14 + $0x528] sm:$0xff]  ;;  %v2536_v28 = vld [vmem:[#allocation14 + $0x410] sm:$0xff] }
 0xd72   :  { %2678 = vmatpush1.msra.mxu0 %v2675_v9  ;;  %2570 = vmatprep.subr.mxu1 %v2561_v43  ;;  %v2535_v9 = vld [vmem:[#allocation14 + $0x408] sm:$0xff]  ;;  %v2648_v43 = vld [vmem:[#allocation14 + $0x518] sm:$0xff] }
 0xd73   :  { %2679 = vmatprep.subr.mxu0 %v2674_v45  ;;  %2571 = vmatpush1.msra.mxu1 %v2560_v47  ;;  %v2534_v45 = vld [vmem:[#allocation14 + $0x400] sm:$0xff]  ;;  %v2647_v47 = vld [vmem:[#allocation14 + $0x510] sm:$0xff] }
 0xd74   :  { %2680 = vmatpush1.msra.mxu0 %v2673_v49  ;;  %2572 = vmatprep.subr.mxu1 %v2559_v61  ;;  %v2646_v49 = vld [vmem:[#allocation14 + $0x508] sm:$0xff]  ;;  %v2787_v61 = vld [vmem:[#allocation14 + $0x6f8] sm:$0xff] }
 0xd75   :  { %2681 = vmatprep.subr.mxu0 %v2672_v51  ;;  %2573 = vmatpush1.msra.mxu1 %v2558_v0  ;;  %v2645_v51 = vld [vmem:[#allocation14 + $0x500] sm:$0xff]  ;;  %v2786_v0 = vld [vmem:[#allocation14 + $0x6f0] sm:$0xff] }
 0xd76   :  { %2682 = vmatpush1.msra.mxu0 %v2671_v7  ;;  %2574 = vmatprep.subr.mxu1 %v2557_v52  ;;  %v2785_v7 = vld [vmem:[#allocation14 + $0x6e8] sm:$0xff]  ;;  %v2898_v52 = vld [vmem:[#allocation14 + $0x7f8] sm:$0xff] }
 0xd77   :  { %2683 = vmatprep.subr.mxu0 %v2670_v25  ;;  %2575 = vmatpush1.msra.mxu1 %v2556_v53  ;;  %v2784_v25 = vld [vmem:[#allocation14 + $0x6e0] sm:$0xff]  ;;  %v2897_v53 = vld [vmem:[#allocation14 + $0x7f0] sm:$0xff] }
 0xd78   :  { %2684 = vmatpush1.msra.mxu0 %v2669_v55  ;;  %2576 = vmatprep.subr.mxu1 %v2555_v59  ;;  %v2783_v55 = vld [vmem:[#allocation14 + $0x6d8] sm:$0xff]  ;;  %v2896_v59 = vld [vmem:[#allocation14 + $0x7e8] sm:$0xff] }
 0xd79   :  { %2685 = vmatprep.subr.mxu0 %v2668_v3  ;;  %2577 = vmatpush1.msra.mxu1 %v2554_v6  ;;  %v2782_v3 = vld [vmem:[#allocation14 + $0x6d0] sm:$0xff]  ;;  %v2895_v6 = vld [vmem:[#allocation14 + $0x7e0] sm:$0xff] }
 0xd7a   :  { %2686 = vmatpush1.msra.mxu0 %v2667_v11  ;;  %2578 = vmatprep.subr.mxu1 %v2553_v13  ;;  %v2894_v11 = vld [vmem:[#allocation14 + $0x7d8] sm:$0xff]  ;;  %v2780_v13 = vld [vmem:[#allocation14 + $0x6c0] sm:$0xff] }
 0xd7b   :  { %2687 = vmatprep.subr.mxu0 %v2666_v15  ;;  %2579 = vmatpush1.msra.mxu1 %v2552_v17  ;;  %v2893_v15 = vld [vmem:[#allocation14 + $0x7d0] sm:$0xff]  ;;  %v2779_v17 = vld [vmem:[#allocation14 + $0x6b8] sm:$0xff] }
 0xd7c   :  { %2688 = vmatpush1.msra.mxu0 %v2665_v19  ;;  %2580 = vmatprep.subr.mxu1 %v2551_v21  ;;  %v2892_v19 = vld [vmem:[#allocation14 + $0x7c8] sm:$0xff]  ;;  %v2778_v21 = vld [vmem:[#allocation14 + $0x6b0] sm:$0xff] }
 0xd7d   :  { %2689 = vmatprep.subr.mxu0 %v2664_v24  ;;  %2581 = vmatpush1.msra.mxu1 %v2550_v63  ;;  %v2777_v24 = vld [vmem:[#allocation14 + $0x6a8] sm:$0xff]  ;;  %v2890_v63 = vld [vmem:[#allocation14 + $0x7b8] sm:$0xff] }
 0xd7e   :  { %2690 = vmatpush1.msra.mxu0 %v2663_v26  ;;  %2582 = vmatprep.subr.mxu1 %v2549_v48  ;;  %v2776_v26 = vld [vmem:[#allocation14 + $0x6a0] sm:$0xff]  ;;  %v2889_v48 = vld [vmem:[#allocation14 + $0x7b0] sm:$0xff] }
 0xd7f   :  { %2691 = vmatprep.subr.mxu0 %v2662_v29  ;;  %2583 = vmatpush1.msra.mxu1 %v2548_v31  ;;  %v2775_v29 = vld [vmem:[#allocation14 + $0x698] sm:$0xff]  ;;  %v2888_v31 = vld [vmem:[#allocation14 + $0x7a8] sm:$0xff] }
 0xd80   :  { %2692 = vmatpush1.msra.mxu0 %v2661_v33  ;;  %2584 = vmatprep.subr.mxu1 %v2547_v35  ;;  %v2774_v33 = vld [vmem:[#allocation14 + $0x690] sm:$0xff]  ;;  %v2887_v35 = vld [vmem:[#allocation14 + $0x7a0] sm:$0xff] }
 0xd81   :  { %2693 = vmatprep.subr.mxu0 %v2660_v37  ;;  %2585 = vmatpush1.msra.mxu1 %v2546_v46  ;;  %v2773_v37 = vld [vmem:[#allocation14 + $0x688] sm:$0xff]  ;;  %v2886_v46 = vld [vmem:[#allocation14 + $0x798] sm:$0xff] }
 0xd82   :  { %2694 = vmatpush1.msra.mxu0 %v2659_v50  ;;  %2586 = vmatprep.subr.mxu1 %v2545_v58  ;;  %v2772_v50 = vld [vmem:[#allocation14 + $0x680] sm:$0xff]  ;;  %v2885_v58 = vld [vmem:[#allocation14 + $0x790] sm:$0xff] }
 0xd83   :  { %2695 = vmatprep.subr.mxu0 %v2658_v16  ;;  %2587 = vmatpush1.msra.mxu1 %v2544_v62  ;;  %v2771_v16 = vld [vmem:[#allocation14 + $0x678] sm:$0xff]  ;;  %v2884_v62 = vld [vmem:[#allocation14 + $0x788] sm:$0xff] }
 0xd84   :  { %2696 = vmatpush1.msra.mxu0 %v2657_v22  ;;  %2588 = vmatprep.subr.mxu1 %v2543_v44  ;;  %v2770_v22 = vld [vmem:[#allocation14 + $0x670] sm:$0xff]  ;;  %v2883_v44 = vld [vmem:[#allocation14 + $0x780] sm:$0xff] }
 0xd85   :  { %2697 = vmatprep.subr.mxu0 %v2656_v2  ;;  %2589 = vmatpush1.msra.mxu1 %v2542_v10  ;;  %v2769_v2 = vld [vmem:[#allocation14 + $0x668] sm:$0xff]  ;;  %v2882_v10 = vld [vmem:[#allocation14 + $0x778] sm:$0xff] }
 0xd86   :  { %2698 = vmatpush1.msra.mxu0 %v2655_v14  ;;  %2590 = vmatprep.subr.mxu1 %v2541_v36  ;;  %v2768_v14 = vld [vmem:[#allocation14 + $0x660] sm:$0xff]  ;;  %v2881_v36 = vld [vmem:[#allocation14 + $0x770] sm:$0xff] }
 0xd87   :  { %2699 = vmatprep.subr.mxu0 %v2654_v5  ;;  %2591 = vmatpush1.msra.mxu1 %v2540_v4  ;;  %v2767_v5 = vld [vmem:[#allocation14 + $0x658] sm:$0xff]  ;;  %v2880_v4 = vld [vmem:[#allocation14 + $0x768] sm:$0xff] }
 0xd88   :  { %2700 = vmatpush1.msra.mxu0 %v2653_v23  ;;  %2592 = vmatprep.subr.mxu1 %v2539_v12  ;;  %v2766_v23 = vld [vmem:[#allocation14 + $0x650] sm:$0xff]  ;;  %v2879_v12 = vld [vmem:[#allocation14 + $0x760] sm:$0xff] }
 0xd89   :  { %2701 = vmatprep.subr.mxu0 %v2652_v40  ;;  %2593 = vmatpush1.msra.mxu1 %v2538_v27  ;;  %v2765_v40 = vld [vmem:[#allocation14 + $0x648] sm:$0xff]  ;;  %v2878_v27 = vld [vmem:[#allocation14 + $0x758] sm:$0xff] }
 0xd8a   :  { %2702 = vmatpush1.msra.mxu0 %v2651_v38  ;;  %2594 = vmatprep.subr.mxu1 %v2537_v30  ;;  %v2764_v38 = vld [vmem:[#allocation14 + $0x640] sm:$0xff]  ;;  %v2877_v30 = vld [vmem:[#allocation14 + $0x750] sm:$0xff] }
 0xd8b   :  { %2703 = vmatprep.subr.mxu0 %v2650_v34  ;;  %2595 = vmatpush1.msra.mxu1 %v2536_v28  ;;  %v2763_v34 = vld [vmem:[#allocation14 + $0x638] sm:$0xff]  ;;  %v2876_v28 = vld [vmem:[#allocation14 + $0x748] sm:$0xff] }
 0xd8c   :  { %2704 = vmatpush1.msra.mxu0 %v2649_v41  ;;  %2596 = vmatprep.subr.mxu1 %v2535_v9  ;;  %v2762_v41 = vld [vmem:[#allocation14 + $0x630] sm:$0xff]  ;;  %v2875_v9 = vld [vmem:[#allocation14 + $0x740] sm:$0xff] }
 0xd8d   :  { %2705 = vmatprep.subr.mxu0 %v2648_v43  ;;  %2597 = vmatpush1.msra.mxu1 %v2534_v45  ;;  %v2761_v43 = vld [vmem:[#allocation14 + $0x628] sm:$0xff]  ;;  %v2874_v45 = vld [vmem:[#allocation14 + $0x738] sm:$0xff] }
 0xd8e   :  { %2630 = vmatprep.mubr.f32.mxu1 %v5743_v20  ;;  %2706 = vmatpush1.msra.mxu0 %v2647_v47  ;;  %v2760_v47 = vld [vmem:[#allocation14 + $0x620] sm:$0xff] }
 0xd8f   :  { %2631 = vmatmul.mubr.f32.vlgmr.msra.gmra.mxu1 %v5563_v39  ;;  %2707 = vmatprep.subr.mxu0 %v2646_v49  ;;  %v2781_v39 = vld [vmem:[#allocation14 + $0x6c8] sm:$0xff]  ;;  %v2873_v49 = vld [vmem:[#allocation14 + $0x730] sm:$0xff] }
 0xd90   :  { %2788 = vmatprep.subr.mxu1 %v2787_v61  ;;  %2708 = vmatpush1.msra.mxu0 %v2645_v51  ;;  %v2759_v61 = vld [vmem:[#allocation14 + $0x618] sm:$0xff]  ;;  %v2872_v51 = vld [vmem:[#allocation14 + $0x728] sm:$0xff] }
 0xd91   :  { %2741 = vmatprep.mubr.f32.mxu0 %v5743_v20  ;;  %2789 = vmatpush1.msra.mxu1 %v2786_v0  ;;  %v2758_v0 = vld [vmem:[#allocation14 + $0x610] sm:$0xff] }
 0xd92   :  { %2742 = vmatmul.mubr.f32.vlgmr.msra.gmra.mxu0 %v5566_v42  ;;  %2790 = vmatprep.subr.mxu1 %v2785_v7  ;;  %v2891_v42 = vld [vmem:[#allocation14 + $0x7c0] sm:$0xff] }
 0xd93   :  { %2899 = vmatprep.subr.mxu0 %v2898_v52  ;;  %2791 = vmatpush1.msra.mxu1 %v2784_v25  ;;  %v2871_v7 = vld [vmem:[#allocation14 + $0x720] sm:$0xff]  ;;  %v2757_v52 = vld [vmem:[#allocation14 + $0x608] sm:$0xff]  ;;  %v2870_v25 = vld [vmem:[#allocation14 + $0x718] sm:$0xff] }
 0xd94   :  { %2900 = vmatpush1.msra.mxu0 %v2897_v53  ;;  %2792 = vmatprep.subr.mxu1 %v2783_v55  ;;  %v2756_v53 = vld [vmem:[#allocation14 + $0x600] sm:$0xff]  ;;  %v2869_v55 = vld [vmem:[#allocation14 + $0x710] sm:$0xff] }
 0xd95   :  { %2901 = vmatprep.subr.mxu0 %v2896_v59  ;;  %2793 = vmatpush1.msra.mxu1 %v2782_v3  ;;  %v2868_v59 = vld [vmem:[#allocation14 + $0x708] sm:$0xff]  ;;  %v3008_v3 = vld [vmem:[#allocation14 + $0x8f8] sm:$0xff] }
 0xd96   :  { %2902 = vmatpush1.msra.mxu0 %v2895_v6  ;;  %2794 = vmatprep.subr.mxu1 %v2781_v39  ;;  %v2867_v6 = vld [vmem:[#allocation14 + $0x700] sm:$0xff]  ;;  %v3007_v39 = vld [vmem:[#allocation14 + $0x8f0] sm:$0xff] }
 0xd97   :  { %2903 = vmatprep.subr.mxu0 %v2894_v11  ;;  %2795 = vmatpush1.msra.mxu1 %v2780_v13  ;;  %v3006_v11 = vld [vmem:[#allocation14 + $0x8e8] sm:$0xff]  ;;  %v3118_v13 = vld [vmem:[#allocation14 + $0x9f8] sm:$0xff] }
 0xd98   :  { %2904 = vmatpush1.msra.mxu0 %v2893_v15  ;;  %2796 = vmatprep.subr.mxu1 %v2779_v17  ;;  %v3005_v15 = vld [vmem:[#allocation14 + $0x8e0] sm:$0xff]  ;;  %v3117_v17 = vld [vmem:[#allocation14 + $0x9f0] sm:$0xff] }
 0xd99   :  { %2905 = vmatprep.subr.mxu0 %v2892_v19  ;;  %2797 = vmatpush1.msra.mxu1 %v2778_v21  ;;  %v3004_v19 = vld [vmem:[#allocation14 + $0x8d8] sm:$0xff]  ;;  %v3116_v21 = vld [vmem:[#allocation14 + $0x9e8] sm:$0xff] }
 0xd9a   :  { %2906 = vmatpush1.msra.mxu0 %v2891_v42  ;;  %2798 = vmatprep.subr.mxu1 %v2777_v24  ;;  %v3003_v42 = vld [vmem:[#allocation14 + $0x8d0] sm:$0xff]  ;;  %v3115_v24 = vld [vmem:[#allocation14 + $0x9e0] sm:$0xff] }
 0xd9b   :  { %2907 = vmatprep.subr.mxu0 %v2890_v63  ;;  %2799 = vmatpush1.msra.mxu1 %v2776_v26  ;;  %v3114_v63 = vld [vmem:[#allocation14 + $0x9d8] sm:$0xff]  ;;  %v3001_v26 = vld [vmem:[#allocation14 + $0x8c0] sm:$0xff] }
 0xd9c   :  { %2908 = vmatpush1.msra.mxu0 %v2889_v48  ;;  %2800 = vmatprep.subr.mxu1 %v2775_v29  ;;  %v3113_v48 = vld [vmem:[#allocation14 + $0x9d0] sm:$0xff]  ;;  %v3000_v29 = vld [vmem:[#allocation14 + $0x8b8] sm:$0xff] }
 0xd9d   :  { %2909 = vmatprep.subr.mxu0 %v2888_v31  ;;  %2801 = vmatpush1.msra.mxu1 %v2774_v33  ;;  %v3112_v31 = vld [vmem:[#allocation14 + $0x9c8] sm:$0xff]  ;;  %v2999_v33 = vld [vmem:[#allocation14 + $0x8b0] sm:$0xff] }
 0xd9e   :  { %2910 = vmatpush1.msra.mxu0 %v2887_v35  ;;  %2802 = vmatprep.subr.mxu1 %v2773_v37  ;;  %v2998_v35 = vld [vmem:[#allocation14 + $0x8a8] sm:$0xff]  ;;  %v3110_v37 = vld [vmem:[#allocation14 + $0x9b8] sm:$0xff] }
 0xd9f   :  { %2911 = vmatprep.subr.mxu0 %v2886_v46  ;;  %2803 = vmatpush1.msra.mxu1 %v2772_v50  ;;  %v2997_v46 = vld [vmem:[#allocation14 + $0x8a0] sm:$0xff]  ;;  %v3109_v50 = vld [vmem:[#allocation14 + $0x9b0] sm:$0xff] }
 0xda0   :  { %2912 = vmatpush1.msra.mxu0 %v2885_v58  ;;  %2804 = vmatprep.subr.mxu1 %v2771_v16  ;;  %v2996_v58 = vld [vmem:[#allocation14 + $0x898] sm:$0xff]  ;;  %v3108_v16 = vld [vmem:[#allocation14 + $0x9a8] sm:$0xff] }
 0xda1   :  { %2913 = vmatprep.subr.mxu0 %v2884_v62  ;;  %2805 = vmatpush1.msra.mxu1 %v2770_v22  ;;  %v2995_v62 = vld [vmem:[#allocation14 + $0x890] sm:$0xff]  ;;  %v3107_v22 = vld [vmem:[#allocation14 + $0x9a0] sm:$0xff] }
 0xda2   :  { %2914 = vmatpush1.msra.mxu0 %v2883_v44  ;;  %2806 = vmatprep.subr.mxu1 %v2769_v2  ;;  %v2994_v44 = vld [vmem:[#allocation14 + $0x888] sm:$0xff]  ;;  %v3106_v2 = vld [vmem:[#allocation14 + $0x998] sm:$0xff] }
 0xda3   :  { %2915 = vmatprep.subr.mxu0 %v2882_v10  ;;  %2807 = vmatpush1.msra.mxu1 %v2768_v14  ;;  %v2993_v10 = vld [vmem:[#allocation14 + $0x880] sm:$0xff]  ;;  %v3105_v14 = vld [vmem:[#allocation14 + $0x990] sm:$0xff] }
 0xda4   :  { %2916 = vmatpush1.msra.mxu0 %v2881_v36  ;;  %2808 = vmatprep.subr.mxu1 %v2767_v5  ;;  %v2992_v36 = vld [vmem:[#allocation14 + $0x878] sm:$0xff]  ;;  %v3104_v5 = vld [vmem:[#allocation14 + $0x988] sm:$0xff] }
 0xda5   :  { %2917 = vmatprep.subr.mxu0 %v2880_v4  ;;  %2809 = vmatpush1.msra.mxu1 %v2766_v23  ;;  %v2991_v4 = vld [vmem:[#allocation14 + $0x870] sm:$0xff]  ;;  %v3103_v23 = vld [vmem:[#allocation14 + $0x980] sm:$0xff] }
 0xda6   :  { %2918 = vmatpush1.msra.mxu0 %v2879_v12  ;;  %2810 = vmatprep.subr.mxu1 %v2765_v40  ;;  %v2990_v12 = vld [vmem:[#allocation14 + $0x868] sm:$0xff]  ;;  %v3102_v40 = vld [vmem:[#allocation14 + $0x978] sm:$0xff] }
 0xda7   :  { %2919 = vmatprep.subr.mxu0 %v2878_v27  ;;  %2811 = vmatpush1.msra.mxu1 %v2764_v38  ;;  %v2989_v27 = vld [vmem:[#allocation14 + $0x860] sm:$0xff]  ;;  %v3101_v38 = vld [vmem:[#allocation14 + $0x970] sm:$0xff] }
 0xda8   :  { %2920 = vmatpush1.msra.mxu0 %v2877_v30  ;;  %2812 = vmatprep.subr.mxu1 %v2763_v34  ;;  %v2988_v30 = vld [vmem:[#allocation14 + $0x858] sm:$0xff]  ;;  %v3100_v34 = vld [vmem:[#allocation14 + $0x968] sm:$0xff] }
 0xda9   :  { %2921 = vmatprep.subr.mxu0 %v2876_v28  ;;  %2813 = vmatpush1.msra.mxu1 %v2762_v41  ;;  %v2987_v28 = vld [vmem:[#allocation14 + $0x850] sm:$0xff]  ;;  %v3099_v41 = vld [vmem:[#allocation14 + $0x960] sm:$0xff] }
 0xdaa   :  { %2922 = vmatpush1.msra.mxu0 %v2875_v9  ;;  %2814 = vmatprep.subr.mxu1 %v2761_v43  ;;  %v2986_v9 = vld [vmem:[#allocation14 + $0x848] sm:$0xff]  ;;  %v3098_v43 = vld [vmem:[#allocation14 + $0x958] sm:$0xff] }
 0xdab   :  { %2923 = vmatprep.subr.mxu0 %v2874_v45  ;;  %2815 = vmatpush1.msra.mxu1 %v2760_v47  ;;  %v2985_v45 = vld [vmem:[#allocation14 + $0x840] sm:$0xff]  ;;  %v3097_v47 = vld [vmem:[#allocation14 + $0x950] sm:$0xff] }
 0xdac   :  { %2924 = vmatpush1.msra.mxu0 %v2873_v49  ;;  %2816 = vmatprep.subr.mxu1 %v2759_v61  ;;  %v2984_v49 = vld [vmem:[#allocation14 + $0x838] sm:$0xff]  ;;  %v3096_v61 = vld [vmem:[#allocation14 + $0x948] sm:$0xff] }
 0xdad   :  { %2925 = vmatprep.subr.mxu0 %v2872_v51  ;;  %2817 = vmatpush1.msra.mxu1 %v2758_v0  ;;  %v2983_v51 = vld [vmem:[#allocation14 + $0x830] sm:$0xff]  ;;  %v3095_v0 = vld [vmem:[#allocation14 + $0x940] sm:$0xff] }
 0xdae   :  { %2926 = vmatpush1.msra.mxu0 %v2871_v7  ;;  %2818 = vmatprep.subr.mxu1 %v2757_v52  ;;  %v2982_v7 = vld [vmem:[#allocation14 + $0x828] sm:$0xff]  ;;  %v3094_v52 = vld [vmem:[#allocation14 + $0x938] sm:$0xff] }
 0xdaf   :  { %2927 = vmatprep.subr.mxu0 %v2870_v25  ;;  %2819 = vmatpush1.msra.mxu1 %v2756_v53  ;;  %v2981_v25 = vld [vmem:[#allocation14 + $0x820] sm:$0xff]  ;;  %v3093_v53 = vld [vmem:[#allocation14 + $0x930] sm:$0xff] }
 0xdb0   :  { %2852 = vmatprep.mubr.f32.mxu1 %v5743_v20  ;;  %2928 = vmatpush1.msra.mxu0 %v2869_v55  ;;  %v2980_v55 = vld [vmem:[#allocation14 + $0x818] sm:$0xff] }
 0xdb1   :  { %2853 = vmatmul.mubr.f32.vlgmr.msra.gmra.mxu1 %v5569_v8  ;;  %2929 = vmatprep.subr.mxu0 %v2868_v59  ;;  %v3002_v8 = vld [vmem:[#allocation14 + $0x8c8] sm:$0xff] }
 0xdb2   :  { %3009 = vmatprep.subr.mxu1 %v3008_v3  ;;  %2930 = vmatpush1.msra.mxu0 %v2867_v6  ;;  %v3092_v59 = vld [vmem:[#allocation14 + $0x928] sm:$0xff]  ;;  %v2979_v3 = vld [vmem:[#allocation14 + $0x810] sm:$0xff]  ;;  %v3091_v6 = vld [vmem:[#allocation14 + $0x920] sm:$0xff] }
 0xdb3   :  { %2963 = vmatprep.mubr.f32.mxu0 %v5743_v20  ;;  %3010 = vmatpush1.msra.mxu1 %v3007_v39  ;;  %v2978_v39 = vld [vmem:[#allocation14 + $0x808] sm:$0xff] }
 0xdb4   :  { %2964 = vmatmul.mubr.f32.vlgmr.msra.gmra.mxu0 %v5572_v54  ;;  %3011 = vmatprep.subr.mxu1 %v3006_v11  ;;  %v3111_v54 = vld [vmem:[#allocation14 + $0x9c0] sm:$0xff]  ;;  %v3090_v11 = vld [vmem:[#allocation14 + $0x918] sm:$0xff] }
 0xdb5   :  { %3119 = vmatprep.subr.mxu0 %v3118_v13  ;;  %3012 = vmatpush1.msra.mxu1 %v3005_v15  ;;  %v2977_v13 = vld [vmem:[#allocation14 + $0x800] sm:$0xff]  ;;  %v2973_v15 = vrot.slane %v5555_v1, 7 }
 0xdb6   :  { %3120 = vmatpush1.msra.mxu0 %v3117_v17  ;;  %3013 = vmatprep.subr.mxu1 %v3004_v19  ;;  %v3089_v17 = vld [vmem:[#allocation14 + $0x910] sm:$0xff]  ;;  %v3088_v19 = vld [vmem:[#allocation14 + $0x908] sm:$0xff] }
 0xdb7   :  { %3121 = vmatprep.subr.mxu0 %v3116_v21  ;;  %3014 = vmatpush1.msra.mxu1 %v3003_v42  ;;  %v3229_v21 = vld [vmem:[#allocation14 + $0xaf8] sm:$0xff]  ;;  %v3087_v42 = vld [vmem:[#allocation14 + $0x900] sm:$0xff] }
 0xdb8   :  { %3122 = vmatpush1.msra.mxu0 %v3115_v24  ;;  %3015 = vmatprep.subr.mxu1 %v3002_v8  ;;  %v2975_v24 = vsel %vm2093_vm7, %v5545_v57, %v2973_v15  ;;  %v3228_v8 = vld [vmem:[#allocation14 + $0xaf0] sm:$0xff]  ;;  %v3203_v15 = vld [vmem:[#allocation14 + $0xa28] sm:$0xff] }
 0xdb9   :  { %3123 = vmatprep.subr.mxu0 %v3114_v63  ;;  %3016 = vmatpush1.msra.mxu1 %v3001_v26  ;;  %v3083_v63 = vrot.slane %v5545_v57, 1  ;;  %v3227_v26 = vld [vmem:[#allocation14 + $0xae8] sm:$0xff] }
 0xdba   :  { %3124 = vmatpush1.msra.mxu0 %v3113_v48  ;;  %3017 = vmatprep.subr.mxu1 %v3000_v29  ;;  %v3340_v48 = vld [vmem:[#allocation14 + $0xbf8] sm:$0xff]  ;;  %v3226_v29 = vld [vmem:[#allocation14 + $0xae0] sm:$0xff] }
 0xdbb   :  { %3125 = vmatprep.subr.mxu0 %v3112_v31  ;;  %3018 = vmatpush1.msra.mxu1 %v2999_v33  ;;  %v3085_v31 = vsel %vm2093_vm7, %v3083_v63, %v5555_v1  ;;  %v3339_v33 = vld [vmem:[#allocation14 + $0xbf0] sm:$0xff]  ;;  %v3313_v63 = vld [vmem:[#allocation14 + $0xb20] sm:$0xff] }
 0xdbc   :  { %3126 = vmatpush1.msra.mxu0 %v3111_v54  ;;  %3019 = vmatprep.subr.mxu1 %v2998_v35  ;;  %v3225_v54 = vld [vmem:[#allocation14 + $0xad8] sm:$0xff]  ;;  %v3338_v35 = vld [vmem:[#allocation14 + $0xbe8] sm:$0xff] }
 0xdbd   :  { %3127 = vmatprep.subr.mxu0 %v3110_v37  ;;  %3020 = vmatpush1.msra.mxu1 %v2997_v46  ;;  %v3224_v37 = vld [vmem:[#allocation14 + $0xad0] sm:$0xff]  ;;  %v3337_v46 = vld [vmem:[#allocation14 + $0xbe0] sm:$0xff] }
 0xdbe   :  { %3128 = vmatpush1.msra.mxu0 %v3109_v50  ;;  %3021 = vmatprep.subr.mxu1 %v2996_v58  ;;  %v3223_v50 = vld [vmem:[#allocation14 + $0xac8] sm:$0xff]  ;;  %v3336_v58 = vld [vmem:[#allocation14 + $0xbd8] sm:$0xff] }
 0xdbf   :  { %3129 = vmatprep.subr.mxu0 %v3108_v16  ;;  %3022 = vmatpush1.msra.mxu1 %v2995_v62  ;;  %v3222_v16 = vld [vmem:[#allocation14 + $0xac0] sm:$0xff]  ;;  %v3335_v62 = vld [vmem:[#allocation14 + $0xbd0] sm:$0xff] }
 0xdc0   :  { %3130 = vmatpush1.msra.mxu0 %v3107_v22  ;;  %3023 = vmatprep.subr.mxu1 %v2994_v44  ;;  %v3221_v22 = vld [vmem:[#allocation14 + $0xab8] sm:$0xff]  ;;  %v3334_v44 = vld [vmem:[#allocation14 + $0xbc8] sm:$0xff] }
 0xdc1   :  { %3131 = vmatprep.subr.mxu0 %v3106_v2  ;;  %3024 = vmatpush1.msra.mxu1 %v2993_v10  ;;  %v3220_v2 = vld [vmem:[#allocation14 + $0xab0] sm:$0xff]  ;;  %v3333_v10 = vld [vmem:[#allocation14 + $0xbc0] sm:$0xff] }
 0xdc2   :  { %3132 = vmatpush1.msra.mxu0 %v3105_v14  ;;  %3025 = vmatprep.subr.mxu1 %v2992_v36  ;;  %v3219_v14 = vld [vmem:[#allocation14 + $0xaa8] sm:$0xff]  ;;  %v3332_v36 = vld [vmem:[#allocation14 + $0xbb8] sm:$0xff] }
 0xdc3   :  { %3133 = vmatprep.subr.mxu0 %v3104_v5  ;;  %3026 = vmatpush1.msra.mxu1 %v2991_v4  ;;  %v3218_v5 = vld [vmem:[#allocation14 + $0xaa0] sm:$0xff]  ;;  %v3331_v4 = vld [vmem:[#allocation14 + $0xbb0] sm:$0xff] }
 0xdc4   :  { %3134 = vmatpush1.msra.mxu0 %v3103_v23  ;;  %3027 = vmatprep.subr.mxu1 %v2990_v12  ;;  %v3217_v23 = vld [vmem:[#allocation14 + $0xa98] sm:$0xff]  ;;  %v3330_v12 = vld [vmem:[#allocation14 + $0xba8] sm:$0xff] }
 0xdc5   :  { %3135 = vmatprep.subr.mxu0 %v3102_v40  ;;  %3028 = vmatpush1.msra.mxu1 %v2989_v27  ;;  %v3216_v40 = vld [vmem:[#allocation14 + $0xa90] sm:$0xff]  ;;  %v3329_v27 = vld [vmem:[#allocation14 + $0xba0] sm:$0xff] }
 0xdc6   :  { %3136 = vmatpush1.msra.mxu0 %v3101_v38  ;;  %3029 = vmatprep.subr.mxu1 %v2988_v30  ;;  %v3215_v38 = vld [vmem:[#allocation14 + $0xa88] sm:$0xff]  ;;  %v3328_v30 = vld [vmem:[#allocation14 + $0xb98] sm:$0xff] }
 0xdc7   :  { %3137 = vmatprep.subr.mxu0 %v3100_v34  ;;  %3030 = vmatpush1.msra.mxu1 %v2987_v28  ;;  %v3214_v34 = vld [vmem:[#allocation14 + $0xa80] sm:$0xff]  ;;  %v3327_v28 = vld [vmem:[#allocation14 + $0xb90] sm:$0xff] }
 0xdc8   :  { %3138 = vmatpush1.msra.mxu0 %v3099_v41  ;;  %3031 = vmatprep.subr.mxu1 %v2986_v9  ;;  %v3213_v41 = vld [vmem:[#allocation14 + $0xa78] sm:$0xff]  ;;  %v3326_v9 = vld [vmem:[#allocation14 + $0xb88] sm:$0xff] }
 0xdc9   :  { %3139 = vmatprep.subr.mxu0 %v3098_v43  ;;  %3032 = vmatpush1.msra.mxu1 %v2985_v45  ;;  %v3212_v43 = vld [vmem:[#allocation14 + $0xa70] sm:$0xff]  ;;  %v3325_v45 = vld [vmem:[#allocation14 + $0xb80] sm:$0xff] }
 0xdca   :  { %3140 = vmatpush1.msra.mxu0 %v3097_v47  ;;  %3033 = vmatprep.subr.mxu1 %v2984_v49  ;;  %v3211_v47 = vld [vmem:[#allocation14 + $0xa68] sm:$0xff]  ;;  %v3324_v49 = vld [vmem:[#allocation14 + $0xb78] sm:$0xff] }
 0xdcb   :  { %3141 = vmatprep.subr.mxu0 %v3096_v61  ;;  %3034 = vmatpush1.msra.mxu1 %v2983_v51  ;;  %v3210_v61 = vld [vmem:[#allocation14 + $0xa60] sm:$0xff]  ;;  %v3323_v51 = vld [vmem:[#allocation14 + $0xb70] sm:$0xff] }
 0xdcc   :  { %3142 = vmatpush1.msra.mxu0 %v3095_v0  ;;  %3035 = vmatprep.subr.mxu1 %v2982_v7  ;;  %v3209_v0 = vld [vmem:[#allocation14 + $0xa58] sm:$0xff]  ;;  %v3322_v7 = vld [vmem:[#allocation14 + $0xb68] sm:$0xff] }
 0xdcd   :  { %3143 = vmatprep.subr.mxu0 %v3094_v52  ;;  %3036 = vmatpush1.msra.mxu1 %v2981_v25  ;;  %v3208_v52 = vld [vmem:[#allocation14 + $0xa50] sm:$0xff]  ;;  %v3321_v25 = vld [vmem:[#allocation14 + $0xb60] sm:$0xff] }
 0xdce   :  { %3144 = vmatpush1.msra.mxu0 %v3093_v53  ;;  %3037 = vmatprep.subr.mxu1 %v2980_v55  ;;  %v3207_v53 = vld [vmem:[#allocation14 + $0xa48] sm:$0xff]  ;;  %v3320_v55 = vld [vmem:[#allocation14 + $0xb58] sm:$0xff] }
 0xdcf   :  { %3145 = vmatprep.subr.mxu0 %v3092_v59  ;;  %3038 = vmatpush1.msra.mxu1 %v2979_v3  ;;  %v3206_v59 = vld [vmem:[#allocation14 + $0xa40] sm:$0xff]  ;;  %v3319_v3 = vld [vmem:[#allocation14 + $0xb50] sm:$0xff] }
 0xdd0   :  { %3146 = vmatpush1.msra.mxu0 %v3091_v6  ;;  %3039 = vmatprep.subr.mxu1 %v2978_v39  ;;  %v3205_v6 = vld [vmem:[#allocation14 + $0xa38] sm:$0xff]  ;;  %v3318_v39 = vld [vmem:[#allocation14 + $0xb48] sm:$0xff] }
 0xdd1   :  { %3147 = vmatprep.subr.mxu0 %v3090_v11  ;;  %3040 = vmatpush1.msra.mxu1 %v2977_v13  ;;  %v3204_v11 = vld [vmem:[#allocation14 + $0xa30] sm:$0xff]  ;;  %v3317_v13 = vld [vmem:[#allocation14 + $0xb40] sm:$0xff] }
 0xdd2   :  { %3073 = vmatprep.mubr.f32.mxu1 %v5743_v20  ;;  %3148 = vmatpush1.msra.mxu0 %v3089_v17  ;;  %v3316_v17 = vld [vmem:[#allocation14 + $0xb38] sm:$0xff] }
 0xdd3   :  { %3074 = vmatmul.mubr.f32.vlgmr.msra.gmra.mxu1 %v2975_v24  ;;  %3149 = vmatprep.subr.mxu0 %v3088_v19  ;;  %v3202_v19 = vld [vmem:[#allocation14 + $0xa20] sm:$0xff]  ;;  %v3314_v24 = vld [vmem:[#allocation14 + $0xb28] sm:$0xff] }
 0xdd4   :  { %3230 = vmatprep.subr.mxu1 %v3229_v21  ;;  %3150 = vmatpush1.msra.mxu0 %v3087_v42  ;;  %v3315_v21 = vld [vmem:[#allocation14 + $0xb30] sm:$0xff]  ;;  %v3201_v42 = vld [vmem:[#allocation14 + $0xa18] sm:$0xff] }
 0xdd5   :  { %3183 = vmatprep.mubr.f32.mxu0 %v5743_v20  ;;  %3231 = vmatpush1.msra.mxu1 %v3228_v8  ;;  %v3200_v8 = vld [vmem:[#allocation14 + $0xa10] sm:$0xff] }
 0xdd6   :  { %3184 = vmatmul.mubr.f32.vlgmr.msra.gmra.mxu0 %v3085_v31  ;;  %3232 = vmatprep.subr.mxu1 %v3227_v26  ;;  %v3199_v26 = vld [vmem:[#allocation14 + $0xa08] sm:$0xff]  ;;  %v3194_v31 = vrot.slane %v5555_v1, 1 }
 0xdd7   :  { %3341 = vmatprep.subr.mxu0 %v3340_v48  ;;  %3233 = vmatpush1.msra.mxu1 %v3226_v29  ;;  %v3312_v48 = vld [vmem:[#allocation14 + $0xb18] sm:$0xff]  ;;  %v3198_v29 = vld [vmem:[#allocation14 + $0xa00] sm:$0xff] }
 0xdd8   :  { %3342 = vmatpush1.msra.mxu0 %v3339_v33  ;;  %3234 = vmatprep.subr.mxu1 %v3225_v54  ;;  %v3311_v33 = vld [vmem:[#allocation14 + $0xb10] sm:$0xff]  ;;  %v3192_v54 = vrot.slane %v5545_v57, 2 }
 0xdd9   :  { %3343 = vmatprep.subr.mxu0 %v3338_v35  ;;  %3235 = vmatpush1.msra.mxu1 %v3224_v37  ;;  %v3310_v35 = vld [vmem:[#allocation14 + $0xb08] sm:$0xff]  ;;  %v3451_v37 = vld [vmem:[#allocation14 + $0xcf8] sm:$0xff] }
 0xdda   :  { %3344 = vmatpush1.msra.mxu0 %v3337_v46  ;;  %3236 = vmatprep.subr.mxu1 %v3223_v50  ;;  %v3309_v46 = vld [vmem:[#allocation14 + $0xb00] sm:$0xff]  ;;  %v3305_v50 = vrot.slane %v5555_v1, 2 }
 0xddb   :  { %3345 = vmatprep.subr.mxu0 %v3336_v58  ;;  %3237 = vmatpush1.msra.mxu1 %v3222_v16  ;;  %v3196_v58 = vsel %vm2093_vm7, %v3192_v54, %v3194_v31  ;;  %v3450_v16 = vld [vmem:[#allocation14 + $0xcf0] sm:$0xff]  ;;  %v3425_v31 = vld [vmem:[#allocation14 + $0xc28] sm:$0xff]  ;;  %v3424_v54 = vld [vmem:[#allocation14 + $0xc20] sm:$0xff] }
 0xddc   :  { %3346 = vmatpush1.msra.mxu0 %v3335_v62  ;;  %3238 = vmatprep.subr.mxu1 %v3221_v22  ;;  %v3303_v62 = vrot.slane %v5545_v57, 3  ;;  %v3449_v22 = vld [vmem:[#allocation14 + $0xce8] sm:$0xff] }
 0xddd   :  { %3347 = vmatprep.subr.mxu0 %v3334_v44  ;;  %3239 = vmatpush1.msra.mxu1 %v3220_v2  ;;  %v3562_v44 = vld [vmem:[#allocation14 + $0xdf8] sm:$0xff]  ;;  %v3448_v2 = vld [vmem:[#allocation14 + $0xce0] sm:$0xff]  ;;  %v3445_v57 = vld [vmem:[#allocation14 + $0xcc8] sm:$0xff] }
 0xdde   :  { %3348 = vmatpush1.msra.mxu0 %v3333_v10  ;;  %3240 = vmatprep.subr.mxu1 %v3219_v14  ;;  %v3307_v1 = vsel %vm2093_vm7, %v3303_v62, %v3305_v50  ;;  %v3561_v10 = vld [vmem:[#allocation14 + $0xdf0] sm:$0xff]  ;;  %v3447_v14 = vld [vmem:[#allocation14 + $0xcd8] sm:$0xff] }
 0xddf   :  { %3349 = vmatprep.subr.mxu0 %v3332_v36  ;;  %3241 = vmatpush1.msra.mxu1 %v3218_v5  ;;  %v3560_v36 = vld [vmem:[#allocation14 + $0xde8] sm:$0xff]  ;;  %v3446_v5 = vld [vmem:[#allocation14 + $0xcd0] sm:$0xff]  ;;  %v3534_v62 = vld [vmem:[#allocation14 + $0xd18] sm:$0xff] }
 0xde0   :  { %3350 = vmatpush1.msra.mxu0 %v3331_v4  ;;  %3242 = vmatprep.subr.mxu1 %v3217_v23  ;;  %v3559_v4 = vld [vmem:[#allocation14 + $0xde0] sm:$0xff]  ;;  %v3558_v23 = vld [vmem:[#allocation14 + $0xdd8] sm:$0xff]  ;;  %v3422_v50 = vld [vmem:[#allocation14 + $0xc10] sm:$0xff] }
 0xde1   :  { %3351 = vmatprep.subr.mxu0 %v3330_v12  ;;  %3243 = vmatpush1.msra.mxu1 %v3216_v40  ;;  %v3444_v12 = vld [vmem:[#allocation14 + $0xcc0] sm:$0xff]  ;;  %v3557_v40 = vld [vmem:[#allocation14 + $0xdd0] sm:$0xff] }
 0xde2   :  { %3352 = vmatpush1.msra.mxu0 %v3329_v27  ;;  %3244 = vmatprep.subr.mxu1 %v3215_v38  ;;  %v3443_v27 = vld [vmem:[#allocation14 + $0xcb8] sm:$0xff]  ;;  %v3556_v38 = vld [vmem:[#allocation14 + $0xdc8] sm:$0xff] }
 0xde3   :  { %3353 = vmatprep.subr.mxu0 %v3328_v30  ;;  %3245 = vmatpush1.msra.mxu1 %v3214_v34  ;;  %v3442_v30 = vld [vmem:[#allocation14 + $0xcb0] sm:$0xff]  ;;  %v3555_v34 = vld [vmem:[#allocation14 + $0xdc0] sm:$0xff] }
 0xde4   :  { %3354 = vmatpush1.msra.mxu0 %v3327_v28  ;;  %3246 = vmatprep.subr.mxu1 %v3213_v41  ;;  %v3441_v28 = vld [vmem:[#allocation14 + $0xca8] sm:$0xff]  ;;  %v3554_v41 = vld [vmem:[#allocation14 + $0xdb8] sm:$0xff] }
 0xde5   :  { %3355 = vmatprep.subr.mxu0 %v3326_v9  ;;  %3247 = vmatpush1.msra.mxu1 %v3212_v43  ;;  %v3440_v9 = vld [vmem:[#allocation14 + $0xca0] sm:$0xff]  ;;  %v3553_v43 = vld [vmem:[#allocation14 + $0xdb0] sm:$0xff] }
 0xde6   :  { %3356 = vmatpush1.msra.mxu0 %v3325_v45  ;;  %3248 = vmatprep.subr.mxu1 %v3211_v47  ;;  %v3439_v45 = vld [vmem:[#allocation14 + $0xc98] sm:$0xff]  ;;  %v3552_v47 = vld [vmem:[#allocation14 + $0xda8] sm:$0xff] }
 0xde7   :  { %3357 = vmatprep.subr.mxu0 %v3324_v49  ;;  %3249 = vmatpush1.msra.mxu1 %v3210_v61  ;;  %v3438_v49 = vld [vmem:[#allocation14 + $0xc90] sm:$0xff]  ;;  %v3551_v61 = vld [vmem:[#allocation14 + $0xda0] sm:$0xff] }
 0xde8   :  { %3358 = vmatpush1.msra.mxu0 %v3323_v51  ;;  %3250 = vmatprep.subr.mxu1 %v3209_v0  ;;  %v3437_v51 = vld [vmem:[#allocation14 + $0xc88] sm:$0xff]  ;;  %v3550_v0 = vld [vmem:[#allocation14 + $0xd98] sm:$0xff] }
 0xde9   :  { %3359 = vmatprep.subr.mxu0 %v3322_v7  ;;  %3251 = vmatpush1.msra.mxu1 %v3208_v52  ;;  %v3436_v7 = vld [vmem:[#allocation14 + $0xc80] sm:$0xff]  ;;  %v3549_v52 = vld [vmem:[#allocation14 + $0xd90] sm:$0xff] }
 0xdea   :  { %3360 = vmatpush1.msra.mxu0 %v3321_v25  ;;  %3252 = vmatprep.subr.mxu1 %v3207_v53  ;;  %v3435_v25 = vld [vmem:[#allocation14 + $0xc78] sm:$0xff]  ;;  %v3548_v53 = vld [vmem:[#allocation14 + $0xd88] sm:$0xff] }
 0xdeb   :  { %3361 = vmatprep.subr.mxu0 %v3320_v55  ;;  %3253 = vmatpush1.msra.mxu1 %v3206_v59  ;;  %v3434_v55 = vld [vmem:[#allocation14 + $0xc70] sm:$0xff]  ;;  %v3547_v59 = vld [vmem:[#allocation14 + $0xd80] sm:$0xff] }
 0xdec   :  { %3362 = vmatpush1.msra.mxu0 %v3319_v3  ;;  %3254 = vmatprep.subr.mxu1 %v3205_v6  ;;  %v3433_v3 = vld [vmem:[#allocation14 + $0xc68] sm:$0xff]  ;;  %v3546_v6 = vld [vmem:[#allocation14 + $0xd78] sm:$0xff] }
 0xded   :  { %3363 = vmatprep.subr.mxu0 %v3318_v39  ;;  %3255 = vmatpush1.msra.mxu1 %v3204_v11  ;;  %v3432_v39 = vld [vmem:[#allocation14 + $0xc60] sm:$0xff]  ;;  %v3545_v11 = vld [vmem:[#allocation14 + $0xd70] sm:$0xff] }
 0xdee   :  { %3364 = vmatpush1.msra.mxu0 %v3317_v13  ;;  %3256 = vmatprep.subr.mxu1 %v3203_v15  ;;  %v3431_v13 = vld [vmem:[#allocation14 + $0xc58] sm:$0xff]  ;;  %v3544_v15 = vld [vmem:[#allocation14 + $0xd68] sm:$0xff] }
 0xdef   :  { %3365 = vmatprep.subr.mxu0 %v3316_v17  ;;  %3257 = vmatpush1.msra.mxu1 %v3202_v19  ;;  %v3430_v17 = vld [vmem:[#allocation14 + $0xc50] sm:$0xff]  ;;  %v3543_v19 = vld [vmem:[#allocation14 + $0xd60] sm:$0xff] }
 0xdf0   :  { %3366 = vmatpush1.msra.mxu0 %v3315_v21  ;;  %3258 = vmatprep.subr.mxu1 %v3201_v42  ;;  %v3429_v21 = vld [vmem:[#allocation14 + $0xc48] sm:$0xff]  ;;  %v3542_v42 = vld [vmem:[#allocation14 + $0xd58] sm:$0xff] }
 0xdf1   :  { %3367 = vmatprep.subr.mxu0 %v3314_v24  ;;  %3259 = vmatpush1.msra.mxu1 %v3200_v8  ;;  %v3428_v24 = vld [vmem:[#allocation14 + $0xc40] sm:$0xff]  ;;  %v3541_v8 = vld [vmem:[#allocation14 + $0xd50] sm:$0xff] }
 0xdf2   :  { %3368 = vmatpush1.msra.mxu0 %v3313_v63  ;;  %3260 = vmatprep.subr.mxu1 %v3199_v26  ;;  %v3427_v63 = vld [vmem:[#allocation14 + $0xc38] sm:$0xff]  ;;  %v3540_v26 = vld [vmem:[#allocation14 + $0xd48] sm:$0xff] }
 0xdf3   :  { %3369 = vmatprep.subr.mxu0 %v3312_v48  ;;  %3261 = vmatpush1.msra.mxu1 %v3198_v29  ;;  %v3426_v48 = vld [vmem:[#allocation14 + $0xc30] sm:$0xff]  ;;  %v3539_v29 = vld [vmem:[#allocation14 + $0xd40] sm:$0xff] }
 0xdf4   :  { %3294 = vmatprep.mubr.f32.mxu1 %v5743_v20  ;;  %3370 = vmatpush1.msra.mxu0 %v3311_v33  ;;  %v3538_v33 = vld [vmem:[#allocation14 + $0xd38] sm:$0xff] }
 0xdf5   :  { %3295 = vmatmul.mubr.f32.vlgmr.msra.gmra.mxu1 %v3196_v58  ;;  %3371 = vmatprep.subr.mxu0 %v3310_v35  ;;  %v3537_v35 = vld [vmem:[#allocation14 + $0xd30] sm:$0xff]  ;;  %v3535_v58 = vld [vmem:[#allocation14 + $0xd20] sm:$0xff] }
 0xdf6   :  { %3452 = vmatprep.subr.mxu1 %v3451_v37  ;;  %3372 = vmatpush1.msra.mxu0 %v3309_v46  ;;  %v3423_v37 = vld [vmem:[#allocation14 + $0xc18] sm:$0xff]  ;;  %v3536_v46 = vld [vmem:[#allocation14 + $0xd28] sm:$0xff] }
 0xdf7   :  { %3405 = vmatprep.mubr.f32.mxu0 %v5743_v20  ;;  %3453 = vmatpush1.msra.mxu1 %v3450_v16  ;;  %v3421_v16 = vld [vmem:[#allocation14 + $0xc08] sm:$0xff] }
 0xdf8   :  { %3406 = vmatmul.mubr.f32.vlgmr.msra.gmra.mxu0 %v3307_v1  ;;  %3454 = vmatprep.subr.mxu1 %v3449_v22  ;;  %v3420_v22 = vld [vmem:[#allocation14 + $0xc00] sm:$0xff]  ;;  %v3673_v1 = vld [vmem:[#allocation14 + $0xef8] sm:$0xff] }
 0xdf9   :  { %3563 = vmatprep.subr.mxu0 %v3562_v44  ;;  %3455 = vmatpush1.msra.mxu1 %v3448_v2  ;;  %v3533_v44 = vld [vmem:[#allocation14 + $0xd10] sm:$0xff]  ;;  %v3532_v2 = vld [vmem:[#allocation14 + $0xd08] sm:$0xff] }
 0xdfa   :  { %3564 = vmatpush1.msra.mxu0 %v3561_v10  ;;  %3456 = vmatprep.subr.mxu1 %v3447_v14  ;;  %v3531_v10 = vld [vmem:[#allocation14 + $0xd00] sm:$0xff]  ;;  %v3672_v14 = vld [vmem:[#allocation14 + $0xef0] sm:$0xff] }
 0xdfb   :  { %3565 = vmatprep.subr.mxu0 %v3560_v36  ;;  %3457 = vmatpush1.msra.mxu1 %v3446_v5  ;;  %v3671_v36 = vld [vmem:[#allocation14 + $0xee8] sm:$0xff]  ;;  %v3784_v5 = vld [vmem:[#allocation14 + $0xff8] sm:$0xff] }
 0xdfc   :  { %3566 = vmatpush1.msra.mxu0 %v3559_v4  ;;  %3458 = vmatprep.subr.mxu1 %v3445_v57  ;;  %v3670_v4 = vld [vmem:[#allocation14 + $0xee0] sm:$0xff]  ;;  %v3783_v57 = vld [vmem:[#allocation14 + $0xff0] sm:$0xff] }
 0xdfd   :  { %3567 = vmatprep.subr.mxu0 %v3558_v23  ;;  %3459 = vmatpush1.msra.mxu1 %v3444_v12  ;;  %v3669_v23 = vld [vmem:[#allocation14 + $0xed8] sm:$0xff]  ;;  %v3782_v12 = vld [vmem:[#allocation14 + $0xfe8] sm:$0xff] }
 0xdfe   :  { %3568 = vmatpush1.msra.mxu0 %v3557_v40  ;;  %3460 = vmatprep.subr.mxu1 %v3443_v27  ;;  %v3668_v40 = vld [vmem:[#allocation14 + $0xed0] sm:$0xff]  ;;  %v3781_v27 = vld [vmem:[#allocation14 + $0xfe0] sm:$0xff] }
 0xdff   :  { %3569 = vmatprep.subr.mxu0 %v3556_v38  ;;  %3461 = vmatpush1.msra.mxu1 %v3442_v30  ;;  %v3780_v38 = vld [vmem:[#allocation14 + $0xfd8] sm:$0xff]  ;;  %v3666_v30 = vld [vmem:[#allocation14 + $0xec0] sm:$0xff] }
 0xe00   :  { %3570 = vmatpush1.msra.mxu0 %v3555_v34  ;;  %3462 = vmatprep.subr.mxu1 %v3441_v28  ;;  %v3779_v34 = vld [vmem:[#allocation14 + $0xfd0] sm:$0xff]  ;;  %v3665_v28 = vld [vmem:[#allocation14 + $0xeb8] sm:$0xff] }
 0xe01   :  { %3571 = vmatprep.subr.mxu0 %v3554_v41  ;;  %3463 = vmatpush1.msra.mxu1 %v3440_v9  ;;  %v3778_v41 = vld [vmem:[#allocation14 + $0xfc8] sm:$0xff]  ;;  %v3664_v9 = vld [vmem:[#allocation14 + $0xeb0] sm:$0xff] }
 0xe02   :  { %3572 = vmatpush1.msra.mxu0 %v3553_v43  ;;  %3464 = vmatprep.subr.mxu1 %v3439_v45  ;;  %v3663_v43 = vld [vmem:[#allocation14 + $0xea8] sm:$0xff]  ;;  %v3776_v45 = vld [vmem:[#allocation14 + $0xfb8] sm:$0xff] }
 0xe03   :  { %3573 = vmatprep.subr.mxu0 %v3552_v47  ;;  %3465 = vmatpush1.msra.mxu1 %v3438_v49  ;;  %v3662_v47 = vld [vmem:[#allocation14 + $0xea0] sm:$0xff]  ;;  %v3775_v49 = vld [vmem:[#allocation14 + $0xfb0] sm:$0xff] }
 0xe04   :  { %3574 = vmatpush1.msra.mxu0 %v3551_v61  ;;  %3466 = vmatprep.subr.mxu1 %v3437_v51  ;;  %v3661_v61 = vld [vmem:[#allocation14 + $0xe98] sm:$0xff]  ;;  %v3774_v51 = vld [vmem:[#allocation14 + $0xfa8] sm:$0xff] }
 0xe05   :  { %3575 = vmatprep.subr.mxu0 %v3550_v0  ;;  %3467 = vmatpush1.msra.mxu1 %v3436_v7  ;;  %v3660_v0 = vld [vmem:[#allocation14 + $0xe90] sm:$0xff]  ;;  %v3773_v7 = vld [vmem:[#allocation14 + $0xfa0] sm:$0xff] }
 0xe06   :  { %3576 = vmatpush1.msra.mxu0 %v3549_v52  ;;  %3468 = vmatprep.subr.mxu1 %v3435_v25  ;;  %v3659_v52 = vld [vmem:[#allocation14 + $0xe88] sm:$0xff]  ;;  %v3772_v25 = vld [vmem:[#allocation14 + $0xf98] sm:$0xff] }
 0xe07   :  { %3577 = vmatprep.subr.mxu0 %v3548_v53  ;;  %3469 = vmatpush1.msra.mxu1 %v3434_v55  ;;  %v3658_v53 = vld [vmem:[#allocation14 + $0xe80] sm:$0xff]  ;;  %v3771_v55 = vld [vmem:[#allocation14 + $0xf90] sm:$0xff] }
 0xe08   :  { %3578 = vmatpush1.msra.mxu0 %v3547_v59  ;;  %3470 = vmatprep.subr.mxu1 %v3433_v3  ;;  %v3657_v59 = vld [vmem:[#allocation14 + $0xe78] sm:$0xff]  ;;  %v3770_v3 = vld [vmem:[#allocation14 + $0xf88] sm:$0xff] }
 0xe09   :  { %3579 = vmatprep.subr.mxu0 %v3546_v6  ;;  %3471 = vmatpush1.msra.mxu1 %v3432_v39  ;;  %v3656_v6 = vld [vmem:[#allocation14 + $0xe70] sm:$0xff]  ;;  %v3769_v39 = vld [vmem:[#allocation14 + $0xf80] sm:$0xff] }
 0xe0a   :  { %3580 = vmatpush1.msra.mxu0 %v3545_v11  ;;  %3472 = vmatprep.subr.mxu1 %v3431_v13  ;;  %v3655_v11 = vld [vmem:[#allocation14 + $0xe68] sm:$0xff]  ;;  %v3768_v13 = vld [vmem:[#allocation14 + $0xf78] sm:$0xff] }
 0xe0b   :  { %3581 = vmatprep.subr.mxu0 %v3544_v15  ;;  %3473 = vmatpush1.msra.mxu1 %v3430_v17  ;;  %v3654_v15 = vld [vmem:[#allocation14 + $0xe60] sm:$0xff]  ;;  %v3767_v17 = vld [vmem:[#allocation14 + $0xf70] sm:$0xff] }
 0xe0c   :  { %3582 = vmatpush1.msra.mxu0 %v3543_v19  ;;  %3474 = vmatprep.subr.mxu1 %v3429_v21  ;;  %v3653_v19 = vld [vmem:[#allocation14 + $0xe58] sm:$0xff]  ;;  %v3766_v21 = vld [vmem:[#allocation14 + $0xf68] sm:$0xff] }
 0xe0d   :  { %3583 = vmatprep.subr.mxu0 %v3542_v42  ;;  %3475 = vmatpush1.msra.mxu1 %v3428_v24  ;;  %v3652_v42 = vld [vmem:[#allocation14 + $0xe50] sm:$0xff]  ;;  %v3765_v24 = vld [vmem:[#allocation14 + $0xf60] sm:$0xff] }
 0xe0e   :  { %3584 = vmatpush1.msra.mxu0 %v3541_v8  ;;  %3476 = vmatprep.subr.mxu1 %v3427_v63  ;;  %v3651_v8 = vld [vmem:[#allocation14 + $0xe48] sm:$0xff]  ;;  %v3764_v63 = vld [vmem:[#allocation14 + $0xf58] sm:$0xff] }
 0xe0f   :  { %3585 = vmatprep.subr.mxu0 %v3540_v26  ;;  %3477 = vmatpush1.msra.mxu1 %v3426_v48  ;;  %v3650_v26 = vld [vmem:[#allocation14 + $0xe40] sm:$0xff]  ;;  %v3763_v48 = vld [vmem:[#allocation14 + $0xf50] sm:$0xff] }
 0xe10   :  { %3586 = vmatpush1.msra.mxu0 %v3539_v29  ;;  %3478 = vmatprep.subr.mxu1 %v3425_v31  ;;  %v3649_v29 = vld [vmem:[#allocation14 + $0xe38] sm:$0xff]  ;;  %v3762_v31 = vld [vmem:[#allocation14 + $0xf48] sm:$0xff] }
 0xe11   :  { %3587 = vmatprep.subr.mxu0 %v3538_v33  ;;  %3479 = vmatpush1.msra.mxu1 %v3424_v54  ;;  %v3648_v33 = vld [vmem:[#allocation14 + $0xe30] sm:$0xff]  ;;  %v3761_v54 = vld [vmem:[#allocation14 + $0xf40] sm:$0xff] }
 0xe12   :  { %3588 = vmatpush1.msra.mxu0 %v3537_v35  ;;  %3480 = vmatprep.subr.mxu1 %v3423_v37  ;;  %v3647_v35 = vld [vmem:[#allocation14 + $0xe28] sm:$0xff]  ;;  %v3760_v37 = vld [vmem:[#allocation14 + $0xf38] sm:$0xff] }
 0xe13   :  { %3589 = vmatprep.subr.mxu0 %v3536_v46  ;;  %3481 = vmatpush1.msra.mxu1 %v3422_v50  ;;  %v3646_v46 = vld [vmem:[#allocation14 + $0xe20] sm:$0xff]  ;;  %v3759_v50 = vld [vmem:[#allocation14 + $0xf30] sm:$0xff] }
 0xe14   :  { %3590 = vmatpush1.msra.mxu0 %v3535_v58  ;;  %3482 = vmatprep.subr.mxu1 %v3421_v16  ;;  %v3645_v58 = vld [vmem:[#allocation14 + $0xe18] sm:$0xff]  ;;  %v3758_v16 = vld [vmem:[#allocation14 + $0xf28] sm:$0xff] }
 0xe15   :  { %3591 = vmatprep.subr.mxu0 %v3534_v62  ;;  %3483 = vmatpush1.msra.mxu1 %v3420_v22  ;;  %v3644_v62 = vld [vmem:[#allocation14 + $0xe10] sm:$0xff]  ;;  %v3757_v22 = vld [vmem:[#allocation14 + $0xf20] sm:$0xff] }
 0xe16   :  { %3516 = vmatprep.mubr.f32.mxu1 %v5743_v20  ;;  %3592 = vmatpush1.msra.mxu0 %v3533_v44  ;;  %v3643_v44 = vld [vmem:[#allocation14 + $0xe08] sm:$0xff] }
 0xe17   :  { %3517 = vmatmul.mubr.f32.vlgmr.msra.gmra.mxu1 %v5583_v32  ;;  %3593 = vmatprep.subr.mxu0 %v3532_v2  ;;  %v3667_v32 = vld [vmem:[#allocation14 + $0xec8] sm:$0xff]  ;;  %v3756_v2 = vld [vmem:[#allocation14 + $0xf18] sm:$0xff] }
 0xe18   :  { %3674 = vmatprep.subr.mxu1 %v3673_v1  ;;  %3594 = vmatpush1.msra.mxu0 %v3531_v10  ;;  %v3642_v1 = vld [vmem:[#allocation14 + $0xe00] sm:$0xff]  ;;  %v3755_v10 = vld [vmem:[#allocation14 + $0xf10] sm:$0xff] }
 0xe19   :  { %3627 = vmatprep.mubr.f32.mxu0 %v5743_v20  ;;  %3675 = vmatpush1.msra.mxu1 %v3672_v14  ;;  %v3754_v14 = vld [vmem:[#allocation14 + $0xf08] sm:$0xff] }
 0xe1a   :  { %3628 = vmatmul.mubr.f32.vlgmr.msra.gmra.mxu0 %v5586_v56  ;;  %3676 = vmatprep.subr.mxu1 %v3671_v36  ;;  %v3777_v56 = vld [vmem:[#allocation14 + $0xfc0] sm:$0xff] }
 0xe1b   :  { %3785 = vmatprep.subr.mxu0 %v3784_v5  ;;  %3677 = vmatpush1.msra.mxu1 %v3670_v4  ;;  %v3753_v36 = vld [vmem:[#allocation14 + $0xf00] sm:$0xff] }
 0xe1c   :  { %3786 = vmatpush1.msra.mxu0 %v3783_v57  ;;  %3678 = vmatprep.subr.mxu1 %v3669_v23  ;;  %v3903_v5 = vld [vmem:[#allocation17 + $0xf8] sm:$0xff]  ;;  %v3902_v57 = vld [vmem:[#allocation17 + $0xf0] sm:$0xff] }
 0xe1d   :  { %3787 = vmatprep.subr.mxu0 %v3782_v12  ;;  %3679 = vmatpush1.msra.mxu1 %v3668_v40  ;;  %v3887_v4 = vld [vmem:[#allocation17 + $0x78] sm:$0xff]  ;;  %v3886_v23 = vld [vmem:[#allocation17 + $0x70] sm:$0xff]  ;;  %v3901_v12 = vld [vmem:[#allocation17 + $0xe8] sm:$0xff] }
 0xe1e   :  { %3788 = vmatpush1.msra.mxu0 %v3781_v27  ;;  %3680 = vmatprep.subr.mxu1 %v3667_v32  ;;  %v3885_v40 = vld [vmem:[#allocation17 + $0x68] sm:$0xff]  ;;  %v3900_v27 = vld [vmem:[#allocation17 + $0xe0] sm:$0xff] }
 0xe1f   :  { %3789 = vmatprep.subr.mxu0 %v3780_v38  ;;  %3681 = vmatpush1.msra.mxu1 %v3666_v30  ;;  %v3884_v32 = vld [vmem:[#allocation17 + $0x60] sm:$0xff]  ;;  %v3883_v38 = vld [vmem:[#allocation17 + $0x58] sm:$0xff]  ;;  %v3897_v30 = vld [vmem:[#allocation17 + $0xc8] sm:$0xff] }
 0xe20   :  { %3790 = vmatpush1.msra.mxu0 %v3779_v34  ;;  %3682 = vmatprep.subr.mxu1 %v3665_v28  ;;  %v3881_v34 = vld [vmem:[#allocation17 + $0x48] sm:$0xff]  ;;  %v3896_v28 = vld [vmem:[#allocation17 + $0xc0] sm:$0xff] }
 0xe21   :  { %3791 = vmatprep.subr.mxu0 %v3778_v41  ;;  %3683 = vmatpush1.msra.mxu1 %v3664_v9  ;;  %v3880_v41 = vld [vmem:[#allocation17 + $0x40] sm:$0xff]  ;;  %v3895_v9 = vld [vmem:[#allocation17 + $0xb8] sm:$0xff] }
 0xe22   :  { %3792 = vmatpush1.msra.mxu0 %v3777_v56  ;;  %3684 = vmatprep.subr.mxu1 %v3663_v43  ;;  %v3879_v56 = vld [vmem:[#allocation17 + $0x38] sm:$0xff]  ;;  %v3894_v43 = vld [vmem:[#allocation17 + $0xb0] sm:$0xff] }
 0xe23   :  { %3793 = vmatprep.subr.mxu0 %v3776_v45  ;;  %3685 = vmatpush1.msra.mxu1 %v3662_v47  ;;  %v3878_v45 = vld [vmem:[#allocation17 + $0x30] sm:$0xff]  ;;  %v3893_v47 = vld [vmem:[#allocation17 + $0xa8] sm:$0xff] }
 0xe24   :  { %3794 = vmatpush1.msra.mxu0 %v3775_v49  ;;  %3686 = vmatprep.subr.mxu1 %v3661_v61  ;;  %v3877_v49 = vld [vmem:[#allocation17 + $0x28] sm:$0xff]  ;;  %v3892_v61 = vld [vmem:[#allocation17 + $0xa0] sm:$0xff] }
 0xe25   :  { %3795 = vmatprep.subr.mxu0 %v3774_v51  ;;  %3687 = vmatpush1.msra.mxu1 %v3660_v0  ;;  %v3876_v51 = vld [vmem:[#allocation17 + $0x20] sm:$0xff]  ;;  %v3891_v0 = vld [vmem:[#allocation17 + $0x98] sm:$0xff] }
 0xe26   :  { %3796 = vmatpush1.msra.mxu0 %v3773_v7  ;;  %3688 = vmatprep.subr.mxu1 %v3659_v52  ;;  %v3875_v7 = vld [vmem:[#allocation17 + $0x18] sm:$0xff]  ;;  %v3890_v52 = vld [vmem:[#allocation17 + $0x90] sm:$0xff] }
 0xe27   :  { %3797 = vmatprep.subr.mxu0 %v3772_v25  ;;  %3689 = vmatpush1.msra.mxu1 %v3658_v53  ;;  %v3874_v25 = vld [vmem:[#allocation17 + $0x10] sm:$0xff]  ;;  %v3889_v53 = vld [vmem:[#allocation17 + $0x88] sm:$0xff] }
 0xe28   :  { %3798 = vmatpush1.msra.mxu0 %v3771_v55  ;;  %3690 = vmatprep.subr.mxu1 %v3657_v59  ;;  %v3873_v55 = vld [vmem:[#allocation17 + $0x8] sm:$0xff]  ;;  %v3888_v59 = vld [vmem:[#allocation17 + $0x80] sm:$0xff] }
 0xe29   :  { %3799 = vmatprep.subr.mxu0 %v3770_v3  ;;  %3691 = vmatpush1.msra.mxu1 %v3656_v6  ;;  %v3872_v3 = vld [vmem:[#allocation17] sm:$0xff]  ;;  %v2230_v6 = vpop.f32.mrf.mxu1 }
 0xe2a   :  { %3800 = vmatpush1.msra.mxu0 %v3769_v39  ;;  %3692 = vmatprep.subr.mxu1 %v3655_v11  ;;  %v2301_v11 = vpop.f32.mrf.mxu0 }
 0xe2b   :  { %3801 = vmatprep.subr.mxu0 %v3768_v13  ;;  %3693 = vmatpush1.msra.mxu1 %v3654_v15  ;;  %v2232_v39 = vpop.f32.mrf.mxu1 }
 0xe2c   :  { %3802 = vmatpush1.msra.mxu0 %v3767_v17  ;;  %3694 = vmatprep.subr.mxu1 %v3653_v19  ;;  %v2303_v15 = vpop.f32.mrf.mxu0  ;;  %v2302_v17 = vadd.f32 %v2301_v11, %v2230_v6 }
 0xe2d   :  { %3803 = vmatprep.subr.mxu0 %v3766_v21  ;;  %3695 = vmatpush1.msra.mxu1 %v3652_v42  ;;  %v2410_v13 = vpop.f32.mrf.mxu1  ;;  %v2304_v42 = vadd.f32 %v2303_v15, %v2232_v39 }
 0xe2e   :  { %3804 = vmatpush1.msra.mxu0 %v3765_v24  ;;  %3696 = vmatprep.subr.mxu1 %v3651_v8  ;;  %v2415_v24 = vadd.f32 %v2410_v13, %v2302_v17 }
 0xe2f   :  { %3805 = vmatprep.subr.mxu0 %v3764_v63  ;;  %3697 = vmatpush1.msra.mxu1 %v3650_v26  ;;  %v2412_v19 = vpop.f32.mrf.mxu1 }
 0xe30   :  { %3806 = vmatpush1.msra.mxu0 %v3763_v48  ;;  %3698 = vmatprep.subr.mxu1 %v3649_v29  ;;  %v2521_v21 = vpop.f32.mrf.mxu0  ;;  %v2416_v63 = vadd.f32 %v2412_v19, %v2304_v42  ;;  %v4038_v42 = vld [vmem:[#allocation19] ss:$0 sm:$0xff] }
 0xe31   :  { %3807 = vmatprep.subr.mxu0 %v3762_v31  ;;  %3699 = vmatpush1.msra.mxu1 %v3648_v33  ;;  %v2526_v48 = vadd.f32 %v2521_v21, %v2415_v24 }
 0xe32   :  { %3808 = vmatpush1.msra.mxu0 %v3761_v54  ;;  %3700 = vmatprep.subr.mxu1 %v3647_v35  ;;  %v2523_v26 = vpop.f32.mrf.mxu0 }
 0xe33   :  { %3809 = vmatprep.subr.mxu0 %v3760_v37  ;;  %3701 = vmatpush1.msra.mxu1 %v3646_v46  ;;  %v2527_v33 = vadd.f32 %v2523_v26, %v2416_v63 }
 0xe34   :  { %3810 = vmatpush1.msra.mxu0 %v3759_v50  ;;  %3702 = vmatprep.subr.mxu1 %v3645_v58 }
 0xe35   :  { %3811 = vmatprep.subr.mxu0 %v3758_v16  ;;  %3703 = vmatpush1.msra.mxu1 %v3644_v62 }
 0xe36   :  { %3812 = vmatpush1.msra.mxu0 %v3757_v22  ;;  %3704 = vmatprep.subr.mxu1 %v3643_v44 }
 0xe37   :  { %3813 = vmatprep.subr.mxu0 %v3756_v2  ;;  %3705 = vmatpush1.msra.mxu1 %v3642_v1 }
 0xe38   :  { %3738 = vmatprep.mubr.f32.mxu1 %v5743_v20  ;;  %3814 = vmatpush1.msra.mxu0 %v3755_v10 }
 0xe39   :  { %3739 = vmatmul.mubr.f32.vlgmr.msra.gmra.mxu1 %v5589_v60  ;;  %3815 = vmatprep.subr.mxu0 %v3754_v14  ;;  %v3899_v60 = vld [vmem:[#allocation17 + $0xd8] sm:$0xff] }
 0xe3a   :  { %3816 = vmatpush1.msra.mxu0 %v3753_v36  ;;  %3849 = vmatprep.mubr.f32.mxu0 %v5743_v20  ;;  %v3898_v20 = vld [vmem:[#allocation17 + $0xd0] sm:$0xff] }
 0xe3b   :  { %3850 = vmatmul.mubr.f32.vlgmr.msra.gmra.mxu0 %v5592_v18  ;;  %4115 = vmatprep.subr.mxu1 %v3903_v5  ;;  %v3882_v18 = vld [vmem:[#allocation17 + $0x50] sm:$0xff] }
 0xe3c   :  { %4116 = vmatpush3.msra.mxu1 %v3887_v4 }
 0xe3d   :  { %4117 = vmatprep.subr.mxu1 %v3902_v57 }
 0xe3e   :  { %4118 = vmatpush3.msra.mxu1 %v3886_v23 }
 0xe3f   :  { %4119 = vmatprep.subr.mxu1 %v3901_v12 }
 0xe40   :  { %4120 = vmatpush3.msra.mxu1 %v3885_v40 }
 0xe41   :  { %4121 = vmatprep.subr.mxu1 %v3900_v27 }
 0xe42   :  { %4122 = vmatpush3.msra.mxu1 %v3884_v32 }
 0xe43   :  { %4123 = vmatprep.subr.mxu1 %v3899_v60 }
 0xe44   :  { %4124 = vmatpush3.msra.mxu1 %v3883_v38 }
 0xe45   :  { %4125 = vmatprep.subr.mxu1 %v3898_v20 }
 0xe46   :  { %4126 = vmatpush3.msra.mxu1 %v3882_v18 }
 0xe47   :  { %4127 = vmatprep.subr.mxu1 %v3897_v30 }
 0xe48   :  { %4128 = vmatpush3.msra.mxu1 %v3881_v34 }
 0xe49   :  { %4129 = vmatprep.subr.mxu1 %v3896_v28 }
 0xe4a   :  { %4130 = vmatpush3.msra.mxu1 %v3880_v41 }
 0xe4b   :  { %4131 = vmatprep.subr.mxu1 %v3895_v9 }
 0xe4c   :  { %4132 = vmatpush3.msra.mxu1 %v3879_v56 }
 0xe4d   :  { %4133 = vmatprep.subr.mxu1 %v3894_v43  ;;  %v5834_v43 = vlaneseq }
 0xe4e   :  { %4134 = vmatpush3.msra.mxu1 %v3878_v45 }
 0xe4f   :  { %4135 = vmatprep.subr.mxu1 %v3893_v47  ;;  %v2632_v8 = vpop.f32.mrf.mxu1  ;;  %v3861_v45 = vshrl.u32 %v5834_v43, 7 }
 0xe50   :  { %4136 = vmatpush3.msra.mxu1 %v3877_v49  ;;  %v2637_v54 = vadd.f32 %v2632_v8, %v2526_v48 }
 0xe51   :  { %4137 = vmatprep.subr.mxu1 %v3892_v61  ;;  %v2634_v29 = vpop.f32.mrf.mxu1 }
 0xe52   :  { %4138 = vmatpush3.msra.mxu1 %v3876_v51  ;;  %v2743_v31 = vpop.f32.mrf.mxu0  ;;  %v2638_v37 = vadd.f32 %v2634_v29, %v2527_v33  ;;  %v3866_v51 = vsub.s32 1, %v3861_v45 }
 0xe53   :  { %4139 = vmatprep.subr.mxu1 %v3891_v0  ;;  %v2748_v50 = vadd.f32 %v2743_v31, %v2637_v54 }
 0xe54   :  { %4140 = vmatpush3.msra.mxu1 %v3875_v7  ;;  %v2745_v46 = vpop.f32.mrf.mxu0  ;;  %v3862_v7 = vsub.s32 0, %v3861_v45 }
 0xe55   :  { %4141 = vmatprep.subr.mxu1 %v3890_v52  ;;  %v2749_v62 = vadd.f32 %v2745_v46, %v2638_v37 }
 0xe56   :  { %4142 = vmatpush3.msra.mxu1 %v3874_v25 }
 0xe57   :  { %4143 = vmatprep.subr.mxu1 %v3889_v53  ;;  %v3858_v53 = vld [vmem:[#allocation16] sm:$0x3] }
 0xe58   :  { %4144 = vmatpush3.msra.mxu1 %v3873_v55  ;;  %v3867_v6 = vrot.slane %v3858_v53, %v3866_v51  ;;  %v3863_v11 = vrot.slane %v3858_v53, %v3862_v7 }
 0xe59   :  { %4145 = vmatprep.subr.mxu1 %v3888_v59 }
 0xe5a   :  { %4146 = vmatpush3.msra.mxu1 %v3872_v3 }
 0xe71   :  { %v2854_v35 = vpop.f32.mrf.mxu1 }
 0xe72   :  { %v2859_v22 = vadd.f32 %v2854_v35, %v2748_v50 }
 0xe73   :  { %v2856_v58 = vpop.f32.mrf.mxu1 }
 0xe74   :  { %v2965_v16 = vpop.f32.mrf.mxu0  ;;  %v2860_v2 = vadd.f32 %v2856_v58, %v2749_v62 }
 0xe75   :  { %v2970_v10 = vadd.f32 %v2965_v16, %v2859_v22 }
 0xe76   :  { %v2967_v1 = vpop.f32.mrf.mxu0 }
 0xe77   :  { %v2971_v5 = vadd.f32 %v2967_v1, %v2860_v2 }
 0xe93   :  { %v3075_v44 = vpop.f32.mrf.mxu1 }
 0xe94   :  { %v3080_v4 = vadd.f32 %v3075_v44, %v2970_v10 }
 0xe95   :  { %v3077_v14 = vpop.f32.mrf.mxu1 }
 0xe96   :  { %v3185_v36 = vpop.f32.mrf.mxu0  ;;  %v3081_v23 = vadd.f32 %v3077_v14, %v2971_v5 }
 0xe97   :  { %v3190_v40 = vadd.f32 %v3185_v36, %v3080_v4 }
 0xe98   :  { %v3187_v12 = vpop.f32.mrf.mxu0 }
 0xe99   :  { %v3191_v60 = vadd.f32 %v3187_v12, %v3081_v23 }
 0xeb5   :  { %v3296_v57 = vpop.f32.mrf.mxu1 }
 0xeb6   :  { %v3301_v38 = vadd.f32 %v3296_v57, %v3190_v40 }
 0xeb7   :  { %v3298_v27 = vpop.f32.mrf.mxu1 }
 0xeb8   :  { %v3407_v32 = vpop.f32.mrf.mxu0  ;;  %v3302_v18 = vadd.f32 %v3298_v27, %v3191_v60 }
 0xeb9   :  { %v3412_v34 = vadd.f32 %v3407_v32, %v3301_v38 }
 0xeba   :  { %v3409_v30 = vpop.f32.mrf.mxu0 }
 0xebb   :  { %v3413_v9 = vadd.f32 %v3409_v30, %v3302_v18 }
 0xed7   :  { %v3518_v20 = vpop.f32.mrf.mxu1 }
 0xed8   :  { %v3523_v56 = vadd.f32 %v3518_v20, %v3412_v34 }
 0xed9   :  { %v3520_v28 = vpop.f32.mrf.mxu1 }
 0xeda   :  { %v3629_v41 = vpop.f32.mrf.mxu0  ;;  %v3524_v47 = vadd.f32 %v3520_v28, %v3413_v9 }
 0xedb   :  { %v3634_v61 = vadd.f32 %v3629_v41, %v3523_v56 }
 0xedc   :  { %v3631_v49 = vpop.f32.mrf.mxu0 }
 0xedd   :  { %v3635_v52 = vadd.f32 %v3631_v49, %v3524_v47 }
 0xef9   :  { %v3740_v0 = vpop.f32.mrf.mxu1 }
 0xefa   :  { %v3745_v25 = vadd.f32 %v3740_v0, %v3634_v61 }
 0xefb   :  { %v3742_v55 = vpop.f32.mrf.mxu1  ;;  %v3851_v59 = vpop.f32.mrf.mxu0 }
 0xefc   :  { %v3746_v3 = vadd.f32 %v3742_v55, %v3635_v52  ;;  %v3856_v39 = vadd.f32 %v3851_v59, %v3745_v25 }
 0xefd   :  { %v3853_v13 = vpop.f32.mrf.mxu0 }
 0xefe   :  { %v3857_v15 = vadd.f32 %v3853_v13, %v3746_v3  ;;  %v3870_v19 = vadd.f32 %v3863_v11, %v3856_v39 }
 0xf00   :  { %v3871_v17 = vadd.f32 %v3867_v6, %v3857_v15 }
 0xf02   :  { %3975 = vmatprep.mubr.f32.mxu1 %v3871_v17 }
 0xf03   :  { %3976 = vmatmul.mubr.f32.vlgmr.msra.gmra.mxu1 %v3870_v19 }
 0xfc3   :  { %v4147_v21 = vpop.f32.mrf.mxu1 }
 0xfc5   :  { %v4148_v24 = vpop.f32.mrf.mxu1 }
 0xfc6   :  { %v4149_v8 = vadd.f32 %v4148_v24, %v4147_v21 }
 0xfc8   :  { %v3978_v63 = vadd.f32 %v4149_v8, %v4038_v42 }
 0xfca   :  { %3981 = vst [vmem:[#allocation20] sm:$0x3] %v3978_v63 }
 0xfcb   :  { %4513 = shalt.err (!%p4510_p3)
}
 0xfcc   :  { %3991 = dma.vmem_to_hbm [thread:$0]  %s3989_s30, 32, %s5652_s15, [#allocation4]  }
 0xfcd   :  { %4534 = dma.done.wait [#allocation4], 32  }
 0xfce   :  { %4535 = vsyncadd [#allocation4], 4294967264 }
 0xfcf   :  { %3995 = vsyncpa [#allocation3], 1 }
 0xfd0   :  { %3996 = vsyncpa [#allocation6], 1 }
 0xfd1   :  { %3997 = vsyncpa [#allocation9], 1 }
 0xfd2   :  { %3998 = vsyncpa [#allocation12], 1 }
 0xfd3   :  { %3999 = vsyncpa [#allocation15], 1 }
 0xfd4   :  { %4000 = vsyncpa [#allocation18], 1 }
 0xfd5   :  { %4001 = vsyncpa [#allocation4], 1 }

</bundles_post_ra>
